<compile_context>
chip_gen: v7x
topology: tpu7x:2x2x1
jax: 0.10.0
libtpu: 0.0.40
codegen_flags: <defaults>
</compile_context>

<pallas_src>
import jax
import jax.numpy as jnp
from jax.experimental import pallas as pl
from jax.experimental.pallas import tpu as pltpu


_VMEM_LIMIT = 32 * 1024 * 1024   # explicit scoped-VMEM limit; safe on v5e/v6e/v7x


# ----------------------------- Pallas kernel -------------------------------

def _filter_fused_kernel(r_ref, noise_ref,
                         w1_ref, b1_ref, w2_ref, b2_ref, w3_ref, b3_ref,
                         z_ref, lam_ref):
    """Fused FilterEstimator forward for one spatial tile.

    r_ref / noise_ref: (N, TS, C) fp32.  Computes per-(spatial, channel) batch
    mean / unbiased std, the 1x1-conv MLP gate lambda, and Z = R*lam + (1-lam)*eps.
    """
    r = r_ref[...]                                    # (N, TS, C) fp32
    n, ts, c = r.shape

    # --- per-(h, w, c) batch statistics (ddof=1, matching torch.std default) ---
    mean = jnp.mean(r, axis=0)                        # (TS, C)
    diff = r - mean[None]
    var = jnp.sum(diff * diff, axis=0) * (1.0 / (n - 1))
    std = jnp.sqrt(var)                               # (TS, C)

    # --- per-pixel MLP (three 1x1 convs) on the MXU, bf16 operands / fp32 acc ---
    x = r.reshape(n * ts, c).astype(jnp.bfloat16)
    h = jnp.dot(x, w1_ref[...], preferred_element_type=jnp.float32) + b1_ref[...]
    h = jnp.maximum(h, 0.0)                           # ReLU
    h = jnp.dot(h.astype(jnp.bfloat16), w2_ref[...],
                preferred_element_type=jnp.float32) + b2_ref[...]
    h = jnp.maximum(h, 0.0)                           # ReLU
    h = jnp.dot(h.astype(jnp.bfloat16), w3_ref[...],
                preferred_element_type=jnp.float32) + b3_ref[...]
    h = jnp.clip(h, -5.0, 5.0)                        # self.bound = 5
    lam = (1.0 / (1.0 + jnp.exp(-h))).reshape(n, ts, c)   # sigmoid in fp32 (EUP exp)

    # --- eps affine + stochastic gate (all fp32, all in VMEM) ---
    eps = noise_ref[...] * std[None] + mean[None]     # eps = randn * std_r + m_r
    z_ref[...] = r * lam + (1.0 - lam) * eps
    lam_ref[...] = lam


# --------------------------- pallas_call wrapper ----------------------------

def _pick_spatial_tile(hw, cap=1024):
    """Largest tile that divides hw; full extent if hw fits, else a multiple of 8."""
    if hw <= cap:
        return hw
    for t in range(min(cap, hw), 7, -1):
        if hw % t == 0 and t % 8 == 0:
            return t
    return hw   # fallback: single full-extent tile


def filter_estimator_forward(r_nchw, params, noise_nhwc, *, tile_cap=1024):
    """FilterEstimator.forward (param_dict=None).  Returns (Z, lambda_) in NCHW."""
    n, c, h, w = r_nchw.shape
    assert n >= 2, "unbiased batch std (ddof=1) requires batch >= 2"
    hw = h * w
    w1, b1, w2, b2, w3, b3 = params

    # NCHW -> (N, HW, C): channels-last so C lands on the 128-lane axis.
    r3 = jnp.transpose(r_nchw, (0, 2, 3, 1)).astype(jnp.float32).reshape(n, hw, c)
    noise3 = noise_nhwc.astype(jnp.float32).reshape(n, hw, c)

    tile_s = _pick_spatial_tile(hw, tile_cap)
    grid = (hw // tile_s,)

    row_spec = pl.BlockSpec((n, tile_s, c), lambda s: (0, s, 0))

    def const_spec(p):
        # Full-array block with constant index -> stays resident in VMEM across grid.
        return pl.BlockSpec(p.shape, lambda s: (0, 0))

    out_shape = (jax.ShapeDtypeStruct((n, hw, c), jnp.float32),
                 jax.ShapeDtypeStruct((n, hw, c), jnp.float32))

    z3, lam3 = pl.pallas_call(
        _filter_fused_kernel,
        out_shape=out_shape,
        grid=grid,
        in_specs=[row_spec, row_spec,
                  const_spec(w1), const_spec(b1),
                  const_spec(w2), const_spec(b2),
                  const_spec(w3), const_spec(b3)],
        out_specs=(row_spec, row_spec),
        compiler_params=pltpu.CompilerParams(
            dimension_semantics=("parallel",),   # shards spatial tiles across TCs
            vmem_limit_bytes=_VMEM_LIMIT),
    )(r3, noise3, w1, b1, w2, b2, w3, b3)

    z = jnp.transpose(z3.reshape(n, h, w, c), (0, 3, 1, 2))
    lam = jnp.transpose(lam3.reshape(n, h, w, c), (0, 3, 1, 2))
    return z, lam


# ------------------------------ JAX reference --------------------------------

def reference_forward(r_nchw, params, noise_nhwc):
    """Pure-JAX (non-Pallas) reference with identical math, for cross-checking."""
    w1, b1, w2, b2, w3, b3 = [p.astype(jnp.float32) for p in params]
    r = jnp.transpose(r_nchw, (0, 2, 3, 1)).astype(jnp.float32)    # NHWC
    m_r = jnp.mean(r, axis=0)
    std_r = jnp.std(r, axis=0, ddof=1)
    h = jnp.maximum(r @ w1 + b1, 0.0)
    h = jnp.maximum(h @ w2 + b2, 0.0)
    h = jnp.clip(h @ w3 + b3, -5.0, 5.0)
    lam = jax.nn.sigmoid(h)
    eps = noise_nhwc * std_r + m_r
    z = r * lam + (1.0 - lam) * eps
    return (jnp.transpose(z, (0, 3, 1, 2)),
            jnp.transpose(lam, (0, 3, 1, 2)))


# ------------------------- deterministic parameters -------------------------

def init_params(key, in_c):
    """1x1-conv weights as (Cin, Cout) matrices; weights bf16 (MXU), biases fp32."""
    c1 = in_c // 2          # conv1: in_c -> in_c // 2
    c2 = in_c * 2           # conv2: in_c // 2 -> 2 * in_c
    k = jax.random.split(key, 6)
    w1 = (0.1 * jax.random.normal(k[0], (in_c, c1))).astype(jnp.bfloat16)
    b1 = (0.01 * jax.random.normal(k[1], (1, c1))).astype(jnp.float32)
    w2 = (0.1 * jax.random.normal(k[2], (c1, c2))).astype(jnp.bfloat16)
    b2 = (0.01 * jax.random.normal(k[3], (1, c2))).astype(jnp.float32)
    w3 = (0.1 * jax.random.normal(k[4], (c2, in_c))).astype(jnp.bfloat16)
    b3 = (0.01 * jax.random.normal(k[5], (1, in_c))).astype(jnp.float32)
    return (w1, b1, w2, b2, w3, b3)


# ----------------------------------- main -----------------------------------

if __name__ == "__main__":
    key = jax.random.PRNGKey(0)
    k_x, k_p, k_n = jax.random.split(key, 3)

    # Small but lane-dense demo: batch=2, in_c=128, 16x16 spatial (NCHW like PyTorch).
    N, C, H, W = 2, 128, 16, 16
    r_nchw = jax.random.normal(k_x, (N, C, H, W), dtype=jnp.float32)
    params = init_params(k_p, C)
    noise_nhwc = jax.random.normal(k_n, (N, H, W, C), dtype=jnp.float32)

    fwd = jax.jit(filter_estimator_forward)
    z, lam = fwd(r_nchw, params, noise_nhwc)
    jax.block_until_ready((z, lam))

    assert z.shape == (N, C, H, W) and lam.shape == (N, C, H, W)
    assert bool(jnp.all(jnp.isfinite(z))) and bool(jnp.all(jnp.isfinite(lam)))
    assert bool(jnp.all(lam >= 0.0)) and bool(jnp.all(lam <= 1.0))

    # Cross-check against the pure-JAX reference (same noise / same bf16 weights);
    # tolerance accounts for bf16 matmul operands in the Pallas path.
    z_ref, lam_ref = reference_forward(r_nchw, params, noise_nhwc)
    assert float(jnp.max(jnp.abs(lam - lam_ref))) < 5e-2
    assert float(jnp.max(jnp.abs(z - z_ref))) < 2.5e-1

    print("KERNEL_OK")
</pallas_src>

<mosaic_0001>
module attributes {stable_mosaic.version = 11 : i64} {
  func.func @_filter_fused_kernel(%arg0: i32, %arg1: memref<2x256x128xf32, #tpu.memory_space<vmem>>, %arg2: memref<2x256x128xf32, #tpu.memory_space<vmem>>, %arg3: memref<128x64xbf16, #tpu.memory_space<vmem>>, %arg4: memref<1x64xf32, #tpu.memory_space<vmem>>, %arg5: memref<64x256xbf16, #tpu.memory_space<vmem>>, %arg6: memref<1x256xf32, #tpu.memory_space<vmem>>, %arg7: memref<256x128xbf16, #tpu.memory_space<vmem>>, %arg8: memref<1x128xf32, #tpu.memory_space<vmem>>, %arg9: memref<2x256x128xf32, #tpu.memory_space<vmem>>, %arg10: memref<2x256x128xf32, #tpu.memory_space<vmem>>) attributes {dimension_semantics = [#tpu.dimension_semantics<parallel>], iteration_bounds = array<i64: 1>, scalar_prefetch = 0 : i64, scratch_operands = 0 : i64, tpu.core_type = #tpu.core_type<tc>, window_params = [{transform_indices = @transform_0, window_bounds = array<i64: 2, 256, 128>}, {transform_indices = @transform_1, window_bounds = array<i64: 2, 256, 128>}, {pipeline_mode = #tpu.pipeline_mode<synchronous>, transform_indices = @transform_2, window_bounds = array<i64: 128, 64>}, {pipeline_mode = #tpu.pipeline_mode<synchronous>, transform_indices = @transform_3, window_bounds = array<i64: 1, 64>}, {pipeline_mode = #tpu.pipeline_mode<synchronous>, transform_indices = @transform_4, window_bounds = array<i64: 64, 256>}, {pipeline_mode = #tpu.pipeline_mode<synchronous>, transform_indices = @transform_5, window_bounds = array<i64: 1, 256>}, {pipeline_mode = #tpu.pipeline_mode<synchronous>, transform_indices = @transform_6, window_bounds = array<i64: 256, 128>}, {pipeline_mode = #tpu.pipeline_mode<synchronous>, transform_indices = @transform_7, window_bounds = array<i64: 1, 128>}, {transform_indices = @transform_8, window_bounds = array<i64: 2, 256, 128>}, {transform_indices = @transform_9, window_bounds = array<i64: 2, 256, 128>}]} {
    %c0 = arith.constant 0 : index
    %c0_0 = arith.constant 0 : index
    %c0_1 = arith.constant 0 : index
    %0 = vector.load %arg1[%c0, %c0_0, %c0_1] : memref<2x256x128xf32, #tpu.memory_space<vmem>>, vector<2x256x128xf32>
    %cst = arith.constant dense<0.000000e+00> : vector<256x128xf32>
    %1 = vector.multi_reduction <add>, %0, %cst [0] : vector<2x256x128xf32> to vector<256x128xf32>
    %cst_2 = arith.constant 2.000000e+00 : f32
    %2 = vector.broadcast %cst_2 : f32 to vector<256x128xf32>
    %3 = arith.divf %1, %2 : vector<256x128xf32>
    %4 = vector.shape_cast %3 : vector<256x128xf32> to vector<1x256x128xf32>
    %5 = vector.broadcast %4 : vector<1x256x128xf32> to vector<2x256x128xf32>
    %6 = arith.subf %0, %5 : vector<2x256x128xf32>
    %7 = arith.mulf %6, %6 : vector<2x256x128xf32>
    %cst_3 = arith.constant dense<0.000000e+00> : vector<256x128xf32>
    %8 = vector.multi_reduction <add>, %7, %cst_3 [0] : vector<2x256x128xf32> to vector<256x128xf32>
    %cst_4 = arith.constant 1.000000e+00 : f32
    %9 = vector.broadcast %cst_4 : f32 to vector<256x128xf32>
    %10 = arith.mulf %8, %9 : vector<256x128xf32>
    %11 = math.sqrt %10 : vector<256x128xf32>
    %12 = vector.shape_cast %0 : vector<2x256x128xf32> to vector<512x128xf32>
    %13 = arith.truncf %12 : vector<512x128xf32> to vector<512x128xbf16>
    %c0_5 = arith.constant 0 : index
    %c0_6 = arith.constant 0 : index
    %14 = vector.load %arg3[%c0_5, %c0_6] : memref<128x64xbf16, #tpu.memory_space<vmem>>, vector<128x64xbf16>
    %cst_7 = arith.constant dense<0.000000e+00> : vector<512x64xf32>
    %15 = tpu.matmul %13, %14, %cst_7 {dimension_numbers = #tpu.dot_dimension_numbers<[1], [0], [0], [1], [0, 0, 1, 1], [], []>} : vector<512x128xbf16>, vector<128x64xbf16>, vector<512x64xf32> -> vector<512x64xf32>
    %c0_8 = arith.constant 0 : index
    %c0_9 = arith.constant 0 : index
    %16 = vector.load %arg4[%c0_8, %c0_9] : memref<1x64xf32, #tpu.memory_space<vmem>>, vector<1x64xf32>
    %17 = vector.broadcast %16 : vector<1x64xf32> to vector<512x64xf32>
    %18 = arith.addf %15, %17 : vector<512x64xf32>
    %cst_10 = arith.constant 0.000000e+00 : f32
    %19 = vector.broadcast %cst_10 : f32 to vector<512x64xf32>
    %20 = arith.maximumf %18, %19 : vector<512x64xf32>
    %21 = arith.truncf %20 : vector<512x64xf32> to vector<512x64xbf16>
    %c0_11 = arith.constant 0 : index
    %c0_12 = arith.constant 0 : index
    %22 = vector.load %arg5[%c0_11, %c0_12] : memref<64x256xbf16, #tpu.memory_space<vmem>>, vector<64x256xbf16>
    %cst_13 = arith.constant dense<0.000000e+00> : vector<512x256xf32>
    %23 = tpu.matmul %21, %22, %cst_13 {dimension_numbers = #tpu.dot_dimension_numbers<[1], [0], [0], [1], [0, 0, 1, 1], [], []>} : vector<512x64xbf16>, vector<64x256xbf16>, vector<512x256xf32> -> vector<512x256xf32>
    %c0_14 = arith.constant 0 : index
    %c0_15 = arith.constant 0 : index
    %24 = vector.load %arg6[%c0_14, %c0_15] : memref<1x256xf32, #tpu.memory_space<vmem>>, vector<1x256xf32>
    %25 = vector.broadcast %24 : vector<1x256xf32> to vector<512x256xf32>
    %26 = arith.addf %23, %25 : vector<512x256xf32>
    %cst_16 = arith.constant 0.000000e+00 : f32
    %27 = vector.broadcast %cst_16 : f32 to vector<512x256xf32>
    %28 = arith.maximumf %26, %27 : vector<512x256xf32>
    %29 = arith.truncf %28 : vector<512x256xf32> to vector<512x256xbf16>
    %c0_17 = arith.constant 0 : index
    %c0_18 = arith.constant 0 : index
    %30 = vector.load %arg7[%c0_17, %c0_18] : memref<256x128xbf16, #tpu.memory_space<vmem>>, vector<256x128xbf16>
    %cst_19 = arith.constant dense<0.000000e+00> : vector<512x128xf32>
    %31 = tpu.matmul %29, %30, %cst_19 {dimension_numbers = #tpu.dot_dimension_numbers<[1], [0], [0], [1], [0, 0, 1, 1], [], []>} : vector<512x256xbf16>, vector<256x128xbf16>, vector<512x128xf32> -> vector<512x128xf32>
    %c0_20 = arith.constant 0 : index
    %c0_21 = arith.constant 0 : index
    %32 = vector.load %arg8[%c0_20, %c0_21] : memref<1x128xf32, #tpu.memory_space<vmem>>, vector<1x128xf32>
    %33 = vector.broadcast %32 : vector<1x128xf32> to vector<512x128xf32>
    %34 = arith.addf %31, %33 : vector<512x128xf32>
    %cst_22 = arith.constant -5.000000e+00 : f32
    %cst_23 = arith.constant 5.000000e+00 : f32
    %35 = vector.broadcast %cst_22 : f32 to vector<512x128xf32>
    %36 = arith.maximumf %35, %34 : vector<512x128xf32>
    %37 = vector.broadcast %cst_23 : f32 to vector<512x128xf32>
    %38 = arith.minimumf %37, %36 : vector<512x128xf32>
    %cst_24 = arith.constant 0.000000e+00 : f32
    %39 = vector.broadcast %cst_24 : f32 to vector<512x128xf32>
    %40 = arith.subf %39, %38 : vector<512x128xf32>
    %41 = math.exp %40 : vector<512x128xf32>
    %cst_25 = arith.constant 1.000000e+00 : f32
    %42 = vector.broadcast %cst_25 : f32 to vector<512x128xf32>
    %43 = arith.addf %42, %41 : vector<512x128xf32>
    %cst_26 = arith.constant 1.000000e+00 : f32
    %44 = vector.broadcast %cst_26 : f32 to vector<512x128xf32>
    %45 = arith.divf %44, %43 : vector<512x128xf32>
    %46 = vector.shape_cast %45 : vector<512x128xf32> to vector<2x256x128xf32>
    %c0_27 = arith.constant 0 : index
    %c0_28 = arith.constant 0 : index
    %c0_29 = arith.constant 0 : index
    %47 = vector.load %arg2[%c0_27, %c0_28, %c0_29] : memref<2x256x128xf32, #tpu.memory_space<vmem>>, vector<2x256x128xf32>
    %48 = vector.shape_cast %11 : vector<256x128xf32> to vector<1x256x128xf32>
    %49 = vector.broadcast %48 : vector<1x256x128xf32> to vector<2x256x128xf32>
    %50 = arith.mulf %47, %49 : vector<2x256x128xf32>
    %51 = vector.shape_cast %3 : vector<256x128xf32> to vector<1x256x128xf32>
    %52 = vector.broadcast %51 : vector<1x256x128xf32> to vector<2x256x128xf32>
    %53 = arith.addf %50, %52 : vector<2x256x128xf32>
    %54 = arith.mulf %0, %46 : vector<2x256x128xf32>
    %cst_30 = arith.constant 1.000000e+00 : f32
    %55 = vector.broadcast %cst_30 : f32 to vector<2x256x128xf32>
    %56 = arith.subf %55, %46 : vector<2x256x128xf32>
    %57 = arith.mulf %56, %53 : vector<2x256x128xf32>
    %58 = arith.addf %54, %57 : vector<2x256x128xf32>
    %c0_31 = arith.constant 0 : index
    %c0_32 = arith.constant 0 : index
    %c0_33 = arith.constant 0 : index
    %59 = vector.load %arg9[%c0_31, %c0_32, %c0_33] : memref<2x256x128xf32, #tpu.memory_space<vmem>>, vector<2x256x128xf32>
    tpu.vector_store %arg9[%c0_31, %c0_32, %c0_33], %58 {strides = array<i32>} : memref<2x256x128xf32, #tpu.memory_space<vmem>>, vector<2x256x128xf32>,
    %c0_34 = arith.constant 0 : index
    %c0_35 = arith.constant 0 : index
    %c0_36 = arith.constant 0 : index
    %60 = vector.load %arg10[%c0_34, %c0_35, %c0_36] : memref<2x256x128xf32, #tpu.memory_space<vmem>>, vector<2x256x128xf32>
    tpu.vector_store %arg10[%c0_34, %c0_35, %c0_36], %46 {strides = array<i32>} : memref<2x256x128xf32, #tpu.memory_space<vmem>>, vector<2x256x128xf32>,
    return
  }
  func.func @transform_0(%arg0: i32) -> (i32, i32, i32) {
    %c0_i32 = arith.constant 0 : i32
    %c0_i32_0 = arith.constant 0 : i32
    %c0_i32_1 = arith.constant 0 : i32
    return %c0_i32, %arg0, %c0_i32_0 : i32, i32, i32
  }
  func.func @transform_1(%arg0: i32) -> (i32, i32, i32) {
    %c0_i32 = arith.constant 0 : i32
    %c0_i32_0 = arith.constant 0 : i32
    %c0_i32_1 = arith.constant 0 : i32
    return %c0_i32, %arg0, %c0_i32_0 : i32, i32, i32
  }
  func.func @transform_2(%arg0: i32) -> (i32, i32) {
    %c0_i32 = arith.constant 0 : i32
    %c0_i32_0 = arith.constant 0 : i32
    %c0_i32_1 = arith.constant 0 : i32
    return %c0_i32, %c0_i32_0 : i32, i32
  }
  func.func @transform_3(%arg0: i32) -> (i32, i32) {
    %c0_i32 = arith.constant 0 : i32
    %c0_i32_0 = arith.constant 0 : i32
    %c0_i32_1 = arith.constant 0 : i32
    return %c0_i32, %c0_i32_0 : i32, i32
  }
  func.func @transform_4(%arg0: i32) -> (i32, i32) {
    %c0_i32 = arith.constant 0 : i32
    %c0_i32_0 = arith.constant 0 : i32
    %c0_i32_1 = arith.constant 0 : i32
    return %c0_i32, %c0_i32_0 : i32, i32
  }
  func.func @transform_5(%arg0: i32) -> (i32, i32) {
    %c0_i32 = arith.constant 0 : i32
    %c0_i32_0 = arith.constant 0 : i32
    %c0_i32_1 = arith.constant 0 : i32
    return %c0_i32, %c0_i32_0 : i32, i32
  }
  func.func @transform_6(%arg0: i32) -> (i32, i32) {
    %c0_i32 = arith.constant 0 : i32
    %c0_i32_0 = arith.constant 0 : i32
    %c0_i32_1 = arith.constant 0 : i32
    return %c0_i32, %c0_i32_0 : i32, i32
  }
  func.func @transform_7(%arg0: i32) -> (i32, i32) {
    %c0_i32 = arith.constant 0 : i32
    %c0_i32_0 = arith.constant 0 : i32
    %c0_i32_1 = arith.constant 0 : i32
    return %c0_i32, %c0_i32_0 : i32, i32
  }
  func.func @transform_8(%arg0: i32) -> (i32, i32, i32) {
    %c0_i32 = arith.constant 0 : i32
    %c0_i32_0 = arith.constant 0 : i32
    %c0_i32_1 = arith.constant 0 : i32
    return %c0_i32, %arg0, %c0_i32_0 : i32, i32, i32
  }
  func.func @transform_9(%arg0: i32) -> (i32, i32, i32) {
    %c0_i32 = arith.constant 0 : i32
    %c0_i32_0 = arith.constant 0 : i32
    %c0_i32_1 = arith.constant 0 : i32
    return %c0_i32, %arg0, %c0_i32_0 : i32, i32, i32
  }
}

</mosaic_0001>

<bundles_post_ra>
// kernel: filter_estimator_forward.1
= control target key start
LH: loop header
LB: loop body
LE: loop exit
PB: predicated region body
PF: predicated region fallthrough
CT: control target
= control target key end

     0   :  { %15 = vsyncpa [#allocation3], 0  ;;  %s5817_s0 = inlined_call_operand.hbm [shape: f32[2,256,128], index: 0, kind: input, shape index: {}]   ;;  %s5818_s1 = inlined_call_operand.hbm [shape: f32[2,256,128], index: 1, kind: input, shape index: {}]   ;;  %s5819_s2 = inlined_call_operand.vmem [shape: bf16[128,64], index: 2, kind: input, shape index: {}]   ;;  %s5820_s3 = inlined_call_operand.vmem [shape: f32[1,64], index: 3, kind: input, shape index: {}]   ;;  %s5821_s4 = inlined_call_operand.vmem [shape: bf16[64,256], index: 4, kind: input, shape index: {}]   ;;  %s5822_s5 = inlined_call_operand.vmem [shape: f32[1,256], index: 5, kind: input, shape index: {}]   ;;  %s5823_s6 = inlined_call_operand.hbm [shape: bf16[256,128], index: 6, kind: input, shape index: {}]   ;;  %s5824_s7 = inlined_call_operand.vmem [shape: f32[1,128], index: 7, kind: input, shape index: {}]   ;;  %s5825_s8 = inlined_call_operand.hbm [shape: f32[2,256,128], index: 8, kind: output, shape index: {0}]   ;;  %s5826_s9 = inlined_call_operand.hbm [shape: f32[2,256,128], index: 9, kind: output, shape index: {1}]  }
   0x1   :  { %16 = vsyncpa [#allocation6], 0 }
   0x2   :  { %17 = vsyncpa [#allocation4], 0 }
   0x3   :  { %18 = vsyncpa [#allocation10], 0  ;;  %s4156_s30 = smov [#allocation5]   ;;  %s4157_s11 = smov [#allocation2]  }
   0x4   :  { %s36_s10 = sshll.u32 %s4156_s30, 4  ;;  %s24_s12 = sshll.u32 %s4157_s11, 4  ;;  %s37_s10 = int_to_ptr.vmem [resolvable:$true] %s36_s10  ;;  %s4216_s12 = int_to_ptr.vmem [resolvable:$true] %s24_s12 }
   0x5   :  { %s4038_s15 = scalar_lea.hbm %s5818_s1, 8192 }
   0x6   :  { %p4039_p0 = scmp.ne.s32.totalorder %s5818_s1, %s4038_s15  ;;  %p4042_p1 = scmp.lt.u32.totalorder %s4038_s15, %s5818_s1 }
   0x8   :  { %p4044_p2 = pnand %p4042_p1, %p4039_p0 }
   0xa   :  { %4047 = shalt.err (!%p4044_p2)
}
   0xb   :  { %s4048_s20 = scalar_lea.vmem %s37_s10, 8192  ;;  %p4053_p4 = scmp.lt.s32.totalorder %s37_s10, %s37_s10 }
   0xc   :  { %p4049_p3 = scmp.ne.s32.totalorder %s37_s10, %s4048_s20  ;;  %p4054_p5 = scmp.lt.s32.totalorder %s4048_s20, %s4048_s20 }
   0xe   :  { %p4055_p6 = por %p4054_p5, %p4053_p4 }
  0x10   :  { %p4056_p7 = pnand %p4055_p6, %p4049_p3 }
  0x12   :  { %4059 = shalt.err (!%p4056_p7)
}
  0x13   :  { %s4158_s21 = smov 128   ;;  %s4159_s22 = smov 8  }
  0x14   :  { %42 = dma.hbm_to_vmem [thread:$0]  %s5818_s1, 8192, %s37_s10, [#allocation6], %s4158_s21, %s4158_s21, %s4159_s22  }
  0x15   :  { %s4060_s27 = scalar_lea.hbm %s5817_s0, 8192 }
  0x16   :  { %p4061_p8 = scmp.ne.s32.totalorder %s5817_s0, %s4060_s27  ;;  %p4064_p9 = scmp.lt.u32.totalorder %s4060_s27, %s5817_s0 }
  0x18   :  { %p4066_p10 = pnand %p4064_p9, %p4061_p8 }
  0x1a   :  { %4069 = shalt.err (!%p4066_p10)
}
  0x1b   :  { %s4070_s13 = scalar_lea.vmem %s4216_s12, 8192  ;;  %p4075_p12 = scmp.lt.s32.totalorder %s4216_s12, %s4216_s12 }
  0x1c   :  { %p4071_p11 = scmp.ne.s32.totalorder %s4216_s12, %s4070_s13  ;;  %p4076_p13 = scmp.lt.s32.totalorder %s4070_s13, %s4070_s13 }
  0x1e   :  { %p4077_p0 = por %p4076_p13, %p4075_p12 }
  0x20   :  { %p4078_p1 = pnand %p4077_p0, %p4071_p11 }
  0x22   :  { %4081 = shalt.err (!%p4078_p1)
}
  0x23   :  { %30 = dma.hbm_to_vmem [thread:$0]  %s5817_s0, 8192, %s4216_s12, [#allocation3], %s4158_s21, %s4158_s21, %s4159_s22  }
  0x24   :  { %s4160_s14 = smov [#allocation7]   ;;  %s4082_s18 = scalar_lea.hbm %s5823_s6, 2048 }
  0x25   :  { %s56_s15 = sshll.u32 %s4160_s14, 4  ;;  %p4083_p2 = scmp.ne.s32.totalorder %s5823_s6, %s4082_s18  ;;  %s57_s15 = int_to_ptr.vmem [resolvable:$true] %s56_s15 }
  0x26   :  { %p4086_p3 = scmp.lt.u32.totalorder %s4082_s18, %s5823_s6 }
  0x28   :  { %p4088_p4 = pnand %p4086_p3, %p4083_p2 }
  0x2a   :  { %4091 = shalt.err (!%p4088_p4)
}
  0x2b   :  { %s4092_s25 = scalar_lea.vmem %s57_s15, 2048  ;;  %p4097_p6 = scmp.lt.s32.totalorder %s57_s15, %s57_s15 }
  0x2c   :  { %p4093_p5 = scmp.ne.s32.totalorder %s57_s15, %s4092_s25  ;;  %p4098_p7 = scmp.lt.s32.totalorder %s4092_s25, %s4092_s25 }
  0x2e   :  { %p4099_p8 = por %p4098_p7, %p4097_p6 }
  0x30   :  { %p4100_p9 = pnand %p4099_p8, %p4093_p5 }
  0x32   :  { %4103 = shalt.err (!%p4100_p9)
}
  0x33   :  { %s4161_s0 = smov 64   ;;  %s4162_s12 = smov 4  }
  0x34   :  { %62 = dma.hbm_to_vmem [thread:$0]  %s5823_s6, 2048, %s57_s15, [#allocation6], %s4161_s0, %s4161_s0, %s4162_s12  }
  0x35   :  { %4148 = dma.done.wait [#allocation3], 8192  }
  0x36   :  { %4149 = vsyncadd [#allocation3], 4294959104 }
  0x37   :  { %4150 = dma.done.wait [#allocation6], 10240  }
  0x38   :  { %4151 = vsyncadd [#allocation6], 4294957056  ;;  %v3616_v0 = vld [vmem:[%s5819_s2] sm:$0xff]   ;;  %v3617_v1 = vld [vmem:[%s5819_s2 + $0x8] sm:$0xff]   ;;  %s4165_s24 = smov [#allocation8]  }
  0x39   :  { %3494 = vmatprep.subr.bf16.mxu0 %v3616_v0  ;;  %v3618_v2 = vld [vmem:[%s5819_s2 + $0x10] sm:$0xff]   ;;  %v3619_v3 = vld [vmem:[%s5819_s2 + $0x18] sm:$0xff]   ;;  %v75_v4 = vld [vmem:[#allocation2] sm:$0xff]  ;;  %s3295_s25 = sshll.u32 %s4165_s24, 4  ;;  %s3296_s25 = int_to_ptr.vmem [resolvable:$true] %s3295_s25 }
  0x3a   :  { %3495 = vmatpush3.bf16.msra.mxu0 %v3616_v0  ;;  %v76_v5 = vld [vmem:[#allocation2 + $0x8] sm:$0xff]  ;;  %v4277_v6 = vld [vmem:[#allocation2 + $0x100] sm:$0xff]  ;;  %v3622_v25 = vld [vmem:[%s5819_s2 + $0x30] sm:$0xff]  }
  0x3b   :  { %3496 = vmatprep.subr.bf16.mxu0 %v3617_v1  ;;  %v4279_v7 = vld [vmem:[#allocation2 + $0x108] sm:$0xff]  ;;  %v139_v8 = vadd.f32 %v4277_v6, %v75_v4  ;;  %v588_v9 = vpack.c.bf16 %v76_v5, %v75_v4  ;;  %v3620_v12 = vld [vmem:[%s5819_s2 + $0x20] sm:$0xff]   ;;  %v4308_v26 = vld [vmem:[#allocation2 + $0x10] sm:$0xff] }
  0x3c   :  { %v140_v10 = vadd.f32 %v4279_v7, %v76_v5  ;;  %v3621_v20 = vld [vmem:[%s5819_s2 + $0x28] sm:$0xff]   ;;  %v4310_v27 = vld [vmem:[#allocation2 + $0x18] sm:$0xff]  ;;  %v4312_v28 = vld [vmem:[#allocation2 + $0x20] sm:$0xff] }
  0x3d   :  { %v4283_v11 = vmul.f32 0.5, %v139_v8  ;;  %3510 = vmatprep.mubr.bf16.mxu0 %v588_v9  ;;  %v4314_v29 = vld [vmem:[#allocation2 + $0x28] sm:$0xff]  ;;  %v4316_v30 = vld [vmem:[#allocation2 + $0x110] sm:$0xff]  ;;  %v4318_v31 = vld [vmem:[#allocation2 + $0x118] sm:$0xff]  ;;  %v589_v35 = vpack.c.bf16 %v4310_v27, %v4308_v26 }
  0x3e   :  { %3497 = vmatpush3.bf16.msra.mxu0 %v3617_v1  ;;  %v4288_v13 = vmul.f32 0.5, %v140_v10  ;;  %v141_v32 = vadd.f32 %v4316_v30, %v4308_v26  ;;  %v142_v33 = vadd.f32 %v4318_v31, %v4310_v27  ;;  %v4324_v34 = vld [vmem:[#allocation2 + $0x120] sm:$0xff]  ;;  %v4328_v36 = vld [vmem:[#allocation2 + $0x128] sm:$0xff]  ;;  %v3623_v38 = vld [vmem:[%s5819_s2 + $0x38] sm:$0xff]   ;;  %v590_v39 = vpack.c.bf16 %v4314_v29, %v4312_v28 }
  0x3f   :  { %3498 = vmatprep.subr.bf16.mxu0 %v3618_v2  ;;  %5860 = vst [vmem:[#allocation15_spill] sm:$0xff] %v4283_v11  ;;  %v204_v14 = vsub.f32 %v75_v4, %v4283_v11  ;;  %v236_v15 = vsub.f32 %v4277_v6, %v4283_v11  ;;  %v143_v37 = vadd.f32 %v4324_v34, %v4312_v28  ;;  %v81_v0 = vld [vmem:[#allocation2 + $0x30] sm:$0xff] }
  0x40   :  { %5861 = vst [vmem:[#allocation16_spill] sm:$0xff] %v4288_v13  ;;  %v205_v16 = vsub.f32 %v76_v5, %v4288_v13  ;;  %v237_v17 = vsub.f32 %v4279_v7, %v4288_v13  ;;  %v4337_v40 = vmul.f32 0.5, %v141_v32  ;;  %v4339_v41 = vmul.f32 0.5, %v142_v33  ;;  %v2746_v5 = vld [vmem:[#allocation5 + $0x100] sm:$0xff] }
  0x41   :  { %v268_v18 = vmul.f32 %v204_v14, %v204_v14  ;;  %v300_v19 = vmul.f32 %v236_v15, %v236_v15  ;;  %v144_v42 = vadd.f32 %v4328_v36, %v4314_v29  ;;  %v4346_v44 = vmul.f32 0.5, %v143_v37  ;;  %v82_v14 = vld [vmem:[#allocation2 + $0x38] sm:$0xff] }
  0x42   :  { %3499 = vmatpush3.bf16.msra.mxu0 %v3618_v2  ;;  %v269_v21 = vmul.f32 %v205_v16, %v205_v16  ;;  %v301_v22 = vmul.f32 %v237_v17, %v237_v17  ;;  %5862 = vst [vmem:[#allocation17_spill] sm:$0xff] %v4337_v40  ;;  %5863 = vst [vmem:[#allocation18_spill] sm:$0xff] %v4339_v41  ;;  %v206_v45 = vsub.f32 %v4308_v26, %v4337_v40  ;;  %v4403_v26 = vld [vmem:[#allocation2 + $0x138] sm:$0xff] }
  0x43   :  { %3500 = vmatprep.subr.bf16.mxu0 %v3619_v3  ;;  %v4299_v23 = vadd.f32 %v300_v19, %v268_v18  ;;  %5864 = vst [vmem:[#allocation19_spill] sm:$0xff] %v4346_v44  ;;  %v207_v46 = vsub.f32 %v4310_v27, %v4339_v41  ;;  %v238_v47 = vsub.f32 %v4316_v30, %v4337_v40  ;;  %v4357_v49 = vmul.f32 0.5, %v144_v42  ;;  %v4391_v19 = vld [vmem:[#allocation2 + $0x40] sm:$0xff] }
  0x44   :  { %v4301_v24 = vadd.f32 %v301_v22, %v269_v21  ;;  %v239_v48 = vsub.f32 %v4318_v31, %v4339_v41  ;;  %v208_v50 = vsub.f32 %v4312_v28, %v4346_v44  ;;  %v240_v51 = vsub.f32 %v4324_v34, %v4346_v44 }
  0x45   :  { %3652 = vrsqrt.f32 %v4299_v23  ;;  %vm366_vm0 = vcmp.eq.f32.partialorder %v4299_v23, inf  ;;  %vm368_vm1 = vcmp.eq.f32.partialorder %v4299_v23, 0.0  ;;  %v369_v43 = vand.u32 2147483648, %v4299_v23  ;;  %5865 = vst [vmem:[#allocation20_spill] sm:$0xff] %v4357_v49 }
  0x46   :  { %3501 = vmatpush3.bf16.msra.mxu0 %v3619_v3  ;;  %3654 = vrsqrt.f32 %v4301_v24  ;;  %vm373_vm2 = vcmp.eq.f32.partialorder %v4301_v24, inf  ;;  %v270_v52 = vmul.f32 %v206_v45, %v206_v45  ;;  %v271_v53 = vmul.f32 %v207_v46, %v207_v46  ;;  %v4373_v3 = vld [vmem:[#allocation2 + $0x130] sm:$0xff] }
  0x47   :  { %3502 = vmatprep.subr.bf16.mxu0 %v3620_v12  ;;  %v302_v54 = vmul.f32 %v238_v47, %v238_v47  ;;  %v303_v55 = vmul.f32 %v239_v48, %v239_v48  ;;  %v209_v57 = vsub.f32 %v4314_v29, %v4357_v49  ;;  %v241_v58 = vsub.f32 %v4328_v36, %v4357_v49  ;;  %v4434_v47 = vld [vmem:[#allocation2 + $0x140] sm:$0xff]  ;;  %v4436_v48 = vld [vmem:[#allocation2 + $0x148] sm:$0xff] }
  0x48   :  { %v272_v59 = vmul.f32 %v208_v50, %v208_v50  ;;  %v304_v60 = vmul.f32 %v240_v51, %v240_v51  ;;  %v376_v63 = vand.u32 2147483648, %v4301_v24  ;;  %vm375_vm3 = vcmp.eq.f32.partialorder %v4301_v24, 0.0 }
  0x49   :  { %v4369_v1 = vadd.f32 %v302_v54, %v270_v52  ;;  %v4371_v2 = vadd.f32 %v303_v55, %v271_v53  ;;  %v273_v8 = vmul.f32 %v209_v57, %v209_v57  ;;  %v145_v9 = vadd.f32 %v4373_v3, %v81_v0  ;;  %v4444_v52 = vld [vmem:[#allocation2 + $0x60] sm:$0xff]  ;;  %v4446_v53 = vld [vmem:[#allocation2 + $0x68] sm:$0xff] }
  0x4a   :  { %3503 = vmatpush3.bf16.msra.mxu0 %v3620_v12  ;;  %v2747_v12 = vld [vmem:[#allocation5 + $0x108] sm:$0xff]  ;;  %v305_v15 = vmul.f32 %v241_v58, %v241_v58  ;;  %v4382_v16 = vadd.f32 %v304_v60, %v272_v59  ;;  %v146_v28 = vadd.f32 %v4403_v26, %v82_v14  ;;  %v147_v50 = vadd.f32 %v4434_v47, %v4391_v19  ;;  %v2748_v59 = vld [vmem:[#allocation5 + $0x110] sm:$0xff] }
  0x4b   :  { %3504 = vmatprep.subr.bf16.mxu0 %v3621_v20  ;;  %3656 = vrsqrt.f32 %v4369_v1  ;;  %v4407_v29 = vmul.f32 0.5, %v145_v9  ;;  %vm380_vm4 = vcmp.eq.f32.partialorder %v4369_v1, inf  ;;  %vm382_vm5 = vcmp.eq.f32.partialorder %v4369_v1, 0.0 }
  0x4c   :  { %3658 = vrsqrt.f32 %v4371_v2  ;;  %vm387_vm6 = vcmp.eq.f32.partialorder %v4371_v2, inf  ;;  %vm389_vm7 = vcmp.eq.f32.partialorder %v4371_v2, 0.0  ;;  %v390_v42 = vand.u32 2147483648, %v4371_v2 }
  0x4d   :  { %5868 = vst [vmem:[#allocation23_spill] sm:$0xff] %v4407_v29  ;;  %3660 = vrsqrt.f32 %v4382_v16  ;;  %v210_v45 = vsub.f32 %v81_v0, %v4407_v29  ;;  %v242_v46 = vsub.f32 %v4373_v3, %v4407_v29  ;;  %vm394_vm8 = vcmp.eq.f32.partialorder %v4382_v16, inf }
  0x4e   :  { %3505 = vmatpush3.bf16.msra.mxu0 %v3621_v20  ;;  %v4393_v20 = vld [vmem:[#allocation2 + $0x48] sm:$0xff]  ;;  %vm396_vm9 = vcmp.eq.f32.partialorder %v4382_v16, 0.0  ;;  %v397_v60 = vand.u32 2147483648, %v4382_v16 }
  0x4f   :  { %3506 = vmatprep.subr.bf16.mxu0 %v3622_v25  ;;  %v3653_v56 = vpop.eup %3652  ;;  %v592_v33 = vpack.c.bf16 %v4393_v20, %v4391_v19  ;;  %v148_v51 = vadd.f32 %v4436_v48, %v4393_v20  ;;  %v306_v57 = vmul.f32 %v242_v46, %v242_v46  ;;  %v3629_v46 = vld [vmem:[%s5821_s4 + $0x10] ss:$8 sps:$4 sm:$0xff]  }
  0x50   :  { %v3655_v61 = vpop.eup %3654  ;;  %v365_v62 = vmul.f32 %v3653_v56, %v4299_v23  ;;  %v274_v56 = vmul.f32 %v210_v45, %v210_v45 }
  0x51   :  { %v372_v4 = vmul.f32 %v3655_v61, %v4301_v24  ;;  %v4453_v61 = vmul.f32 0.5, %v147_v50 }
  0x52   :  { %3507 = vmatpush3.bf16.msra.mxu0 %v3622_v25  ;;  %v367_v10 = vsel %vm366_vm0, %v4299_v23, %v365_v62  ;;  %v4399_v25 = vld [vmem:[#allocation2 + $0x50] sm:$0xff]  ;;  %v4401_v23 = vld [vmem:[#allocation2 + $0x58] sm:$0xff]  ;;  %v4455_v62 = vmul.f32 0.5, %v148_v51 }
  0x53   :  { %3508 = vmatprep.subr.bf16.mxu0 %v3623_v38  ;;  %v4386_v17 = vsel %vm368_vm1, %v369_v43, %v367_v10  ;;  %v374_v18 = vsel %vm373_vm2, %v4301_v24, %v372_v4  ;;  %v591_v24 = vpack.c.bf16 %v82_v14, %v81_v0  ;;  %v4429_v43 = vmul.f32 0.5, %v146_v28  ;;  %5872 = vst [vmem:[#allocation27_spill] sm:$0xff] %v4453_v61 }
  0x54   :  { %5866 = vst [vmem:[#allocation21_spill] sm:$0xff] %v4386_v17  ;;  %v4396_v21 = vsel %vm375_vm3, %v376_v63, %v374_v18  ;;  %v2810_v22 = vmul.f32 %v2746_v5, %v4386_v17  ;;  %5873 = vst [vmem:[#allocation28_spill] sm:$0xff] %v4455_v62  ;;  %v4457_v63 = vld [vmem:[#allocation2 + $0x150] sm:$0xff]  ;;  %v2749_v5 = vld [vmem:[#allocation5 + $0x118] sm:$0xff]  ;;  %v4460_v10 = vadd.f32 %v306_v57, %v274_v56 }
  0x55   :  { %5867 = vst [vmem:[#allocation22_spill] sm:$0xff] %v4396_v21  ;;  %v2811_v27 = vmul.f32 %v2747_v12, %v4396_v21  ;;  %5871 = vst [vmem:[#allocation26_spill] sm:$0xff] %v4429_v43  ;;  %v211_v54 = vsub.f32 %v82_v14, %v4429_v43  ;;  %v243_v55 = vsub.f32 %v4403_v26, %v4429_v43  ;;  %v3657_v58 = vpop.eup %3656  ;;  %v4462_v12 = vld [vmem:[#allocation2 + $0x158] sm:$0xff]  ;;  %v3624_v14 = vld [vmem:[%s5821_s4 + $0x4] ss:$8 sps:$4 sm:$0xff]  }
  0x56   :  { %3509 = vmatpush3.bf16.msra.mxu0 %v3623_v38  ;;  %v4410_v32 = vadd.f32 %v2810_v22, %v4283_v11  ;;  %v593_v38 = vpack.c.bf16 %v4401_v23, %v4399_v25  ;;  %v3659_v0 = vpop.eup %3658  ;;  %v379_v4 = vmul.f32 %v3657_v58, %v4369_v1  ;;  %v594_v18 = vpack.c.bf16 %v4446_v53, %v4444_v52  ;;  %v4757_v11 = vld [vmem:[#allocation2 + $0x188] sm:$0xff] }
  0x57   :  { %v4418_v37 = vadd.f32 %v2811_v27, %v4288_v13  ;;  %v307_v9 = vmul.f32 %v243_v55, %v243_v55  ;;  %v386_v22 = vmul.f32 %v3659_v0, %v4371_v2  ;;  %v149_v45 = vadd.f32 %v4457_v63, %v4399_v25  ;;  %1233 = vmatprep.subr.bf16.mxu1 %v3624_v14  ;;  %v3661_v50 = vpop.eup %3660  ;;  %v2750_v55 = vld [vmem:[#allocation5 + $0x120] sm:$0xff]  ;;  %v2751_v14 = vld [vmem:[#allocation5 + $0x128] sm:$0xff] }
  0x58   :  { %5869 = vst [vmem:[#allocation24_spill] sm:$0xff] %v4410_v32  ;;  %v381_v28 = vsel %vm380_vm4, %v4369_v1, %v379_v4  ;;  %v212_v56 = vsub.f32 %v4391_v19, %v4453_v61  ;;  %v150_v57 = vadd.f32 %v4462_v12, %v4401_v23  ;;  %v213_v0 = vsub.f32 %v4393_v20, %v4455_v62  ;;  %v4510_v19 = vld [vmem:[#allocation2 + $0x78] sm:$0xff] }
  0x59   :  { %3511 = vmatmul.mubr.bf16.vlgmr.msra.gmra.mrb[0].mxu0 %v589_v35  ;;  %v4414_v35 = vadd.f32 %v305_v15, %v273_v8  ;;  %5870 = vst [vmem:[#allocation25_spill] sm:$0xff] %v4418_v37  ;;  %v275_v8 = vmul.f32 %v211_v54, %v211_v54  ;;  %v3626_v15 = vld [vmem:[%s5821_s4] ss:$8 sps:$4 sm:$0xff]   ;;  %v388_v54 = vsel %vm387_vm6, %v4371_v2, %v386_v22  ;;  %vm408_vm12 = vcmp.eq.f32.partialorder %v4460_v10, inf }
  0x5a   :  { %3514 = vmatprep.mubr.bf16.mxu0 %v590_v39  ;;  %v383_v39 = vand.u32 2147483648, %v4369_v1  ;;  %1234 = vmatpush1.bf16.msra.mxu1 %v3626_v15  ;;  %v4502_v58 = vsel %vm389_vm7, %v390_v42, %v388_v54  ;;  %vm410_vm13 = vcmp.eq.f32.partialorder %v4460_v10, 0.0  ;;  %v4530_v15 = vld [vmem:[#allocation2 + $0x88] sm:$0xff]  ;;  %v606_v21 = vpack.c.bf16 %v4328_v36, %v4324_v34 }
  0x5b   :  { %3662 = vrsqrt.f32 %v4414_v35  ;;  %vm401_vm10 = vcmp.eq.f32.partialorder %v4414_v35, inf  ;;  %vm403_vm11 = vcmp.eq.f32.partialorder %v4414_v35, 0.0  ;;  %v404_v27 = vand.u32 2147483648, %v4414_v35  ;;  %5875 = vst [vmem:[#allocation30_spill] sm:$0xff] %v4502_v58 }
  0x5c   :  { %3664 = vrsqrt.f32 %v4460_v10  ;;  %v4491_v51 = vsel %vm382_vm5, %v383_v39, %v381_v28  ;;  %v393_v39 = vmul.f32 %v3661_v50, %v4382_v16  ;;  %v411_v28 = vand.u32 2147483648, %v4460_v10 }
  0x5d   :  { %5874 = vst [vmem:[#allocation29_spill] sm:$0xff] %v4491_v51  ;;  %v2812_v1 = vmul.f32 %v2748_v59, %v4491_v51  ;;  %v244_v59 = vsub.f32 %v4434_v47, %v4453_v61  ;;  %v4679_v51 = vld [vmem:[#allocation2 + $0xd0] sm:$0xff] }
  0x5e   :  { %v395_v20 = vsel %vm394_vm8, %v4382_v16, %v393_v39 }
  0x5f   :  { %v4517_v2 = vadd.f32 %v2812_v1, %v4337_v40  ;;  %v276_v1 = vmul.f32 %v212_v56, %v212_v56  ;;  %v2755_v40 = vld [vmem:[#allocation5 + $0x148] sm:$0xff] }
  0x61   :  { %3515 = vmatmul.mubr.bf16.gmra.mrb[4].mxu0 %v591_v24  ;;  %v3627_v24 = vld [vmem:[%s5821_s4 + $0x14] ss:$8 sps:$4 sm:$0xff]   ;;  %5876 = vst [vmem:[#allocation31_spill] sm:$0xff] %v4517_v2 }
  0x62   :  { %3518 = vmatprep.mubr.bf16.mxu0 %v592_v33  ;;  %v4481_v33 = vadd.f32 %v307_v9, %v275_v8  ;;  %1235 = vmatprep.subr.bf16.mxu1 %v3627_v24  ;;  %v4508_v8 = vld [vmem:[#allocation2 + $0x70] sm:$0xff]  ;;  %v2813_v9 = vmul.f32 %v2749_v5, %v4502_v58  ;;  %v4528_v5 = vld [vmem:[#allocation2 + $0x80] sm:$0xff]  ;;  %v4537_v24 = vsel %vm396_vm9, %v397_v60, %v395_v20  ;;  %v4559_v20 = vmul.f32 0.5, %v149_v45 }
  0x63   :  { %5878 = vst [vmem:[#allocation33_spill] sm:$0xff] %v4537_v24  ;;  %1236 = vmatpush1.bf16.msra.mxu1 %v3629_v46  ;;  %v2814_v50 = vmul.f32 %v2750_v55, %v4537_v24  ;;  %v245_v60 = vsub.f32 %v4436_v48, %v4455_v62  ;;  %v277_v46 = vmul.f32 %v213_v0, %v213_v0  ;;  %v2752_v0 = vld [vmem:[#allocation5 + $0x130] sm:$0xff] }
  0x64   :  { %3666 = vrsqrt.f32 %v4481_v33  ;;  %v4533_v22 = vadd.f32 %v2813_v9, %v4339_v41  ;;  %vm415_vm14 = vcmp.eq.f32.partialorder %v4481_v33, inf  ;;  %vm417_vm15 = vcmp.eq.f32.partialorder %v4481_v33, 0.0  ;;  %5881 = vst [vmem:[#allocation36_spill] sm:$0xff] %v4559_v20 }
  0x65   :  { %v3663_v4 = vpop.eup %3662  ;;  %v418_v54 = vand.u32 2147483648, %v4481_v33  ;;  %v4557_v55 = vadd.f32 %v2814_v50, %v4346_v44  ;;  %v309_v9 = vmul.f32 %v245_v60, %v245_v60  ;;  %v214_v45 = vsub.f32 %v4399_v25, %v4559_v20  ;;  %v4589_v25 = vld [vmem:[#allocation2 + $0x98] sm:$0xff] }
  0x66   :  { %v400_v42 = vmul.f32 %v3663_v4, %v4414_v35  ;;  %5877 = vst [vmem:[#allocation32_spill] sm:$0xff] %v4533_v22  ;;  %v308_v4 = vmul.f32 %v244_v59, %v244_v59 }
  0x67   :  { %5880 = vst [vmem:[#allocation35_spill] sm:$0xff] %v4557_v55  ;;  %v4573_v59 = vadd.f32 %v309_v9, %v277_v46 }
  0x68   :  { %v4571_v50 = vadd.f32 %v308_v4, %v276_v1  ;;  %v246_v1 = vsub.f32 %v4457_v63, %v4559_v20  ;;  %v4587_v4 = vld [vmem:[#allocation2 + $0x90] sm:$0xff] }
  0x69   :  { %3519 = vmatmul.mubr.bf16.gmra.mrb[8].mxu0 %v593_v38  ;;  %v402_v38 = vsel %vm401_vm10, %v4414_v35, %v400_v42  ;;  %v4561_v35 = vmul.f32 0.5, %v150_v57  ;;  %v596_v42 = vpack.c.bf16 %v4530_v15, %v4528_v5  ;;  %v597_v22 = vpack.c.bf16 %v4589_v25, %v4587_v4 }
  0x6a   :  { %3522 = vmatprep.mubr.bf16.mxu0 %v594_v18  ;;  %v4549_v16 = vsel %vm403_vm11, %v404_v27, %v402_v38  ;;  %v595_v18 = vpack.c.bf16 %v4510_v19, %v4508_v8  ;;  %v3665_v27 = vpop.eup %3664  ;;  %v4568_v38 = vld [vmem:[#allocation2 + $0x160] sm:$0xff]  ;;  %3668 = vrsqrt.f32 %v4571_v50  ;;  %vm422_vm0 = vcmp.eq.f32.partialorder %v4571_v50, inf }
  0x6b   :  { %5879 = vst [vmem:[#allocation34_spill] sm:$0xff] %v4549_v16  ;;  %v2815_v39 = vmul.f32 %v2751_v14, %v4549_v16  ;;  %5882 = vst [vmem:[#allocation37_spill] sm:$0xff] %v4561_v35  ;;  %v407_v14 = vmul.f32 %v3665_v27, %v4460_v10  ;;  %v215_v57 = vsub.f32 %v4401_v23, %v4561_v35  ;;  %3670 = vrsqrt.f32 %v4573_v59  ;;  %v4599_v27 = vld [vmem:[#allocation2 + $0x168] sm:$0xff] }
  0x6c   :  { %v151_v46 = vadd.f32 %v4568_v38, %v4444_v52  ;;  %v247_v9 = vsub.f32 %v4462_v12, %v4561_v35  ;;  %vm424_vm1 = vcmp.eq.f32.partialorder %v4571_v50, 0.0  ;;  %vm429_vm2 = vcmp.eq.f32.partialorder %v4573_v59, inf }
  0x6d   :  { %v4566_v56 = vadd.f32 %v2815_v39, %v4357_v49  ;;  %v409_v39 = vsel %vm408_vm12, %v4460_v10, %v407_v14  ;;  %v4601_v14 = vld [vmem:[#allocation2 + $0xa0] sm:$0xff]  ;;  %v152_v10 = vadd.f32 %v4599_v27, %v4446_v53  ;;  %v4624_v49 = vld [vmem:[#allocation2 + $0xb8] sm:$0xff]  ;;  %vm431_vm3 = vcmp.eq.f32.partialorder %v4573_v59, 0.0 }
  0x6e   :  { %v3667_v60 = vpop.eup %3666  ;;  %v4593_v23 = vsel %vm410_vm13, %v411_v28, %v409_v39  ;;  %v279_v39 = vmul.f32 %v215_v57, %v215_v57  ;;  %v311_v57 = vmul.f32 %v247_v9, %v247_v9  ;;  %v425_v9 = vand.u32 2147483648, %v4571_v50 }
  0x6f   :  { %5883 = vst [vmem:[#allocation38_spill] sm:$0xff] %v4566_v56  ;;  %5884 = vst [vmem:[#allocation39_spill] sm:$0xff] %v4593_v23  ;;  %v2753_v56 = vld [vmem:[#allocation5 + $0x138] sm:$0xff]  ;;  %v2816_v55 = vmul.f32 %v2752_v0, %v4593_v23  ;;  %v310_v0 = vmul.f32 %v246_v1, %v246_v1  ;;  %v4622_v23 = vld [vmem:[#allocation2 + $0xb0] sm:$0xff] }
  0x70   :  { %v4638_v1 = vadd.f32 %v311_v57, %v279_v39 }
  0x71   :  { %3523 = vmatmul.mubr.bf16.gmra.mrb[12].mxu0 %v595_v18  ;;  %v414_v18 = vmul.f32 %v3667_v60, %v4481_v33  ;;  %v278_v60 = vmul.f32 %v214_v45, %v214_v45  ;;  %v4618_v37 = vadd.f32 %v2816_v55, %v4407_v29 }
  0x72   :  { %3526 = vmatprep.mubr.bf16.mxu0 %v596_v42  ;;  %v4603_v42 = vld [vmem:[#allocation2 + $0xa8] sm:$0xff]  ;;  %vm443_vm6 = vcmp.eq.f32.partialorder %v4638_v1, inf  ;;  %vm445_vm7 = vcmp.eq.f32.partialorder %v4638_v1, 0.0 }
  0x73   :  { %v416_v28 = vsel %vm415_vm14, %v4481_v33, %v414_v18  ;;  %5886 = vst [vmem:[#allocation41_spill] sm:$0xff] %v4618_v37  ;;  %v598_v32 = vpack.c.bf16 %v4603_v42, %v4601_v14  ;;  %v4627_v18 = vmul.f32 0.5, %v151_v46  ;;  %v4629_v44 = vadd.f32 %v310_v0, %v278_v60 }
  0x74   :  { %v4615_v2 = vsel %vm417_vm15, %v418_v54, %v416_v28  ;;  %v4631_v33 = vmul.f32 0.5, %v152_v10  ;;  %v4633_v54 = vld [vmem:[#allocation2 + $0x170] sm:$0xff]  ;;  %v599_v46 = vpack.c.bf16 %v4624_v49, %v4622_v23  ;;  %v4655_v10 = vld [vmem:[#allocation2 + $0xc8] sm:$0xff]  ;;  %v432_v37 = vand.u32 2147483648, %v4573_v59 }
  0x75   :  { %5885 = vst [vmem:[#allocation40_spill] sm:$0xff] %v4615_v2  ;;  %v2817_v45 = vmul.f32 %v2753_v56, %v4615_v2  ;;  %v216_v28 = vsub.f32 %v4444_v52, %v4627_v18  ;;  %v153_v56 = vadd.f32 %v4633_v54, %v4508_v8  ;;  %3672 = vrsqrt.f32 %v4629_v44  ;;  %v3669_v52 = vpop.eup %3668  ;;  %v2754_v2 = vld [vmem:[#allocation5 + $0x140] sm:$0xff] }
  0x76   :  { %3674 = vrsqrt.f32 %v4638_v1  ;;  %v217_v60 = vsub.f32 %v4446_v53, %v4631_v33  ;;  %v248_v39 = vsub.f32 %v4568_v38, %v4627_v18  ;;  %v3671_v57 = vpop.eup %3670  ;;  %vm436_vm4 = vcmp.eq.f32.partialorder %v4629_v44, inf }
  0x77   :  { %v4636_v55 = vadd.f32 %v2817_v45, %v4429_v43  ;;  %v280_v0 = vmul.f32 %v216_v28, %v216_v28  ;;  %v4663_v45 = vld [vmem:[#allocation2 + $0x178] sm:$0xff]  ;;  %v4669_v29 = vmul.f32 0.5, %v153_v56  ;;  %v428_v53 = vmul.f32 %v3671_v57, %v4573_v59 }
  0x78   :  { %v154_v43 = vadd.f32 %v4663_v45, %v4510_v19  ;;  %v281_v16 = vmul.f32 %v217_v60, %v217_v60  ;;  %v312_v24 = vmul.f32 %v248_v39, %v248_v39  ;;  %v4681_v56 = vld [vmem:[#allocation2 + $0xd8] sm:$0xff]  ;;  %vm438_vm5 = vcmp.eq.f32.partialorder %v4629_v44, 0.0 }
  0x79   :  { %5887 = vst [vmem:[#allocation42_spill] sm:$0xff] %v4636_v55  ;;  %3527 = vmatmul.mubr.bf16.gmra.mrb[16].mxu0 %v597_v22  ;;  %v4653_v22 = vld [vmem:[#allocation2 + $0xc0] sm:$0xff]  ;;  %v421_v55 = vmul.f32 %v3669_v52, %v4571_v50  ;;  %v430_v60 = vsel %vm429_vm2, %v4573_v59, %v428_v53  ;;  %v218_v13 = vsub.f32 %v4508_v8, %v4669_v29  ;;  %v439_v59 = vand.u32 2147483648, %v4629_v44 }
  0x7a   :  { %3530 = vmatprep.mubr.bf16.mxu0 %v598_v32  ;;  %v249_v32 = vsub.f32 %v4599_v27, %v4631_v33  ;;  %v600_v28 = vpack.c.bf16 %v4655_v10, %v4653_v22  ;;  %v4677_v58 = vmul.f32 0.5, %v154_v43  ;;  %v4690_v39 = vadd.f32 %v312_v24, %v280_v0  ;;  %v4714_v8 = vld [vmem:[#allocation2 + $0xe0] sm:$0xff] }
  0x7b   :  { %v423_v52 = vsel %vm422_vm0, %v4571_v50, %v421_v55  ;;  %v4696_v43 = vsel %vm431_vm3, %v432_v37, %v430_v60  ;;  %v601_v37 = vpack.c.bf16 %v4681_v56, %v4679_v51  ;;  %v446_v0 = vand.u32 2147483648, %v4638_v1 }
  0x7c   :  { %v313_v41 = vmul.f32 %v249_v32, %v249_v32  ;;  %v4685_v57 = vsel %vm424_vm1, %v425_v9, %v423_v52  ;;  %5889 = vst [vmem:[#allocation44_spill] sm:$0xff] %v4696_v43  ;;  %v2819_v50 = vmul.f32 %v2755_v40, %v4696_v43  ;;  %3676 = vrsqrt.f32 %v4690_v39  ;;  %v2756_v52 = vld [vmem:[#allocation5 + $0x150] sm:$0xff]  ;;  %v4737_v43 = vld [vmem:[#allocation2 + $0xf8] sm:$0xff] }
  0x7d   :  { %5888 = vst [vmem:[#allocation43_spill] sm:$0xff] %v4685_v57  ;;  %v2818_v55 = vmul.f32 %v2754_v2, %v4685_v57  ;;  %v219_v24 = vsub.f32 %v4510_v19, %v4677_v58  ;;  %v251_v53 = vsub.f32 %v4663_v45, %v4677_v58  ;;  %v282_v60 = vmul.f32 %v218_v13, %v218_v13 }
  0x7e   :  { %v4692_v32 = vadd.f32 %v313_v41, %v281_v16  ;;  %v250_v41 = vsub.f32 %v4633_v54, %v4669_v29  ;;  %v4716_v16 = vld [vmem:[#allocation2 + $0xe8] sm:$0xff]  ;;  %v4719_v19 = vadd.f32 %v2819_v50, %v4455_v62  ;;  %vm450_vm8 = vcmp.eq.f32.partialorder %v4690_v39, inf }
  0x7f   :  { %v4710_v2 = vadd.f32 %v2818_v55, %v4453_v61  ;;  %v3673_v40 = vpop.eup %3672  ;;  %v283_v55 = vmul.f32 %v219_v24, %v219_v24  ;;  %v315_v62 = vmul.f32 %v251_v53, %v251_v53  ;;  %v4735_v61 = vld [vmem:[#allocation2 + $0xf0] sm:$0xff]  ;;  %vm452_vm9 = vcmp.eq.f32.partialorder %v4690_v39, 0.0 }
  0x80   :  { %5891 = vst [vmem:[#allocation46_spill] sm:$0xff] %v4719_v19  ;;  %3678 = vrsqrt.f32 %v4692_v32  ;;  %v435_v9 = vmul.f32 %v3673_v40, %v4629_v44  ;;  %v314_v50 = vmul.f32 %v250_v41, %v250_v41  ;;  %v602_v19 = vpack.c.bf16 %v4716_v16, %v4714_v8  ;;  %v4748_v41 = vld [vmem:[#allocation2 + $0x180] sm:$0xff] }
  0x81   :  { %3531 = vmatmul.mubr.bf16.gmra.mrb[20].mxu0 %v599_v46  ;;  %5890 = vst [vmem:[#allocation45_spill] sm:$0xff] %v4710_v2  ;;  %v3675_v46 = vpop.eup %3674  ;;  %v2757_v2 = vld [vmem:[#allocation5 + $0x158] sm:$0xff]  ;;  %v4755_v57 = vadd.f32 %v315_v62, %v283_v55  ;;  %v604_v62 = vpack.c.bf16 %v4279_v7, %v4277_v6  ;;  %vm457_vm10 = vcmp.eq.f32.partialorder %v4692_v32, inf  ;;  %v4785_v7 = vld [vmem:[#allocation2 + $0x190] sm:$0xff]  ;;  %vm459_vm11 = vcmp.eq.f32.partialorder %v4692_v32, 0.0 }
  0x82   :  { %3534 = vmatprep.mubr.bf16.mxu0 %v600_v28  ;;  %v442_v28 = vmul.f32 %v3675_v46, %v4638_v1  ;;  %v437_v40 = vsel %vm436_vm4, %v4629_v44, %v435_v9  ;;  %v4746_v24 = vadd.f32 %v314_v50, %v282_v60  ;;  %v155_v44 = vadd.f32 %v4748_v41, %v4528_v5 }
  0x83   :  { %v4741_v46 = vsel %vm438_vm5, %v439_v59, %v437_v40  ;;  %v460_v50 = vand.u32 2147483648, %v4692_v32  ;;  %v2758_v40 = vld [vmem:[#allocation5 + $0x160] sm:$0xff]  ;;  %vm471_vm14 = vcmp.eq.f32.partialorder %v4755_v57, inf  ;;  %vm473_vm15 = vcmp.eq.f32.partialorder %v4755_v57, 0.0 }
  0x84   :  { %5892 = vst [vmem:[#allocation47_spill] sm:$0xff] %v4741_v46  ;;  %v444_v13 = vsel %vm443_vm6, %v4638_v1, %v442_v28  ;;  %v2820_v53 = vmul.f32 %v2756_v52, %v4741_v46  ;;  %3680 = vrsqrt.f32 %v4746_v24  ;;  %v156_v28 = vadd.f32 %v4757_v11, %v4530_v15 }
  0x85   :  { %v4752_v9 = vsel %vm445_vm7, %v446_v0, %v444_v13  ;;  %v603_v1 = vpack.c.bf16 %v4737_v43, %v4735_v61  ;;  %3682 = vrsqrt.f32 %v4755_v57  ;;  %v4783_v6 = vmul.f32 0.5, %v155_v44 }
  0x86   :  { %5893 = vst [vmem:[#allocation48_spill] sm:$0xff] %v4752_v9  ;;  %v2821_v59 = vmul.f32 %v2757_v2, %v4752_v9  ;;  %v4772_v52 = vadd.f32 %v2820_v53, %v4559_v20  ;;  %v4789_v13 = vmul.f32 0.5, %v156_v28  ;;  %v157_v53 = vadd.f32 %v4785_v7, %v4587_v4 }
  0x87   :  { %v220_v44 = vsub.f32 %v4528_v5, %v4783_v6  ;;  %v252_v0 = vsub.f32 %v4748_v41, %v4783_v6  ;;  %vm464_vm12 = vcmp.eq.f32.partialorder %v4746_v24, inf  ;;  %vm466_vm13 = vcmp.eq.f32.partialorder %v4746_v24, 0.0 }
  0x88   :  { %5894 = vst [vmem:[#allocation49_spill] sm:$0xff] %v4772_v52  ;;  %v4775_v2 = vadd.f32 %v2821_v59, %v4561_v35  ;;  %v2759_v35 = vld [vmem:[#allocation5 + $0x168] sm:$0xff]  ;;  %v221_v28 = vsub.f32 %v4530_v15, %v4789_v13  ;;  %v253_v20 = vsub.f32 %v4757_v11, %v4789_v13  ;;  %v4813_v9 = vmul.f32 0.5, %v157_v53 }
  0x89   :  { %3535 = vmatmul.mubr.bf16.gmra.mrb[24].mxu0 %v601_v37  ;;  %v3677_v37 = vpop.eup %3676 }
  0x8a   :  { %3538 = vmatprep.mubr.bf16.mxu0 %v602_v19  ;;  %5895 = vst [vmem:[#allocation50_spill] sm:$0xff] %v4775_v2  ;;  %v453_v19 = vand.u32 2147483648, %v4690_v39  ;;  %v449_v60 = vmul.f32 %v3677_v37, %v4690_v39  ;;  %v3679_v55 = vpop.eup %3678  ;;  %v4799_v2 = vld [vmem:[#allocation2 + $0x198] sm:$0xff]  ;;  %v285_v15 = vmul.f32 %v221_v28, %v221_v28  ;;  %v317_v46 = vmul.f32 %v253_v20, %v253_v20 }
  0x8b   :  { %v456_v37 = vmul.f32 %v3679_v55, %v4692_v32  ;;  %v284_v55 = vmul.f32 %v220_v44, %v220_v44  ;;  %v254_v53 = vsub.f32 %v4785_v7, %v4813_v9 }
  0x8c   :  { %v451_v59 = vsel %vm450_vm8, %v4690_v39, %v449_v60  ;;  %v158_v39 = vadd.f32 %v4799_v2, %v4589_v25 }
  0x8d   :  { %v4801_v52 = vsel %vm452_vm9, %v453_v19, %v451_v59  ;;  %v458_v5 = vsel %vm457_vm10, %v4692_v32, %v456_v37  ;;  %v316_v59 = vmul.f32 %v252_v0, %v252_v0 }
  0x8e   :  { %v2822_v60 = vmul.f32 %v2758_v40, %v4801_v52  ;;  %v4817_v19 = vsel %vm459_vm11, %v460_v50, %v458_v5  ;;  %v3681_v40 = vpop.eup %3680  ;;  %v4829_v50 = vadd.f32 %v317_v46, %v285_v15  ;;  %v4831_v0 = vmul.f32 0.5, %v158_v39  ;;  %v2761_v39 = vld [vmem:[#allocation5 + $0x178] sm:$0xff] }
  0x8f   :  { %v2823_v17 = vmul.f32 %v2759_v35, %v4817_v19  ;;  %v4827_v32 = vadd.f32 %v316_v59, %v284_v55  ;;  %v463_v34 = vmul.f32 %v3681_v40, %v4746_v24  ;;  %v3683_v36 = vpop.eup %3682  ;;  %v474_v35 = vand.u32 2147483648, %v4755_v57 }
  0x90   :  { %v4823_v37 = vadd.f32 %v2822_v60, %v4627_v18  ;;  %v222_v46 = vsub.f32 %v4587_v4, %v4813_v9  ;;  %v470_v44 = vmul.f32 %v3683_v36, %v4755_v57  ;;  %v223_v5 = vsub.f32 %v4589_v25, %v4831_v0  ;;  %v4870_v36 = vld [vmem:[#allocation2 + $0x1a8] sm:$0xff] }
  0x91   :  { %3539 = vmatmul.mubr.bf16.gmra.mrb[28].mxu0 %v603_v1  ;;  %v467_v1 = vand.u32 2147483648, %v4746_v24  ;;  %v4834_v20 = vadd.f32 %v2823_v17, %v4631_v33  ;;  %3684 = vrsqrt.f32 %v4827_v32  ;;  %v465_v17 = vsel %vm464_vm12, %v4746_v24, %v463_v34 }
  0x92   :  { %3542 = vmatprep.mubr.bf16.mxu0 %v604_v62  ;;  %5896 = vst [vmem:[#allocation51_spill] sm:$0xff] %v4823_v37  ;;  %v2760_v62 = vld [vmem:[#allocation5 + $0x170] sm:$0xff]  ;;  %3686 = vrsqrt.f32 %v4829_v50  ;;  %v472_v4 = vsel %vm471_vm14, %v4755_v57, %v470_v44  ;;  %v255_v55 = vsub.f32 %v4799_v2, %v4831_v0  ;;  %v5898_v24 = vpack.c.bf16 %v4318_v31, %v4316_v30  ;;  %v4868_v57 = vld [vmem:[#allocation2 + $0x1a0] sm:$0xff] }
  0x93   :  { %5897 = vst [vmem:[#allocation52_spill] sm:$0xff] %v4834_v20  ;;  %v4851_v28 = vsel %vm466_vm13, %v467_v1, %v465_v17  ;;  %v4862_v15 = vsel %vm473_vm15, %v474_v35, %v472_v4  ;;  %v286_v59 = vmul.f32 %v222_v46, %v222_v46  ;;  %v287_v40 = vmul.f32 %v223_v5, %v223_v5 }
  0x94   :  { %v2824_v60 = vmul.f32 %v2760_v62, %v4851_v28  ;;  %v318_v1 = vmul.f32 %v254_v53, %v254_v53  ;;  %v2825_v34 = vmul.f32 %v2761_v39, %v4862_v15  ;;  %v319_v62 = vmul.f32 %v255_v55, %v255_v55  ;;  %v4886_v53 = vld [vmem:[#allocation2 + $0x1b0] sm:$0xff]  ;;  %v4892_v39 = vld [vmem:[#allocation2 + $0x1b8] sm:$0xff] }
  0x95   :  { %v159_v30 = vadd.f32 %v4868_v57, %v4601_v14  ;;  %v160_v31 = vadd.f32 %v4870_v36, %v4603_v42  ;;  %v608_v35 = vpack.c.bf16 %v4436_v48, %v4434_v47  ;;  %vm478_vm0 = vcmp.eq.f32.partialorder %v4827_v32, inf }
  0x96   :  { %v4866_v25 = vadd.f32 %v2824_v60, %v4669_v29  ;;  %v4872_v17 = vadd.f32 %v318_v1, %v286_v59  ;;  %v4883_v46 = vadd.f32 %v2825_v34, %v4677_v58  ;;  %vm480_vm1 = vcmp.eq.f32.partialorder %v4827_v32, 0.0 }
  0x97   :  { %v4889_v44 = vadd.f32 %v319_v62, %v287_v40  ;;  %v4897_v47 = vmul.f32 0.5, %v159_v30  ;;  %v4899_v48 = vmul.f32 0.5, %v160_v31  ;;  %v162_v5 = vadd.f32 %v4892_v39, %v4624_v49  ;;  %v2762_v62 = vld [vmem:[#allocation5 + $0x180] sm:$0xff] }
  0x98   :  { %5899 = vst [vmem:[#allocation53_spill] sm:$0xff] %v4866_v25  ;;  %5900 = vst [vmem:[#allocation54_spill] sm:$0xff] %v4883_v46  ;;  %3688 = vrsqrt.f32 %v4872_v17  ;;  %vm485_vm2 = vcmp.eq.f32.partialorder %v4829_v50, inf  ;;  %vm487_vm3 = vcmp.eq.f32.partialorder %v4829_v50, 0.0  ;;  %v488_v60 = vand.u32 2147483648, %v4829_v50 }
  0x99   :  { %3543 = vmatmul.mubr.bf16.gmra.mrb[32].mxu0 %v5898_v24  ;;  %3690 = vrsqrt.f32 %v4889_v44  ;;  %v224_v59 = vsub.f32 %v4601_v14, %v4897_v47  ;;  %v225_v40 = vsub.f32 %v4603_v42, %v4899_v48  ;;  %v256_v1 = vsub.f32 %v4868_v57, %v4897_v47  ;;  %v2763_v42 = vld [vmem:[#allocation5 + $0x188] sm:$0xff] }
  0x9a   :  { %3546 = vmatprep.mubr.bf16.mxu0 %v606_v21  ;;  %v607_v21 = vpack.c.bf16 %v4403_v26, %v4373_v3  ;;  %v161_v3 = vadd.f32 %v4886_v53, %v4622_v23  ;;  %v481_v26 = vand.u32 2147483648, %v4827_v32  ;;  %v257_v30 = vsub.f32 %v4870_v36, %v4899_v48 }
  0x9b   :  { %v3685_v4 = vpop.eup %3684  ;;  %v4919_v46 = vmul.f32 0.5, %v162_v5  ;;  %v289_v25 = vmul.f32 %v225_v40, %v225_v40  ;;  %v320_v20 = vmul.f32 %v256_v1, %v256_v1  ;;  %v610_v1 = vpack.c.bf16 %v4599_v27, %v4568_v38  ;;  %v2764_v27 = vld [vmem:[#allocation5 + $0x190] sm:$0xff] }
  0x9c   :  { %v3687_v55 = vpop.eup %3686  ;;  %v477_v24 = vmul.f32 %v3685_v4, %v4827_v32  ;;  %v4917_v31 = vmul.f32 0.5, %v161_v3  ;;  %v288_v4 = vmul.f32 %v224_v59, %v224_v59  ;;  %v609_v59 = vpack.c.bf16 %v4462_v12, %v4457_v63 }
  0x9d   :  { %v484_v34 = vmul.f32 %v3687_v55, %v4829_v50  ;;  %v321_v55 = vmul.f32 %v257_v30, %v257_v30  ;;  %vm492_vm4 = vcmp.eq.f32.partialorder %v4872_v17, inf  ;;  %v495_v12 = vand.u32 2147483648, %v4872_v17 }
  0x9e   :  { %v479_v14 = vsel %vm478_vm0, %v4827_v32, %v477_v24  ;;  %v4936_v24 = vadd.f32 %v320_v20, %v288_v4  ;;  %v226_v40 = vsub.f32 %v4622_v23, %v4917_v31  ;;  %v227_v20 = vsub.f32 %v4624_v49, %v4919_v46 }
  0x9f   :  { %v486_v3 = vsel %vm485_vm2, %v4829_v50, %v484_v34  ;;  %vm494_vm5 = vcmp.eq.f32.partialorder %v4872_v17, 0.0  ;;  %vm499_vm6 = vcmp.eq.f32.partialorder %v4889_v44, inf  ;;  %v502_v49 = vand.u32 2147483648, %v4889_v44 }
  0xa0   :  { %3692 = vrsqrt.f32 %v4936_v24  ;;  %v259_v34 = vsub.f32 %v4892_v39, %v4919_v46  ;;  %vm501_vm7 = vcmp.eq.f32.partialorder %v4889_v44, 0.0  ;;  %vm506_vm8 = vcmp.eq.f32.partialorder %v4936_v24, inf }
  0xa1   :  { %3547 = vmatmul.mubr.bf16.gmra.mrb[36].mxu0 %v607_v21  ;;  %v4926_v21 = vsel %vm480_vm1, %v481_v26, %v479_v14  ;;  %v4941_v26 = vadd.f32 %v321_v55, %v289_v25  ;;  %v258_v25 = vsub.f32 %v4886_v53, %v4917_v31  ;;  %vm508_vm9 = vcmp.eq.f32.partialorder %v4936_v24, 0.0 }
  0xa2   :  { %3550 = vmatprep.mubr.bf16.mxu0 %v608_v35  ;;  %v4933_v35 = vsel %vm487_vm3, %v488_v60, %v486_v3  ;;  %v2826_v5 = vmul.f32 %v2762_v62, %v4926_v21  ;;  %v3689_v60 = vpop.eup %3688  ;;  %v290_v62 = vmul.f32 %v226_v40, %v226_v40  ;;  %v2765_v3 = vld [vmem:[#allocation5 + $0x198] sm:$0xff]  ;;  %v611_v40 = vpack.c.bf16 %v4663_v45, %v4633_v54 }
  0xa3   :  { %v2827_v32 = vmul.f32 %v2763_v42, %v4933_v35  ;;  %v491_v23 = vmul.f32 %v3689_v60, %v4872_v17  ;;  %3694 = vrsqrt.f32 %v4941_v26  ;;  %v3691_v38 = vpop.eup %3690  ;;  %v291_v42 = vmul.f32 %v227_v20, %v227_v20 }
  0xa4   :  { %v4948_v50 = vadd.f32 %v2826_v5, %v4783_v6  ;;  %v498_v14 = vmul.f32 %v3691_v38, %v4889_v44  ;;  %v322_v55 = vmul.f32 %v258_v25, %v258_v25  ;;  %v323_v5 = vmul.f32 %v259_v34, %v259_v34  ;;  %v3635_v25 = vld [vmem:[%s5821_s4 + $0x30] ss:$8 sps:$4 sm:$0xff]  }
  0xa5   :  { %v4954_v63 = vadd.f32 %v2827_v32, %v4789_v13  ;;  %v493_v30 = vsel %vm492_vm4, %v4872_v17, %v491_v23  ;;  %v3630_v17 = vld [vmem:[%s5821_s4 + $0x24] ss:$8 sps:$4 sm:$0xff]   ;;  %vm513_vm10 = vcmp.eq.f32.partialorder %v4941_v26, inf  ;;  %vm515_vm11 = vcmp.eq.f32.partialorder %v4941_v26, 0.0 }
  0xa6   :  { %5901 = vst [vmem:[#allocation55_spill] sm:$0xff] %v4948_v50  ;;  %v4970_v4 = vsel %vm494_vm5, %v495_v12, %v493_v30  ;;  %v4983_v20 = vadd.f32 %v322_v55, %v290_v62  ;;  %v4985_v60 = vadd.f32 %v323_v5, %v291_v42  ;;  %v3632_v12 = vld [vmem:[%s5821_s4 + $0x20] ss:$8 sps:$4 sm:$0xff]   ;;  %1237 = vmatprep.subr.bf16.mxu1 %v3630_v17  ;;  %v516_v62 = vand.u32 2147483648, %v4941_v26 }
  0xa7   :  { %5902 = vst [vmem:[#allocation56_spill] sm:$0xff] %v4954_v63  ;;  %v2828_v32 = vmul.f32 %v2764_v27, %v4970_v4  ;;  %1238 = vmatpush1.bf16.msra.mxu1 %v3632_v12  ;;  %v614_v30 = vpack.c.bf16 %v4870_v36, %v4868_v57  ;;  %v5027_v55 = vld [vmem:[#allocation2 + $0x1c8] sm:$0xff]  ;;  %v5045_v12 = vld [vmem:[#allocation2 + $0x1d8] sm:$0xff] }
  0xa8   :  { %3696 = vrsqrt.f32 %v4983_v20  ;;  %vm520_vm12 = vcmp.eq.f32.partialorder %v4983_v20, inf  ;;  %v2767_v36 = vld [vmem:[#allocation5 + $0x1a8] sm:$0xff]  ;;  %vm522_vm13 = vcmp.eq.f32.partialorder %v4983_v20, 0.0  ;;  %vm527_vm14 = vcmp.eq.f32.partialorder %v4985_v60, inf }
  0xa9   :  { %3551 = vmatmul.mubr.bf16.gmra.mrb[40].mxu0 %v609_v59  ;;  %v500_v59 = vsel %vm499_vm6, %v4889_v44, %v498_v14  ;;  %v612_v44 = vpack.c.bf16 %v4757_v11, %v4748_v41  ;;  %v4994_v38 = vadd.f32 %v2828_v32, %v4813_v9  ;;  %3698 = vrsqrt.f32 %v4985_v60  ;;  %v3633_v11 = vld [vmem:[%s5821_s4 + $0x34] ss:$8 sps:$4 sm:$0xff]  }
  0xaa   :  { %3554 = vmatprep.mubr.bf16.mxu0 %v610_v1  ;;  %v4981_v1 = vsel %vm501_vm7, %v502_v49, %v500_v59  ;;  %v3693_v54 = vpop.eup %3692  ;;  %v509_v49 = vand.u32 2147483648, %v4936_v24  ;;  %v613_v41 = vpack.c.bf16 %v4799_v2, %v4785_v7  ;;  %v2766_v2 = vld [vmem:[#allocation5 + $0x1a0] sm:$0xff]  ;;  %1239 = vmatprep.subr.bf16.mxu1 %v3633_v11  ;;  %v164_v59 = vadd.f32 %v5027_v55, %v4655_v10  ;;  %v5037_v32 = vld [vmem:[#allocation2 + $0x1d0] sm:$0xff] }
  0xab   :  { %v2829_v23 = vmul.f32 %v2765_v3, %v4981_v1  ;;  %5903 = vst [vmem:[#allocation57_spill] sm:$0xff] %v4994_v38  ;;  %v505_v27 = vmul.f32 %v3693_v54, %v4936_v24  ;;  %1240 = vmatpush1.bf16.msra.mxu1 %v3635_v25  ;;  %v5025_v3 = vld [vmem:[#allocation2 + $0x1c0] sm:$0xff]  ;;  %v166_v11 = vadd.f32 %v5045_v12, %v4681_v56  ;;  %vm529_vm15 = vcmp.eq.f32.partialorder %v4985_v60, 0.0 }
  0xac   :  { %v163_v5 = vadd.f32 %v5025_v3, %v4653_v22 }
  0xad   :  { %v4998_v45 = vadd.f32 %v2829_v23, %v4831_v0  ;;  %v3695_v34 = vpop.eup %3694  ;;  %v507_v7 = vsel %vm506_vm8, %v4936_v24, %v505_v27  ;;  %v5851_v24 = vmov 0  }
  0xae   :  { %v512_v14 = vmul.f32 %v3695_v34, %v4941_v26  ;;  %v5031_v57 = vsel %vm508_vm9, %v509_v49, %v507_v7  ;;  %1265 = vmatprep.mubr.bf16.mxu1 %v5851_v24  ;;  %v5053_v54 = vmul.f32 0.5, %v163_v5  ;;  %v5055_v49 = vmul.f32 0.5, %v164_v59  ;;  %3574 = vmatprep.subr.bf16.mxu1 %v5851_v24 }
  0xaf   :  { %5904 = vst [vmem:[#allocation58_spill] sm:$0xff] %v4998_v45  ;;  %1913 = vmatprep.subr.bf16.mxu0 %v5851_v24  ;;  %v530_v5 = vand.u32 2147483648, %v4985_v60 }
  0xb0   :  { %v514_v17 = vsel %vm513_vm10, %v4941_v26, %v512_v14  ;;  %v523_v26 = vand.u32 2147483648, %v4983_v20  ;;  %v228_v34 = vsub.f32 %v4653_v22, %v5053_v54  ;;  %v261_v7 = vsub.f32 %v5027_v55, %v5055_v49 }
  0xb1   :  { %3555 = vmatmul.mubr.bf16.gmra.mrb[44].mxu0 %v611_v40  ;;  %v2830_v40 = vmul.f32 %v2766_v2, %v5031_v57  ;;  %v5051_v23 = vsel %vm515_vm11, %v516_v62, %v514_v17  ;;  %v229_v62 = vsub.f32 %v4655_v10, %v5055_v49  ;;  %v260_v2 = vsub.f32 %v5025_v3, %v5053_v54 }
  0xb2   :  { %3558 = vmatprep.mubr.bf16.mxu0 %v612_v44  ;;  %v165_v44 = vadd.f32 %v5037_v32, %v4679_v51  ;;  %v2831_v27 = vmul.f32 %v2767_v36, %v5051_v23  ;;  %v3697_v14 = vpop.eup %3696  ;;  %v5081_v17 = vmul.f32 0.5, %v166_v11  ;;  %v2769_v11 = vld [vmem:[#allocation5 + $0x1b8] sm:$0xff] }
  0xb3   :  { %v5063_v25 = vadd.f32 %v2830_v40, %v4897_v47  ;;  %v3699_v22 = vpop.eup %3698  ;;  %v519_v10 = vmul.f32 %v3697_v14, %v4983_v20  ;;  %v292_v40 = vmul.f32 %v228_v34, %v228_v34  ;;  %v293_v24 = vmul.f32 %v229_v62, %v229_v62 }
  0xb4   :  { %v5076_v36 = vadd.f32 %v2831_v27, %v4899_v48  ;;  %v5079_v59 = vmul.f32 0.5, %v165_v44  ;;  %v324_v42 = vmul.f32 %v260_v2, %v260_v2  ;;  %v325_v27 = vmul.f32 %v261_v7, %v261_v7 }
  0xb5   :  { %5905 = vst [vmem:[#allocation59_spill] sm:$0xff] %v5063_v25  ;;  %v526_v25 = vmul.f32 %v3699_v22, %v4985_v60  ;;  %v521_v44 = vsel %vm520_vm12, %v4983_v20, %v519_v10  ;;  %v231_v62 = vsub.f32 %v4681_v56, %v5081_v17  ;;  %v263_v56 = vsub.f32 %v5045_v12, %v5081_v17  ;;  %v135_v10 = vld [vmem:[#allocation2 + $0x1e0] sm:$0xff] }
  0xb6   :  { %5906 = vst [vmem:[#allocation60_spill] sm:$0xff] %v5076_v36  ;;  %v616_v36 = vpack.c.bf16 %v5027_v55, %v5025_v3  ;;  %v230_v34 = vsub.f32 %v4679_v51, %v5079_v59  ;;  %v5099_v2 = vsel %vm522_vm13, %v523_v26, %v521_v44  ;;  %v5104_v55 = vadd.f32 %v325_v27, %v293_v24 }
  0xb7   :  { %v528_v3 = vsel %vm527_vm14, %v4985_v60, %v526_v25  ;;  %v5908_v24 = vpack.c.bf16 %v4892_v39, %v4886_v53  ;;  %v295_v14 = vmul.f32 %v231_v62, %v231_v62  ;;  %v327_v22 = vmul.f32 %v263_v56, %v263_v56  ;;  %v137_v39 = vld [vmem:[#allocation2 + $0x1f0] sm:$0xff] }
  0xb8   :  { %v5108_v7 = vsel %vm529_vm15, %v530_v5, %v528_v3  ;;  %v294_v60 = vmul.f32 %v230_v34, %v230_v34  ;;  %v617_v53 = vpack.c.bf16 %v5045_v12, %v5037_v32  ;;  %v138_v34 = vld [vmem:[#allocation2 + $0x1f8] sm:$0xff]  ;;  %v169_v62 = vadd.f32 %v137_v39, %v4735_v61 }
  0xb9   :  { %3559 = vmatmul.mubr.bf16.gmra.mrb[48].mxu0 %v613_v41  ;;  %v2768_v41 = vld [vmem:[#allocation5 + $0x1b0] sm:$0xff]  ;;  %v2833_v20 = vmul.f32 %v2769_v11, %v5108_v7  ;;  %v5129_v11 = vadd.f32 %v327_v22, %v295_v14  ;;  %vm541_vm2 = vcmp.eq.f32.partialorder %v5104_v55, inf  ;;  %vm543_vm3 = vcmp.eq.f32.partialorder %v5104_v55, 0.0 }
  0xba   :  { %3562 = vmatprep.mubr.bf16.mxu0 %v614_v30  ;;  %v5091_v30 = vadd.f32 %v324_v42, %v292_v40  ;;  %v262_v42 = vsub.f32 %v5037_v32, %v5079_v59  ;;  %v2832_v51 = vmul.f32 %v2768_v41, %v5099_v2  ;;  %v136_v40 = vld [vmem:[#allocation2 + $0x1e8] sm:$0xff]  ;;  %v167_v41 = vadd.f32 %v135_v10, %v4714_v8 }
  0xbb   :  { %v5123_v25 = vadd.f32 %v2833_v20, %v4919_v46  ;;  %v168_v27 = vadd.f32 %v136_v40, %v4716_v16  ;;  %v5153_v22 = vmul.f32 0.5, %v169_v62  ;;  %vm555_vm6 = vcmp.eq.f32.partialorder %v5129_v11, inf }
  0xbc   :  { %3700 = vrsqrt.f32 %v5091_v30  ;;  %v5116_v26 = vadd.f32 %v2832_v51, %v4917_v31  ;;  %v326_v5 = vmul.f32 %v262_v42, %v262_v42  ;;  %v5133_v3 = vmul.f32 0.5, %v167_v41 }
  0xbd   :  { %3702 = vrsqrt.f32 %v5104_v55  ;;  %5909 = vst [vmem:[#allocation62_spill] sm:$0xff] %v5123_v25  ;;  %v170_v42 = vadd.f32 %v138_v34, %v4737_v43  ;;  %vm534_vm0 = vcmp.eq.f32.partialorder %v5091_v30, inf  ;;  %v618_v51 = vpack.c.bf16 %v136_v40, %v135_v10  ;;  %5912 = vst [vmem:[#allocation65_spill] sm:$0xff] %v5153_v22  ;;  %v2770_v25 = vld [vmem:[#allocation5 + $0x1c0] sm:$0xff] }
  0xbe   :  { %5907 = vst [vmem:[#allocation61_spill] sm:$0xff] %v5116_v26  ;;  %v5127_v44 = vadd.f32 %v326_v5, %v294_v60  ;;  %5910 = vst [vmem:[#allocation63_spill] sm:$0xff] %v5133_v3  ;;  %vm536_vm1 = vcmp.eq.f32.partialorder %v5091_v30, 0.0  ;;  %v537_v56 = vand.u32 2147483648, %v5091_v30  ;;  %v232_v12 = vsub.f32 %v4714_v8, %v5133_v3 }
  0xbf   :  { %v264_v60 = vsub.f32 %v135_v10, %v5133_v3  ;;  %v544_v5 = vand.u32 2147483648, %v5104_v55  ;;  %v5155_v41 = vmul.f32 0.5, %v170_v42  ;;  %vm557_vm7 = vcmp.eq.f32.partialorder %v5129_v11, 0.0 }
  0xc0   :  { %3704 = vrsqrt.f32 %v5127_v44  ;;  %v296_v26 = vmul.f32 %v232_v12, %v232_v12  ;;  %v234_v12 = vsub.f32 %v4735_v61, %v5153_v22  ;;  %vm548_vm4 = vcmp.eq.f32.partialorder %v5127_v44, inf }
  0xc1   :  { %3563 = vmatmul.mubr.bf16.gmra.mrb[52].mxu0 %v5908_v24  ;;  %3706 = vrsqrt.f32 %v5129_v11  ;;  %5913 = vst [vmem:[#allocation66_spill] sm:$0xff] %v5155_v41  ;;  %v328_v45 = vmul.f32 %v264_v60, %v264_v60  ;;  %vm550_vm5 = vcmp.eq.f32.partialorder %v5127_v44, 0.0  ;;  %v551_v61 = vand.u32 2147483648, %v5127_v44 }
  0xc2   :  { %3566 = vmatprep.mubr.bf16.mxu0 %v616_v36  ;;  %v5135_v36 = vmul.f32 0.5, %v168_v27 }
  0xc3   :  { %v360_v62 = vadd.f32 %v328_v45, %v296_v26 }
  0xc4   :  { %5911 = vst [vmem:[#allocation64_spill] sm:$0xff] %v5135_v36  ;;  %v233_v20 = vsub.f32 %v4716_v16, %v5135_v36  ;;  %v265_v24 = vsub.f32 %v136_v40, %v5135_v36 }
  0xc5   :  { %3708 = vrsqrt.f32 %v360_v62  ;;  %vm562_vm8 = vcmp.eq.f32.partialorder %v360_v62, inf  ;;  %vm564_vm9 = vcmp.eq.f32.partialorder %v360_v62, 0.0 }
  0xc6   :  { %v3701_v32 = vpop.eup %3700  ;;  %v297_v8 = vmul.f32 %v233_v20, %v233_v20  ;;  %v329_v38 = vmul.f32 %v265_v24, %v265_v24  ;;  %v619_v20 = vpack.c.bf16 %v138_v34, %v137_v39  ;;  %v558_v24 = vand.u32 2147483648, %v5129_v11 }
  0xc7   :  { %v533_v14 = vmul.f32 %v3701_v32, %v5091_v30  ;;  %v3703_v27 = vpop.eup %3702 }
  0xc8   :  { %v540_v10 = vmul.f32 %v3703_v27, %v5104_v55  ;;  %v361_v42 = vadd.f32 %v329_v38, %v297_v8 }
  0xc9   :  { %3567 = vmatmul.mubr.bf16.gmra.mrb[56].mxu0 %v617_v53  ;;  %v535_v16 = vsel %vm534_vm0, %v5091_v30, %v533_v14  ;;  %v2771_v53 = vld [vmem:[#allocation5 + $0x1c8] sm:$0xff]  ;;  %v235_v30 = vsub.f32 %v4737_v43, %v5155_v41  ;;  %v2772_v14 = vld [vmem:[#allocation5 + $0x1d0] sm:$0xff]  ;;  %vm1136_vm0 = vcmask 523264  }
  0xca   :  { %3570 = vmatprep.mubr.bf16.mxu0 %v618_v51  ;;  %v5164_v40 = vsel %vm536_vm1, %v537_v56, %v535_v16  ;;  %v542_v32 = vsel %vm541_vm2, %v5104_v55, %v540_v10  ;;  %v266_v56 = vsub.f32 %v137_v39, %v5153_v22  ;;  %v267_v55 = vsub.f32 %v138_v34, %v5155_v41  ;;  %v3705_v26 = vpop.eup %3704  ;;  %v2773_v10 = vld [vmem:[#allocation5 + $0x1d8] sm:$0xff] }
  0xcb   :  { %v2834_v51 = vmul.f32 %v2770_v25, %v5164_v40  ;;  %v5172_v60 = vsel %vm543_vm3, %v544_v5, %v542_v32  ;;  %3710 = vrsqrt.f32 %v361_v42  ;;  %v3707_v43 = vpop.eup %3706  ;;  %v547_v39 = vmul.f32 %v3705_v26, %v5127_v44 }
  0xcc   :  { %v2835_v38 = vmul.f32 %v2771_v53, %v5172_v60  ;;  %v554_v34 = vmul.f32 %v3707_v43, %v5129_v11  ;;  %v298_v5 = vmul.f32 %v234_v12, %v234_v12  ;;  %v299_v27 = vmul.f32 %v235_v30, %v235_v30 }
  0xcd   :  { %v5179_v45 = vadd.f32 %v2834_v51, %v5053_v54  ;;  %v330_v8 = vmul.f32 %v266_v56, %v266_v56  ;;  %v549_v16 = vsel %vm548_vm4, %v5127_v44, %v547_v39  ;;  %v331_v53 = vmul.f32 %v267_v55, %v267_v55 }
  0xce   :  { %v5187_v25 = vadd.f32 %v2835_v38, %v5055_v49  ;;  %v5198_v32 = vsel %vm550_vm5, %v551_v61, %v549_v16  ;;  %v556_v51 = vsel %vm555_vm6, %v5129_v11, %v554_v34  ;;  %v565_v61 = vand.u32 2147483648, %v360_v62 }
  0xcf   :  { %5914 = vst [vmem:[#allocation67_spill] sm:$0xff] %v5179_v45  ;;  %v5203_v38 = vsel %vm557_vm7, %v558_v24, %v556_v51  ;;  %v2836_v12 = vmul.f32 %v2772_v14, %v5198_v32  ;;  %v363_v30 = vadd.f32 %v331_v53, %v299_v27  ;;  %v3709_v55 = vpop.eup %3708  ;;  %vm569_vm10 = vcmp.eq.f32.partialorder %v361_v42, inf  ;;  %v2774_v24 = vld [vmem:[#allocation5 + $0x1e0] sm:$0xff]  ;;  %v2775_v27 = vld [vmem:[#allocation5 + $0x1e8] sm:$0xff] }
  0xd0   :  { %5915 = vst [vmem:[#allocation68_spill] sm:$0xff] %v5187_v25  ;;  %v2837_v56 = vmul.f32 %v2773_v10, %v5203_v38  ;;  %v561_v11 = vmul.f32 %v3709_v55, %v360_v62  ;;  %v572_v39 = vand.u32 2147483648, %v361_v42  ;;  %vm571_vm11 = vcmp.eq.f32.partialorder %v361_v42, 0.0  ;;  %v3636_v45 = vld [vmem:[#allocation7] sm:$0xff]  }
  0xd1   :  { %3571 = vmatmul.mubr.bf16.gmra.mrb[60].mxu0 %v619_v20  ;;  %v362_v20 = vadd.f32 %v330_v8, %v298_v5  ;;  %v5208_v26 = vadd.f32 %v2836_v12, %v5079_v59  ;;  %vm583_vm14 = vcmp.eq.f32.partialorder %v363_v30, inf  ;;  %vm585_vm15 = vcmp.eq.f32.partialorder %v363_v30, 0.0 }
  0xd2   :  { %v5211_v44 = vadd.f32 %v2837_v56, %v5081_v17  ;;  %v563_v34 = vsel %vm562_vm8, %v360_v62, %v561_v11  ;;  %v2776_v11 = vld [vmem:[#allocation5 + $0x1f0] sm:$0xff]  ;;  %1914 = vmatpush1.bf16.msra.mxu0 %v3636_v45 }
  0xd3   :  { %3712 = vrsqrt.f32 %v362_v20  ;;  %5916 = vst [vmem:[#allocation69_spill] sm:$0xff] %v5208_v26  ;;  %v5213_v5 = vsel %vm564_vm9, %v565_v61, %v563_v34  ;;  %vm576_vm12 = vcmp.eq.f32.partialorder %v362_v20, inf  ;;  %v579_v56 = vand.u32 2147483648, %v362_v20  ;;  %v2777_v34 = vld [vmem:[#allocation5 + $0x1f8] sm:$0xff] }
  0xd4   :  { %5917 = vst [vmem:[#allocation70_spill] sm:$0xff] %v5211_v44  ;;  %3714 = vrsqrt.f32 %v363_v30  ;;  %v2838_v16 = vmul.f32 %v2774_v24, %v5213_v5  ;;  %vm578_vm13 = vcmp.eq.f32.partialorder %v362_v20, 0.0 }
  0xd5   :  { %v3711_v43 = vpop.eup %3710 }
  0xd6   :  { %v568_v14 = vmul.f32 %v3711_v43, %v361_v42  ;;  %v5220_v51 = vadd.f32 %v2838_v16, %v5133_v3 }
  0xd8   :  { %v570_v8 = vsel %vm569_vm10, %v361_v42, %v568_v14  ;;  %5919 = vst [vmem:[#allocation72_spill] sm:$0xff] %v5220_v51  ;;  %v586_v42 = vand.u32 2147483648, %v363_v30 }
  0xd9   :  { %v5216_v10 = vsel %vm571_vm11, %v572_v39, %v570_v8 }
  0xda   :  { %5918 = vst [vmem:[#allocation71_spill] sm:$0xff] %v5216_v10  ;;  %v2839_v53 = vmul.f32 %v2775_v27, %v5216_v10 }
  0xdc   :  { %v5223_v62 = vadd.f32 %v2839_v53, %v5135_v36 }
  0xdd   :  { %v3713_v12 = vpop.eup %3712 }
  0xde   :  { %5920 = vst [vmem:[#allocation73_spill] sm:$0xff] %v5223_v62  ;;  %v575_v55 = vmul.f32 %v3713_v12, %v362_v20  ;;  %v3715_v61 = vpop.eup %3714 }
  0xdf   :  { %v582_v39 = vmul.f32 %v3715_v61, %v363_v30 }
  0xe0   :  { %v577_v43 = vsel %vm576_vm12, %v362_v20, %v575_v55  ;;  %v5240_v20 = vld [vmem:[%s5820_s3] ss:$0 sm:$0xff] }
  0xe1   :  { %v5225_v24 = vsel %vm578_vm13, %v579_v56, %v577_v43  ;;  %v584_v14 = vsel %vm583_vm14, %v363_v30, %v582_v39 }
  0xe2   :  { %5921 = vst [vmem:[#allocation74_spill] sm:$0xff] %v5225_v24  ;;  %v2840_v27 = vmul.f32 %v2776_v11, %v5225_v24  ;;  %v5228_v8 = vsel %vm585_vm15, %v586_v42, %v584_v14 }
  0xe3   :  { %5922 = vst [vmem:[#allocation75_spill] sm:$0xff] %v5228_v8  ;;  %v2841_v16 = vmul.f32 %v2777_v34, %v5228_v8 }
  0xe4   :  { %v5232_v53 = vadd.f32 %v2840_v27, %v5153_v22 }
  0xe5   :  { %v5235_v12 = vadd.f32 %v2841_v16, %v5155_v41 }
  0xe6   :  { %5923 = vst [vmem:[#allocation76_spill] sm:$0xff] %v5232_v53 }
  0xe7   :  { %5924 = vst [vmem:[#allocation77_spill] sm:$0xff] %v5235_v12 }
 0x12c   :  { %v3512_v56 = vpop.f32.mrb[0].mxu0 }
 0x12d   :  { %v734_v30 = vadd.f32 %v3512_v56, %v5240_v20  ;;  %v725_v55 = vpop.f32.mrb[1].mxu0 }
 0x12e   :  { %v726_v61 = vadd.f32 %v5240_v20, %v725_v55  ;;  %v3513_v42 = vpop.f32.mrb[2].mxu0 }
 0x12f   :  { %v737_v11 = vadd.f32 %v3513_v42, %v5240_v20  ;;  %v728_v43 = vpop.f32.mrb[3].mxu0  ;;  %v982_v34 = vmax.f32 %v734_v30, 0.0  ;;  %v5925_v30 = vmov 0  }
 0x130   :  { %v729_v39 = vadd.f32 %v5240_v20, %v728_v43  ;;  %v980_v27 = vmax.f32 %v726_v61, 0.0  ;;  %1915 = vmatprep.subr.bf16.mxu0 %v5925_v30 }
 0x131   :  { %v983_v14 = vmax.f32 %v737_v11, 0.0 }
 0x132   :  { %v981_v16 = vmax.f32 %v729_v39, 0.0 }
 0x133   :  { %v1045_v12 = vpack.c.bf16 %v983_v14, %v982_v34 }
 0x134   :  { %v1044_v53 = vpack.c.bf16 %v981_v16, %v980_v27  ;;  %v3516_v62 = vpop.f32.mrb[4].mxu0 }
 0x135   :  { %v750_v51 = vadd.f32 %v3516_v62, %v5240_v20  ;;  %v741_v56 = vpop.f32.mrb[5].mxu0 }
 0x136   :  { %3341 = vmatmul.mubr.msk.bf16.vlgmr.msra.gmra.mrb[0].mxu1 %vm1136_vm0, %v1044_v53  ;;  %v742_v55 = vadd.f32 %v5240_v20, %v741_v56  ;;  %v3517_v44 = vpop.f32.mrb[6].mxu0 }
 0x137   :  { %v986_v42 = vmax.f32 %v750_v51, 0.0  ;;  %v753_v26 = vadd.f32 %v3517_v44, %v5240_v20  ;;  %v744_v43 = vpop.f32.mrb[7].mxu0  ;;  %1275 = vmatprep.mubr.bf16.mxu1 %v5925_v30  ;;  %3590 = vmatpush1.bf16.msra.mxu1 %v3636_v45 }
 0x138   :  { %v984_v61 = vmax.f32 %v742_v55, 0.0  ;;  %v745_v11 = vadd.f32 %v5240_v20, %v744_v43  ;;  %3575 = vmatprep.subr.bf16.mxu1 %v5925_v30 }
 0x139   :  { %v987_v39 = vmax.f32 %v753_v26, 0.0 }
 0x13a   :  { %v985_v34 = vmax.f32 %v745_v11, 0.0 }
 0x13b   :  { %v1047_v14 = vpack.c.bf16 %v987_v39, %v986_v42 }
 0x13c   :  { %v1046_v27 = vpack.c.bf16 %v985_v34, %v984_v61  ;;  %v3520_v62 = vpop.f32.mrb[8].mxu0 }
 0x13d   :  { %v766_v16 = vadd.f32 %v3520_v62, %v5240_v20  ;;  %v757_v53 = vpop.f32.mrb[9].mxu0 }
 0x13e   :  { %3342 = vmatmul.mubr.msk.bf16.gmra.mrb[4].mxu1 %vm1136_vm0, %v1045_v12  ;;  %v758_v51 = vadd.f32 %v5240_v20, %v757_v53  ;;  %v3521_v56 = vpop.f32.mrb[10].mxu0 }
 0x13f   :  { %1285 = vmatprep.mubr.bf16.mxu1 %v5925_v30  ;;  %v990_v44 = vmax.f32 %v766_v16, 0.0  ;;  %v769_v55 = vadd.f32 %v3521_v56, %v5240_v20  ;;  %v760_v25 = vpop.f32.mrb[11].mxu0 }
 0x140   :  { %v988_v43 = vmax.f32 %v758_v51, 0.0  ;;  %v761_v26 = vadd.f32 %v5240_v20, %v760_v25 }
 0x141   :  { %v991_v42 = vmax.f32 %v769_v55, 0.0 }
 0x142   :  { %v989_v61 = vmax.f32 %v761_v26, 0.0 }
 0x143   :  { %v5258_v11 = vpack.c.bf16 %v991_v42, %v990_v44 }
 0x144   :  { %v1048_v39 = vpack.c.bf16 %v989_v61, %v988_v43  ;;  %v3524_v34 = vpop.f32.mrb[12].mxu0 }
 0x145   :  { %v782_v12 = vadd.f32 %v3524_v34, %v5240_v20  ;;  %v773_v62 = vpop.f32.mrb[13].mxu0 }
 0x146   :  { %3343 = vmatmul.mubr.msk.bf16.gmra.mrb[8].mxu1 %vm1136_vm0, %v1046_v27  ;;  %v774_v53 = vadd.f32 %v5240_v20, %v773_v62  ;;  %v3525_v16 = vpop.f32.mrb[14].mxu0 }
 0x147   :  { %1295 = vmatprep.mubr.bf16.mxu1 %v5925_v30  ;;  %v994_v51 = vmax.f32 %v782_v12, 0.0  ;;  %v785_v25 = vadd.f32 %v3525_v16, %v5240_v20  ;;  %v776_v56 = vpop.f32.mrb[15].mxu0 }
 0x148   :  { %v992_v55 = vmax.f32 %v774_v53, 0.0  ;;  %v777_v44 = vadd.f32 %v5240_v20, %v776_v56 }
 0x149   :  { %v995_v43 = vmax.f32 %v785_v25, 0.0 }
 0x14a   :  { %v993_v27 = vmax.f32 %v777_v44, 0.0 }
 0x14b   :  { %v5268_v26 = vpack.c.bf16 %v995_v43, %v994_v51 }
 0x14c   :  { %v5270_v42 = vpack.c.bf16 %v993_v27, %v992_v55  ;;  %v3528_v61 = vpop.f32.mrb[16].mxu0 }
 0x14d   :  { %v798_v34 = vadd.f32 %v3528_v61, %v5240_v20  ;;  %v789_v12 = vpop.f32.mrb[17].mxu0 }
 0x14e   :  { %3344 = vmatmul.mubr.msk.bf16.gmra.mrb[12].mxu1 %vm1136_vm0, %v1047_v14  ;;  %v790_v62 = vadd.f32 %v5240_v20, %v789_v12  ;;  %v3529_v53 = vpop.f32.mrb[18].mxu0 }
 0x14f   :  { %1305 = vmatprep.mubr.bf16.mxu1 %v5925_v30  ;;  %v998_v45 = vmax.f32 %v798_v34, 0.0  ;;  %v801_v16 = vadd.f32 %v3529_v53, %v5240_v20  ;;  %v792_v25 = vpop.f32.mrb[19].mxu0  ;;  %v3637_v53 = vld [vmem:[#allocation7 + $0x8] sm:$0xff]  }
 0x150   :  { %v996_v56 = vmax.f32 %v790_v62, 0.0  ;;  %v793_v51 = vadd.f32 %v5240_v20, %v792_v25  ;;  %1916 = vmatpush1.bf16.msra.mxu0 %v3637_v53  ;;  %3591 = vmatpush1.bf16.msra.mxu1 %v3637_v53 }
 0x151   :  { %v999_v55 = vmax.f32 %v801_v16, 0.0  ;;  %1917 = vmatprep.subr.bf16.mxu0 %v5925_v30  ;;  %3576 = vmatprep.subr.bf16.mxu1 %v5925_v30 }
 0x152   :  { %v997_v44 = vmax.f32 %v793_v51, 0.0  ;;  %v3638_v51 = vld [vmem:[#allocation7 + $0x10] sm:$0xff]  }
 0x153   :  { %v5278_v43 = vpack.c.bf16 %v999_v55, %v998_v45 }
 0x154   :  { %v5280_v27 = vpack.c.bf16 %v997_v44, %v996_v56  ;;  %v3532_v61 = vpop.f32.mrb[20].mxu0  ;;  %1918 = vmatpush1.bf16.msra.mxu0 %v3638_v51  ;;  %3592 = vmatpush1.bf16.msra.mxu1 %v3638_v51 }
 0x155   :  { %v814_v14 = vadd.f32 %v3532_v61, %v5240_v20  ;;  %v805_v12 = vpop.f32.mrb[21].mxu0  ;;  %1919 = vmatprep.subr.bf16.mxu0 %v5925_v30  ;;  %3577 = vmatprep.subr.bf16.mxu1 %v5925_v30 }
 0x156   :  { %3345 = vmatmul.mubr.msk.bf16.gmra.mrb[16].mxu1 %vm1136_vm0, %v1048_v39  ;;  %v806_v34 = vadd.f32 %v5240_v20, %v805_v12  ;;  %v3533_v63 = vpop.f32.mrb[22].mxu0 }
 0x157   :  { %1315 = vmatprep.mubr.bf16.mxu1 %v5925_v30  ;;  %v1002_v62 = vmax.f32 %v814_v14, 0.0  ;;  %v817_v16 = vadd.f32 %v3533_v63, %v5240_v20  ;;  %v808_v25 = vpop.f32.mrb[23].mxu0 }
 0x158   :  { %v1000_v45 = vmax.f32 %v806_v34, 0.0  ;;  %v809_v56 = vadd.f32 %v5240_v20, %v808_v25 }
 0x159   :  { %v1003_v55 = vmax.f32 %v817_v16, 0.0 }
 0x15a   :  { %v1001_v39 = vmax.f32 %v809_v56, 0.0 }
 0x15b   :  { %v5290_v44 = vpack.c.bf16 %v1003_v55, %v1002_v62  ;;  %v3639_v62 = vld [vmem:[#allocation7 + $0x18] sm:$0xff]   ;;  %v3640_v55 = vld [vmem:[#allocation7 + $0x20] sm:$0xff]  }
 0x15c   :  { %v5292_v61 = vpack.c.bf16 %v1001_v39, %v1000_v45  ;;  %v3536_v14 = vpop.f32.mrb[24].mxu0  ;;  %1920 = vmatpush1.bf16.msra.mxu0 %v3639_v62  ;;  %3593 = vmatpush1.bf16.msra.mxu1 %v3639_v62 }
 0x15d   :  { %v830_v63 = vadd.f32 %v3536_v14, %v5240_v20  ;;  %v821_v12 = vpop.f32.mrb[25].mxu0  ;;  %1921 = vmatprep.subr.bf16.mxu0 %v5925_v30  ;;  %3578 = vmatprep.subr.bf16.mxu1 %v5925_v30 }
 0x15e   :  { %3346 = vmatmul.mubr.msk.bf16.gmra.mrb[20].mxu1 %vm1136_vm0, %v5258_v11  ;;  %v822_v34 = vadd.f32 %v5240_v20, %v821_v12  ;;  %v3537_v53 = vpop.f32.mrb[26].mxu0 }
 0x15f   :  { %1325 = vmatprep.mubr.bf16.mxu1 %v5925_v30  ;;  %v1006_v16 = vmax.f32 %v830_v63, 0.0  ;;  %v833_v25 = vadd.f32 %v3537_v53, %v5240_v20  ;;  %v824_v45 = vpop.f32.mrb[27].mxu0 }
 0x160   :  { %v1004_v56 = vmax.f32 %v822_v34, 0.0  ;;  %v825_v51 = vadd.f32 %v5240_v20, %v824_v45  ;;  %1922 = vmatpush1.bf16.msra.mxu0 %v3640_v55  ;;  %3594 = vmatpush1.bf16.msra.mxu1 %v3640_v55 }
 0x161   :  { %v1007_v39 = vmax.f32 %v833_v25, 0.0  ;;  %1923 = vmatprep.subr.bf16.mxu0 %v5925_v30  ;;  %3579 = vmatprep.subr.bf16.mxu1 %v5925_v30 }
 0x162   :  { %v1005_v11 = vmax.f32 %v825_v51, 0.0 }
 0x163   :  { %v5305_v14 = vpack.c.bf16 %v1007_v39, %v1006_v16  ;;  %v3641_v16 = vld [vmem:[#allocation7 + $0x28] sm:$0xff]  }
 0x164   :  { %v5307_v12 = vpack.c.bf16 %v1005_v11, %v1004_v56  ;;  %v3540_v63 = vpop.f32.mrb[28].mxu0  ;;  %1924 = vmatpush1.bf16.msra.mxu0 %v3641_v16  ;;  %v3642_v11 = vld [vmem:[#allocation7 + $0x30] sm:$0xff]   ;;  %3595 = vmatpush1.bf16.msra.mxu1 %v3641_v16 }
 0x165   :  { %v846_v34 = vadd.f32 %v3540_v63, %v5240_v20  ;;  %v837_v53 = vpop.f32.mrb[29].mxu0  ;;  %1925 = vmatprep.subr.bf16.mxu0 %v5925_v30  ;;  %3580 = vmatprep.subr.bf16.mxu1 %v5925_v30 }
 0x166   :  { %3347 = vmatmul.mubr.msk.bf16.gmra.mrb[24].mxu1 %vm1136_vm0, %v5270_v42  ;;  %v838_v62 = vadd.f32 %v5240_v20, %v837_v53  ;;  %v3541_v25 = vpop.f32.mrb[30].mxu0 }
 0x167   :  { %1335 = vmatprep.mubr.bf16.mxu1 %v5925_v30  ;;  %v1010_v45 = vmax.f32 %v846_v34, 0.0  ;;  %v849_v56 = vadd.f32 %v3541_v25, %v5240_v20  ;;  %v840_v51 = vpop.f32.mrb[31].mxu0 }
 0x168   :  { %v1008_v55 = vmax.f32 %v838_v62, 0.0  ;;  %v841_v39 = vadd.f32 %v5240_v20, %v840_v51  ;;  %1926 = vmatpush1.bf16.msra.mxu0 %v3642_v11  ;;  %3596 = vmatpush1.bf16.msra.mxu1 %v3642_v11 }
 0x169   :  { %v1011_v63 = vmax.f32 %v849_v56, 0.0  ;;  %1927 = vmatprep.subr.bf16.mxu0 %v5925_v30  ;;  %3581 = vmatprep.subr.bf16.mxu1 %v5925_v30 }
 0x16a   :  { %v1009_v42 = vmax.f32 %v841_v39, 0.0 }
 0x16b   :  { %v5320_v53 = vpack.c.bf16 %v1011_v63, %v1010_v45  ;;  %v3643_v45 = vld [vmem:[#allocation7 + $0x38] sm:$0xff]  }
 0x16c   :  { %v5322_v50 = vpack.c.bf16 %v1009_v42, %v1008_v55  ;;  %v3544_v34 = vpop.f32.mrb[32].mxu0  ;;  %1928 = vmatpush1.bf16.msra.mxu0 %v3643_v45  ;;  %v3644_v42 = vld [vmem:[#allocation7 + $0x40] sm:$0xff]   ;;  %3597 = vmatpush1.bf16.msra.mxu1 %v3643_v45 }
 0x16d   :  { %v862_v62 = vadd.f32 %v3544_v34, %v5240_v20  ;;  %v853_v25 = vpop.f32.mrb[33].mxu0  ;;  %1929 = vmatprep.subr.bf16.mxu0 %v5925_v30  ;;  %3582 = vmatprep.subr.bf16.mxu1 %v5925_v30 }
 0x16e   :  { %3348 = vmatmul.mubr.msk.bf16.gmra.mrb[28].mxu1 %vm1136_vm0, %v5268_v26  ;;  %v854_v16 = vadd.f32 %v5240_v20, %v853_v25  ;;  %v3545_v56 = vpop.f32.mrb[34].mxu0 }
 0x16f   :  { %1345 = vmatprep.mubr.bf16.mxu1 %v5925_v30  ;;  %v1014_v51 = vmax.f32 %v862_v62, 0.0  ;;  %v865_v55 = vadd.f32 %v3545_v56, %v5240_v20  ;;  %v856_v39 = vpop.f32.mrb[35].mxu0 }
 0x170   :  { %v1012_v11 = vmax.f32 %v854_v16, 0.0  ;;  %v857_v63 = vadd.f32 %v5240_v20, %v856_v39  ;;  %1930 = vmatpush1.bf16.msra.mxu0 %v3644_v42  ;;  %3598 = vmatpush1.bf16.msra.mxu1 %v3644_v42 }
 0x171   :  { %v1015_v34 = vmax.f32 %v865_v55, 0.0  ;;  %1931 = vmatprep.subr.bf16.mxu0 %v5925_v30  ;;  %3583 = vmatprep.subr.bf16.mxu1 %v5925_v30 }
 0x172   :  { %v1013_v26 = vmax.f32 %v857_v63, 0.0 }
 0x173   :  { %v5335_v25 = vpack.c.bf16 %v1015_v34, %v1014_v51  ;;  %v3645_v51 = vld [vmem:[#allocation7 + $0x48] sm:$0xff]  }
 0x174   :  { %v5337_v37 = vpack.c.bf16 %v1013_v26, %v1012_v11  ;;  %v3548_v62 = vpop.f32.mrb[36].mxu0  ;;  %1932 = vmatpush1.bf16.msra.mxu0 %v3645_v51  ;;  %v3646_v26 = vld [vmem:[#allocation7 + $0x50] sm:$0xff]   ;;  %3599 = vmatpush1.bf16.msra.mxu1 %v3645_v51 }
 0x175   :  { %v878_v16 = vadd.f32 %v3548_v62, %v5240_v20  ;;  %v869_v56 = vpop.f32.mrb[37].mxu0  ;;  %1933 = vmatprep.subr.bf16.mxu0 %v5925_v30  ;;  %3584 = vmatprep.subr.bf16.mxu1 %v5925_v30 }
 0x176   :  { %3349 = vmatmul.mubr.msk.bf16.gmra.mrb[32].mxu1 %vm1136_vm0, %v5280_v27  ;;  %v870_v45 = vadd.f32 %v5240_v20, %v869_v56  ;;  %v3549_v55 = vpop.f32.mrb[38].mxu0 }
 0x177   :  { %1355 = vmatprep.mubr.bf16.mxu1 %v5925_v30  ;;  %v1018_v39 = vmax.f32 %v878_v16, 0.0  ;;  %v881_v11 = vadd.f32 %v3549_v55, %v5240_v20  ;;  %v872_v63 = vpop.f32.mrb[39].mxu0 }
 0x178   :  { %v1016_v42 = vmax.f32 %v870_v45, 0.0  ;;  %v873_v34 = vadd.f32 %v5240_v20, %v872_v63  ;;  %1934 = vmatpush1.bf16.msra.mxu0 %v3646_v26  ;;  %3600 = vmatpush1.bf16.msra.mxu1 %v3646_v26 }
 0x179   :  { %v1019_v62 = vmax.f32 %v881_v11, 0.0  ;;  %1935 = vmatprep.subr.bf16.mxu0 %v5925_v30  ;;  %3585 = vmatprep.subr.bf16.mxu1 %v5925_v30 }
 0x17a   :  { %v1017_v27 = vmax.f32 %v873_v34, 0.0 }
 0x17b   :  { %v5350_v56 = vpack.c.bf16 %v1019_v62, %v1018_v39  ;;  %v3647_v39 = vld [vmem:[#allocation7 + $0x58] sm:$0xff]  }
 0x17c   :  { %v5352_v41 = vpack.c.bf16 %v1017_v27, %v1016_v42  ;;  %v3552_v16 = vpop.f32.mrb[40].mxu0  ;;  %1936 = vmatpush1.bf16.msra.mxu0 %v3647_v39  ;;  %v3648_v27 = vld [vmem:[#allocation7 + $0x60] sm:$0xff]   ;;  %3601 = vmatpush1.bf16.msra.mxu1 %v3647_v39 }
 0x17d   :  { %v894_v45 = vadd.f32 %v3552_v16, %v5240_v20  ;;  %v885_v55 = vpop.f32.mrb[41].mxu0  ;;  %1937 = vmatprep.subr.bf16.mxu0 %v5925_v30  ;;  %3586 = vmatprep.subr.bf16.mxu1 %v5925_v30 }
 0x17e   :  { %3350 = vmatmul.mubr.msk.bf16.gmra.mrb[36].mxu1 %vm1136_vm0, %v5278_v43  ;;  %v886_v51 = vadd.f32 %v5240_v20, %v885_v55  ;;  %v3553_v11 = vpop.f32.mrb[42].mxu0 }
 0x17f   :  { %1365 = vmatprep.mubr.bf16.mxu1 %v5925_v30  ;;  %v1022_v63 = vmax.f32 %v894_v45, 0.0  ;;  %v897_v42 = vadd.f32 %v3553_v11, %v5240_v20  ;;  %v888_v34 = vpop.f32.mrb[43].mxu0 }
 0x180   :  { %v1020_v26 = vmax.f32 %v886_v51, 0.0  ;;  %v889_v62 = vadd.f32 %v5240_v20, %v888_v34  ;;  %1938 = vmatpush1.bf16.msra.mxu0 %v3648_v27  ;;  %3602 = vmatpush1.bf16.msra.mxu1 %v3648_v27 }
 0x181   :  { %v1023_v16 = vmax.f32 %v897_v42, 0.0  ;;  %1939 = vmatprep.subr.bf16.mxu0 %v5925_v30  ;;  %3587 = vmatprep.subr.bf16.mxu1 %v5925_v30 }
 0x182   :  { %v1021_v43 = vmax.f32 %v889_v62, 0.0  ;;  %v3649_v62 = vld [vmem:[#allocation7 + $0x68] sm:$0xff]  }
 0x183   :  { %v5365_v55 = vpack.c.bf16 %v1023_v16, %v1022_v63 }
 0x184   :  { %v5367_v22 = vpack.c.bf16 %v1021_v43, %v1020_v26  ;;  %v3556_v45 = vpop.f32.mrb[44].mxu0  ;;  %1940 = vmatpush1.bf16.msra.mxu0 %v3649_v62  ;;  %3603 = vmatpush1.bf16.msra.mxu1 %v3649_v62 }
 0x185   :  { %v910_v51 = vadd.f32 %v3556_v45, %v5240_v20  ;;  %v901_v11 = vpop.f32.mrb[45].mxu0  ;;  %1941 = vmatprep.subr.bf16.mxu0 %v5925_v30  ;;  %3588 = vmatprep.subr.bf16.mxu1 %v5925_v30 }
 0x186   :  { %3351 = vmatmul.mubr.msk.bf16.gmra.mrb[40].mxu1 %vm1136_vm0, %v5292_v61  ;;  %v902_v39 = vadd.f32 %v5240_v20, %v901_v11  ;;  %v3557_v42 = vpop.f32.mrb[46].mxu0  ;;  %v3650_v11 = vld [vmem:[#allocation7 + $0x70] sm:$0xff]  }
 0x187   :  { %1375 = vmatprep.mubr.bf16.mxu1 %v5925_v30  ;;  %v1026_v63 = vmax.f32 %v910_v51, 0.0  ;;  %v913_v34 = vadd.f32 %v3557_v42, %v5240_v20  ;;  %v904_v26 = vpop.f32.mrb[47].mxu0 }
 0x188   :  { %v1024_v27 = vmax.f32 %v902_v39, 0.0  ;;  %v905_v16 = vadd.f32 %v5240_v20, %v904_v26  ;;  %1942 = vmatpush1.bf16.msra.mxu0 %v3650_v11  ;;  %3604 = vmatpush1.bf16.msra.mxu1 %v3650_v11 }
 0x189   :  { %v1027_v43 = vmax.f32 %v913_v34, 0.0  ;;  %1943 = vmatprep.subr.bf16.mxu0 %v5925_v30  ;;  %3589 = vmatprep.subr.bf16.mxu1 %v5925_v30 }
 0x18a   :  { %v1025_v45 = vmax.f32 %v905_v16, 0.0 }
 0x18b   :  { %v5380_v61 = vpack.c.bf16 %v1027_v43, %v1026_v63 }
 0x18c   :  { %v5382_v8 = vpack.c.bf16 %v1025_v45, %v1024_v27  ;;  %v3560_v51 = vpop.f32.mrb[48].mxu0  ;;  %v3651_v27 = vld [vmem:[#allocation7 + $0x78] sm:$0xff]  }
 0x18d   :  { %v926_v42 = vadd.f32 %v3560_v51, %v5240_v20  ;;  %v917_v24 = vpop.f32.mrb[49].mxu0  ;;  %1944 = vmatpush1.bf16.msra.mxu0 %v3651_v27  ;;  %3605 = vmatpush1.bf16.msra.mxu1 %v3651_v27 }
 0x18e   :  { %3352 = vmatmul.mubr.msk.bf16.gmra.mrb[44].mxu1 %vm1136_vm0, %v5290_v44  ;;  %v918_v39 = vadd.f32 %v5240_v20, %v917_v24  ;;  %v3561_v34 = vpop.f32.mrb[50].mxu0 }
 0x18f   :  { %1385 = vmatprep.mubr.bf16.mxu1 %v5925_v30  ;;  %v1030_v63 = vmax.f32 %v926_v42, 0.0  ;;  %v929_v26 = vadd.f32 %v3561_v34, %v5240_v20  ;;  %v920_v62 = vpop.f32.mrb[51].mxu0 }
 0x190   :  { %v1028_v16 = vmax.f32 %v918_v39, 0.0  ;;  %v921_v43 = vadd.f32 %v5240_v20, %v920_v62 }
 0x191   :  { %v1031_v45 = vmax.f32 %v929_v26, 0.0 }
 0x192   :  { %v1029_v44 = vmax.f32 %v921_v43, 0.0 }
 0x193   :  { %v5393_v24 = vpack.c.bf16 %v1031_v45, %v1030_v63 }
 0x194   :  { %v5395_v11 = vpack.c.bf16 %v1029_v44, %v1028_v16  ;;  %v3564_v51 = vpop.f32.mrb[52].mxu0 }
 0x195   :  { %v942_v42 = vadd.f32 %v3564_v51, %v5240_v20  ;;  %v933_v36 = vpop.f32.mrb[53].mxu0 }
 0x196   :  { %3353 = vmatmul.mubr.msk.bf16.gmra.mrb[48].mxu1 %vm1136_vm0, %v5307_v12  ;;  %v934_v34 = vadd.f32 %v5240_v20, %v933_v36  ;;  %v3565_v39 = vpop.f32.mrb[54].mxu0 }
 0x197   :  { %1395 = vmatprep.mubr.bf16.mxu1 %v5925_v30  ;;  %v1034_v26 = vmax.f32 %v942_v42, 0.0  ;;  %v945_v62 = vadd.f32 %v3565_v39, %v5240_v20  ;;  %v936_v27 = vpop.f32.mrb[55].mxu0 }
 0x198   :  { %v1032_v63 = vmax.f32 %v934_v34, 0.0  ;;  %v937_v16 = vadd.f32 %v5240_v20, %v936_v27 }
 0x199   :  { %v1035_v43 = vmax.f32 %v945_v62, 0.0 }
 0x19a   :  { %v1033_v45 = vmax.f32 %v937_v16, 0.0 }
 0x19b   :  { %v5404_v44 = vpack.c.bf16 %v1035_v43, %v1034_v26 }
 0x19c   :  { %v1070_v51 = vpack.c.bf16 %v1033_v45, %v1032_v63  ;;  %v3568_v3 = vpop.f32.mrb[56].mxu0 }
 0x19d   :  { %v958_v12 = vadd.f32 %v3568_v3, %v5240_v20  ;;  %v949_v10 = vpop.f32.mrb[57].mxu0 }
 0x19e   :  { %3354 = vmatmul.mubr.msk.bf16.gmra.mrb[52].mxu1 %vm1136_vm0, %v5305_v14  ;;  %v950_v36 = vadd.f32 %v5240_v20, %v949_v10  ;;  %v3569_v42 = vpop.f32.mrb[58].mxu0 }
 0x19f   :  { %1405 = vmatprep.mubr.bf16.mxu1 %v5925_v30  ;;  %v1038_v34 = vmax.f32 %v958_v12, 0.0  ;;  %v961_v39 = vadd.f32 %v3569_v42, %v5240_v20  ;;  %v952_v62 = vpop.f32.mrb[59].mxu0 }
 0x1a0   :  { %v1036_v27 = vmax.f32 %v950_v36, 0.0  ;;  %v953_v26 = vadd.f32 %v5240_v20, %v952_v62 }
 0x1a1   :  { %v1039_v63 = vmax.f32 %v961_v39, 0.0 }
 0x1a2   :  { %v1037_v16 = vmax.f32 %v953_v26, 0.0 }
 0x1a3   :  { %v5413_v43 = vpack.c.bf16 %v1039_v63, %v1038_v34 }
 0x1a4   :  { %v5415_v3 = vpack.c.bf16 %v1037_v16, %v1036_v27  ;;  %v3572_v45 = vpop.f32.mrb[60].mxu0 }
 0x1a5   :  { %v974_v14 = vadd.f32 %v3572_v45, %v5240_v20  ;;  %v965_v10 = vpop.f32.mrb[61].mxu0 }
 0x1a6   :  { %3355 = vmatmul.mubr.msk.bf16.gmra.mrb[56].mxu1 %vm1136_vm0, %v5322_v50  ;;  %v966_v12 = vadd.f32 %v5240_v20, %v965_v10  ;;  %v3573_v42 = vpop.f32.mrb[62].mxu0 }
 0x1a7   :  { %1415 = vmatprep.mubr.bf16.mxu1 %v5925_v30  ;;  %v1042_v36 = vmax.f32 %v974_v14, 0.0  ;;  %v977_v39 = vadd.f32 %v3573_v42, %v5240_v20  ;;  %v968_v62 = vpop.f32.mrb[63].mxu0 }
 0x1a8   :  { %v1040_v34 = vmax.f32 %v966_v12, 0.0  ;;  %v969_v27 = vadd.f32 %v5240_v20, %v968_v62 }
 0x1a9   :  { %v1043_v26 = vmax.f32 %v977_v39, 0.0 }
 0x1aa   :  { %v1041_v63 = vmax.f32 %v969_v27, 0.0 }
 0x1ab   :  { %v5424_v16 = vpack.c.bf16 %v1043_v26, %v1042_v36 }
 0x1ac   :  { %v5426_v45 = vpack.c.bf16 %v1041_v63, %v1040_v34 }
 0x1ae   :  { %3356 = vmatmul.mubr.msk.bf16.gmra.mrb[60].mxu1 %vm1136_vm0, %v5320_v53 }
 0x1af   :  { %1425 = vmatprep.mubr.bf16.mxu1 %v5925_v30 }
 0x1b6   :  { %3357 = vmatmul.mubr.msk.bf16.gmra.mrb[64].mxu1 %vm1136_vm0, %v5337_v37  ;;  %v1086_v37 = vlaneseq }
 0x1b7   :  { %1435 = vmatprep.mubr.bf16.mxu1 %v5925_v30 }
 0x1b8   :  { %v1087_v50 = vshrl.u32 %v1086_v37, 7 }
 0x1be   :  { %3358 = vmatmul.mubr.msk.bf16.gmra.mrb[68].mxu1 %vm1136_vm0, %v5335_v25 }
 0x1bf   :  { %1445 = vmatprep.mubr.bf16.mxu1 %v5925_v30 }
 0x1c6   :  { %3359 = vmatmul.mubr.msk.bf16.gmra.mrb[72].mxu1 %vm1136_vm0, %v5352_v41  ;;  %v1084_v41 = vld [vmem:[%s5822_s5] sm:$0x3] }
 0x1c7   :  { %1455 = vmatprep.mubr.bf16.mxu1 %v5925_v30 }
 0x1ce   :  { %3360 = vmatmul.mubr.msk.bf16.gmra.mrb[76].mxu1 %vm1136_vm0, %v5350_v56 }
 0x1cf   :  { %1465 = vmatprep.mubr.bf16.mxu1 %v5925_v30 }
 0x1d6   :  { %3361 = vmatmul.mubr.msk.bf16.gmra.mrb[80].mxu1 %vm1136_vm0, %v5367_v22  ;;  %v1088_v22 = vsub.s32 0, %v1087_v50 }
 0x1d7   :  { %1475 = vmatprep.mubr.bf16.mxu1 %v5925_v30 }
 0x1d8   :  { %v5465_v20 = vrot.slane %v1084_v41, %v1088_v22 }
 0x1de   :  { %3362 = vmatmul.mubr.msk.bf16.gmra.mrb[84].mxu1 %vm1136_vm0, %v5365_v55 }
 0x1df   :  { %1485 = vmatprep.mubr.bf16.mxu1 %v5925_v30 }
 0x1e6   :  { %3363 = vmatmul.mubr.msk.bf16.gmra.mrb[88].mxu1 %vm1136_vm0, %v5382_v8  ;;  %v1092_v8 = vsub.s32 1, %v1087_v50 }
 0x1e7   :  { %1495 = vmatprep.mubr.bf16.mxu1 %v5925_v30 }
 0x1e8   :  { %v5467_v53 = vrot.slane %v1084_v41, %v1092_v8 }
 0x1ee   :  { %3364 = vmatmul.mubr.msk.bf16.gmra.mrb[92].mxu1 %vm1136_vm0, %v5380_v61 }
 0x1ef   :  { %1505 = vmatprep.mubr.bf16.mxu1 %v5925_v30 }
 0x1f6   :  { %3365 = vmatmul.mubr.msk.bf16.gmra.mrb[96].mxu1 %vm1136_vm0, %v5395_v11 }
 0x1f7   :  { %1515 = vmatprep.mubr.bf16.mxu1 %v5925_v30 }
 0x1fe   :  { %3366 = vmatmul.mubr.msk.bf16.gmra.mrb[100].mxu1 %vm1136_vm0, %v5393_v24 }
 0x1ff   :  { %1525 = vmatprep.mubr.bf16.mxu1 %v5925_v30 }
 0x206   :  { %3367 = vmatmul.mubr.msk.bf16.gmra.mrb[104].mxu1 %vm1136_vm0, %v1070_v51 }
 0x207   :  { %1535 = vmatprep.mubr.bf16.mxu1 %v5925_v30 }
 0x209   :  { %v1267_v25 = vpop.f32.mrb[0].mxu1 }
 0x20a   :  { %v1268_v56 = vadd.f32 %v1267_v25, %v5465_v20  ;;  %v1269_v55 = vpop.f32.mrb[1].mxu1 }
 0x20b   :  { %v1270_v61 = vadd.f32 %v1269_v55, %v5467_v53  ;;  %v1271_v24 = vpop.f32.mrb[2].mxu1 }
 0x20c   :  { %v1272_v11 = vadd.f32 %v1271_v24, %v5465_v20  ;;  %v1273_v14 = vpop.f32.mrb[3].mxu1  ;;  %v1586_v12 = vmax.f32 %v1268_v56, 0.0 }
 0x20d   :  { %v1274_v10 = vadd.f32 %v1273_v14, %v5467_v53  ;;  %v1587_v42 = vmax.f32 %v1270_v61, 0.0 }
 0x20e   :  { %v1588_v51 = vmax.f32 %v1272_v11, 0.0  ;;  %3368 = vmatmul.mubr.msk.bf16.gmra.mrb[108].mxu1 %vm1136_vm0, %v5404_v44 }
 0x20f   :  { %v1589_v36 = vmax.f32 %v1274_v10, 0.0  ;;  %1545 = vmatprep.mubr.bf16.mxu1 %v5925_v30 }
 0x210   :  { %v1714_v39 = vpack.c.bf16 %v1588_v51, %v1586_v12 }
 0x211   :  { %v1715_v62 = vpack.c.bf16 %v1589_v36, %v1587_v42  ;;  %v1277_v34 = vpop.f32.mrb[4].mxu1 }
 0x212   :  { %v1278_v27 = vadd.f32 %v1277_v34, %v5465_v20  ;;  %v1279_v26 = vpop.f32.mrb[5].mxu1 }
 0x213   :  { %v1280_v63 = vadd.f32 %v1279_v26, %v5467_v53  ;;  %v1281_v37 = vpop.f32.mrb[6].mxu1  ;;  %1945 = vmatprep.mubr.bf16.mxu0 %v1715_v62 }
 0x214   :  { %v1282_v50 = vadd.f32 %v1281_v37, %v5465_v20  ;;  %v1283_v22 = vpop.f32.mrb[7].mxu1  ;;  %1946 = vmatmul.mubr.bf16.vlgmr.msra.gmra.mrb[64].mxu0 %v1714_v39  ;;  %v1590_v41 = vmax.f32 %v1278_v27, 0.0 }
 0x215   :  { %v1284_v44 = vadd.f32 %v1283_v22, %v5467_v53  ;;  %v1591_v25 = vmax.f32 %v1280_v63, 0.0 }
 0x216   :  { %v1592_v8 = vmax.f32 %v1282_v50, 0.0  ;;  %3369 = vmatmul.mubr.msk.bf16.gmra.mrb[112].mxu1 %vm1136_vm0, %v5415_v3 }
 0x217   :  { %v1593_v56 = vmax.f32 %v1284_v44, 0.0  ;;  %1555 = vmatprep.mubr.bf16.mxu1 %v5925_v30 }
 0x218   :  { %v1716_v55 = vpack.c.bf16 %v1592_v8, %v1590_v41 }
 0x219   :  { %v1717_v61 = vpack.c.bf16 %v1593_v56, %v1591_v25  ;;  %v1287_v24 = vpop.f32.mrb[8].mxu1 }
 0x21a   :  { %v1288_v11 = vadd.f32 %v1287_v24, %v5465_v20  ;;  %v1289_v14 = vpop.f32.mrb[9].mxu1 }
 0x21b   :  { %v1290_v10 = vadd.f32 %v1289_v14, %v5467_v53  ;;  %v1291_v12 = vpop.f32.mrb[10].mxu1  ;;  %1953 = vmatprep.mubr.bf16.mxu0 %v1717_v61 }
 0x21c   :  { %v1292_v51 = vadd.f32 %v1291_v12, %v5465_v20  ;;  %v1293_v42 = vpop.f32.mrb[11].mxu1  ;;  %1954 = vmatmul.mubr.bf16.gmra.mrb[68].mxu0 %v1716_v55  ;;  %v1594_v36 = vmax.f32 %v1288_v11, 0.0 }
 0x21d   :  { %v1294_v3 = vadd.f32 %v1293_v42, %v5467_v53  ;;  %v1595_v62 = vmax.f32 %v1290_v10, 0.0 }
 0x21e   :  { %v1596_v39 = vmax.f32 %v1292_v51, 0.0  ;;  %3370 = vmatmul.mubr.msk.bf16.gmra.mrb[116].mxu1 %vm1136_vm0, %v5413_v43 }
 0x21f   :  { %v1597_v34 = vmax.f32 %v1294_v3, 0.0  ;;  %1565 = vmatprep.mubr.bf16.mxu1 %v5925_v30 }
 0x220   :  { %v1718_v27 = vpack.c.bf16 %v1596_v39, %v1594_v36 }
 0x221   :  { %v1719_v26 = vpack.c.bf16 %v1597_v34, %v1595_v62  ;;  %v1297_v63 = vpop.f32.mrb[12].mxu1 }
 0x222   :  { %v1298_v37 = vadd.f32 %v1297_v63, %v5465_v20  ;;  %v1299_v50 = vpop.f32.mrb[13].mxu1 }
 0x223   :  { %v1300_v22 = vadd.f32 %v1299_v50, %v5467_v53  ;;  %v1301_v44 = vpop.f32.mrb[14].mxu1  ;;  %1961 = vmatprep.mubr.bf16.mxu0 %v1719_v26 }
 0x224   :  { %v1302_v41 = vadd.f32 %v1301_v44, %v5465_v20  ;;  %v1303_v8 = vpop.f32.mrb[15].mxu1  ;;  %1962 = vmatmul.mubr.bf16.gmra.mrb[72].mxu0 %v1718_v27  ;;  %v1598_v25 = vmax.f32 %v1298_v37, 0.0 }
 0x225   :  { %v1304_v43 = vadd.f32 %v1303_v8, %v5467_v53  ;;  %v1599_v55 = vmax.f32 %v1300_v22, 0.0 }
 0x226   :  { %v1600_v56 = vmax.f32 %v1302_v41, 0.0  ;;  %3371 = vmatmul.mubr.msk.bf16.gmra.mrb[120].mxu1 %vm1136_vm0, %v5426_v45 }
 0x227   :  { %v1601_v61 = vmax.f32 %v1304_v43, 0.0  ;;  %1575 = vmatprep.mubr.bf16.mxu1 %v5925_v30 }
 0x228   :  { %v1720_v24 = vpack.c.bf16 %v1600_v56, %v1598_v25 }
 0x229   :  { %v1721_v11 = vpack.c.bf16 %v1601_v61, %v1599_v55  ;;  %v1307_v14 = vpop.f32.mrb[16].mxu1 }
 0x22a   :  { %v1308_v10 = vadd.f32 %v1307_v14, %v5465_v20  ;;  %v1309_v12 = vpop.f32.mrb[17].mxu1 }
 0x22b   :  { %v1310_v51 = vadd.f32 %v1309_v12, %v5467_v53  ;;  %v1311_v42 = vpop.f32.mrb[18].mxu1  ;;  %1969 = vmatprep.mubr.bf16.mxu0 %v1721_v11 }
 0x22c   :  { %v1312_v3 = vadd.f32 %v1311_v42, %v5465_v20  ;;  %v1313_v36 = vpop.f32.mrb[19].mxu1  ;;  %1970 = vmatmul.mubr.bf16.gmra.mrb[76].mxu0 %v1720_v24  ;;  %v1602_v39 = vmax.f32 %v1308_v10, 0.0 }
 0x22d   :  { %v1314_v45 = vadd.f32 %v1313_v36, %v5467_v53  ;;  %v1603_v30 = vmax.f32 %v1310_v51, 0.0 }
 0x22e   :  { %v1604_v62 = vmax.f32 %v1312_v3, 0.0  ;;  %3372 = vmatmul.mubr.msk.bf16.gmra.mrb[124].mxu1 %vm1136_vm0, %v5424_v16 }
 0x22f   :  { %v1605_v34 = vmax.f32 %v1314_v45, 0.0 }
 0x230   :  { %v1722_v27 = vpack.c.bf16 %v1604_v62, %v1602_v39 }
 0x231   :  { %v1723_v26 = vpack.c.bf16 %v1605_v34, %v1603_v30  ;;  %v1317_v63 = vpop.f32.mrb[20].mxu1 }
 0x232   :  { %v1318_v37 = vadd.f32 %v1317_v63, %v5465_v20  ;;  %v1319_v50 = vpop.f32.mrb[21].mxu1 }
 0x233   :  { %v1320_v22 = vadd.f32 %v1319_v50, %v5467_v53  ;;  %v1321_v44 = vpop.f32.mrb[22].mxu1  ;;  %1977 = vmatprep.mubr.bf16.mxu0 %v1723_v26 }
 0x234   :  { %v1322_v41 = vadd.f32 %v1321_v44, %v5465_v20  ;;  %v1323_v8 = vpop.f32.mrb[23].mxu1  ;;  %1978 = vmatmul.mubr.bf16.gmra.mrb[80].mxu0 %v1722_v27  ;;  %v1606_v25 = vmax.f32 %v1318_v37, 0.0 }
 0x235   :  { %v1324_v43 = vadd.f32 %v1323_v8, %v5467_v53  ;;  %v1607_v56 = vmax.f32 %v1320_v22, 0.0 }
 0x236   :  { %v1608_v16 = vmax.f32 %v1322_v41, 0.0 }
 0x237   :  { %v1609_v55 = vmax.f32 %v1324_v43, 0.0 }
 0x238   :  { %v1724_v61 = vpack.c.bf16 %v1608_v16, %v1606_v25 }
 0x239   :  { %v1725_v24 = vpack.c.bf16 %v1609_v55, %v1607_v56  ;;  %v1327_v11 = vpop.f32.mrb[24].mxu1 }
 0x23a   :  { %v1328_v14 = vadd.f32 %v1327_v11, %v5465_v20  ;;  %v1329_v10 = vpop.f32.mrb[25].mxu1 }
 0x23b   :  { %v1330_v12 = vadd.f32 %v1329_v10, %v5467_v53  ;;  %v1331_v51 = vpop.f32.mrb[26].mxu1  ;;  %1985 = vmatprep.mubr.bf16.mxu0 %v1725_v24 }
 0x23c   :  { %v1332_v42 = vadd.f32 %v1331_v51, %v5465_v20  ;;  %v1333_v3 = vpop.f32.mrb[27].mxu1  ;;  %1986 = vmatmul.mubr.bf16.gmra.mrb[84].mxu0 %v1724_v61  ;;  %v1610_v45 = vmax.f32 %v1328_v14, 0.0 }
 0x23d   :  { %v1334_v36 = vadd.f32 %v1333_v3, %v5467_v53  ;;  %v1611_v62 = vmax.f32 %v1330_v12, 0.0 }
 0x23e   :  { %v1612_v39 = vmax.f32 %v1332_v42, 0.0 }
 0x23f   :  { %v1613_v30 = vmax.f32 %v1334_v36, 0.0 }
 0x240   :  { %v1726_v34 = vpack.c.bf16 %v1612_v39, %v1610_v45 }
 0x241   :  { %v1727_v27 = vpack.c.bf16 %v1613_v30, %v1611_v62  ;;  %v1337_v26 = vpop.f32.mrb[28].mxu1 }
 0x242   :  { %v1338_v63 = vadd.f32 %v1337_v26, %v5465_v20  ;;  %v1339_v37 = vpop.f32.mrb[29].mxu1 }
 0x243   :  { %v1340_v50 = vadd.f32 %v1339_v37, %v5467_v53  ;;  %v1341_v22 = vpop.f32.mrb[30].mxu1  ;;  %1993 = vmatprep.mubr.bf16.mxu0 %v1727_v27 }
 0x244   :  { %v1342_v44 = vadd.f32 %v1341_v22, %v5465_v20  ;;  %v1343_v41 = vpop.f32.mrb[31].mxu1  ;;  %1994 = vmatmul.mubr.bf16.gmra.mrb[88].mxu0 %v1726_v34  ;;  %v1614_v43 = vmax.f32 %v1338_v63, 0.0 }
 0x245   :  { %v1344_v8 = vadd.f32 %v1343_v41, %v5467_v53  ;;  %v1615_v16 = vmax.f32 %v1340_v50, 0.0 }
 0x246   :  { %v1616_v25 = vmax.f32 %v1342_v44, 0.0 }
 0x247   :  { %v1617_v56 = vmax.f32 %v1344_v8, 0.0 }
 0x248   :  { %v1728_v55 = vpack.c.bf16 %v1616_v25, %v1614_v43 }
 0x249   :  { %v1729_v61 = vpack.c.bf16 %v1617_v56, %v1615_v16  ;;  %v1347_v24 = vpop.f32.mrb[32].mxu1 }
 0x24a   :  { %v1348_v11 = vadd.f32 %v1347_v24, %v5465_v20  ;;  %v1349_v14 = vpop.f32.mrb[33].mxu1 }
 0x24b   :  { %v1350_v10 = vadd.f32 %v1349_v14, %v5467_v53  ;;  %v1351_v12 = vpop.f32.mrb[34].mxu1  ;;  %2001 = vmatprep.mubr.bf16.mxu0 %v1729_v61 }
 0x24c   :  { %v1352_v51 = vadd.f32 %v1351_v12, %v5465_v20  ;;  %v1353_v42 = vpop.f32.mrb[35].mxu1  ;;  %2002 = vmatmul.mubr.bf16.gmra.mrb[92].mxu0 %v1728_v55  ;;  %v1618_v36 = vmax.f32 %v1348_v11, 0.0 }
 0x24d   :  { %v1354_v3 = vadd.f32 %v1353_v42, %v5467_v53  ;;  %v1619_v39 = vmax.f32 %v1350_v10, 0.0 }
 0x24e   :  { %v1620_v45 = vmax.f32 %v1352_v51, 0.0 }
 0x24f   :  { %v1621_v62 = vmax.f32 %v1354_v3, 0.0 }
 0x250   :  { %v1730_v30 = vpack.c.bf16 %v1620_v45, %v1618_v36 }
 0x251   :  { %v1731_v34 = vpack.c.bf16 %v1621_v62, %v1619_v39  ;;  %v1357_v27 = vpop.f32.mrb[36].mxu1 }
 0x252   :  { %v1358_v26 = vadd.f32 %v1357_v27, %v5465_v20  ;;  %v1359_v63 = vpop.f32.mrb[37].mxu1 }
 0x253   :  { %v1360_v37 = vadd.f32 %v1359_v63, %v5467_v53  ;;  %v1361_v50 = vpop.f32.mrb[38].mxu1  ;;  %2009 = vmatprep.mubr.bf16.mxu0 %v1731_v34 }
 0x254   :  { %v1362_v22 = vadd.f32 %v1361_v50, %v5465_v20  ;;  %v1363_v44 = vpop.f32.mrb[39].mxu1  ;;  %2010 = vmatmul.mubr.bf16.gmra.mrb[96].mxu0 %v1730_v30  ;;  %v1622_v8 = vmax.f32 %v1358_v26, 0.0 }
 0x255   :  { %v1364_v41 = vadd.f32 %v1363_v44, %v5467_v53  ;;  %v1623_v25 = vmax.f32 %v1360_v37, 0.0 }
 0x256   :  { %v1624_v43 = vmax.f32 %v1362_v22, 0.0 }
 0x257   :  { %v1625_v16 = vmax.f32 %v1364_v41, 0.0 }
 0x258   :  { %v1732_v56 = vpack.c.bf16 %v1624_v43, %v1622_v8 }
 0x259   :  { %v1733_v55 = vpack.c.bf16 %v1625_v16, %v1623_v25  ;;  %v1367_v61 = vpop.f32.mrb[40].mxu1 }
 0x25a   :  { %v1368_v24 = vadd.f32 %v1367_v61, %v5465_v20  ;;  %v1369_v11 = vpop.f32.mrb[41].mxu1 }
 0x25b   :  { %v1370_v14 = vadd.f32 %v1369_v11, %v5467_v53  ;;  %v1371_v10 = vpop.f32.mrb[42].mxu1  ;;  %2017 = vmatprep.mubr.bf16.mxu0 %v1733_v55 }
 0x25c   :  { %v1372_v12 = vadd.f32 %v1371_v10, %v5465_v20  ;;  %v1373_v51 = vpop.f32.mrb[43].mxu1  ;;  %2018 = vmatmul.mubr.bf16.gmra.mrb[100].mxu0 %v1732_v56  ;;  %v1626_v3 = vmax.f32 %v1368_v24, 0.0 }
 0x25d   :  { %v1374_v42 = vadd.f32 %v1373_v51, %v5467_v53  ;;  %v1627_v45 = vmax.f32 %v1370_v14, 0.0 }
 0x25e   :  { %v1628_v36 = vmax.f32 %v1372_v12, 0.0 }
 0x25f   :  { %v1629_v39 = vmax.f32 %v1374_v42, 0.0 }
 0x260   :  { %v1734_v62 = vpack.c.bf16 %v1628_v36, %v1626_v3 }
 0x261   :  { %v1735_v30 = vpack.c.bf16 %v1629_v39, %v1627_v45  ;;  %v1377_v34 = vpop.f32.mrb[44].mxu1 }
 0x262   :  { %v1378_v27 = vadd.f32 %v1377_v34, %v5465_v20  ;;  %v1379_v26 = vpop.f32.mrb[45].mxu1 }
 0x263   :  { %v1380_v63 = vadd.f32 %v1379_v26, %v5467_v53  ;;  %v1381_v37 = vpop.f32.mrb[46].mxu1  ;;  %2025 = vmatprep.mubr.bf16.mxu0 %v1735_v30 }
 0x264   :  { %v1382_v50 = vadd.f32 %v1381_v37, %v5465_v20  ;;  %v1383_v22 = vpop.f32.mrb[47].mxu1  ;;  %2026 = vmatmul.mubr.bf16.gmra.mrb[104].mxu0 %v1734_v62  ;;  %v1630_v41 = vmax.f32 %v1378_v27, 0.0 }
 0x265   :  { %v1384_v44 = vadd.f32 %v1383_v22, %v5467_v53  ;;  %v1631_v43 = vmax.f32 %v1380_v63, 0.0 }
 0x266   :  { %v1632_v8 = vmax.f32 %v1382_v50, 0.0 }
 0x267   :  { %v1633_v25 = vmax.f32 %v1384_v44, 0.0 }
 0x268   :  { %v1736_v16 = vpack.c.bf16 %v1632_v8, %v1630_v41 }
 0x269   :  { %v1737_v56 = vpack.c.bf16 %v1633_v25, %v1631_v43  ;;  %v1387_v55 = vpop.f32.mrb[48].mxu1 }
 0x26a   :  { %v1388_v61 = vadd.f32 %v1387_v55, %v5465_v20  ;;  %v1389_v24 = vpop.f32.mrb[49].mxu1 }
 0x26b   :  { %v1390_v11 = vadd.f32 %v1389_v24, %v5467_v53  ;;  %v1391_v14 = vpop.f32.mrb[50].mxu1  ;;  %2033 = vmatprep.mubr.bf16.mxu0 %v1737_v56 }
 0x26c   :  { %v1392_v10 = vadd.f32 %v1391_v14, %v5465_v20  ;;  %v1393_v12 = vpop.f32.mrb[51].mxu1  ;;  %2034 = vmatmul.mubr.bf16.gmra.mrb[108].mxu0 %v1736_v16  ;;  %v1634_v42 = vmax.f32 %v1388_v61, 0.0 }
 0x26d   :  { %v1394_v51 = vadd.f32 %v1393_v12, %v5467_v53  ;;  %v1635_v36 = vmax.f32 %v1390_v11, 0.0 }
 0x26e   :  { %v1636_v3 = vmax.f32 %v1392_v10, 0.0 }
 0x26f   :  { %v1637_v45 = vmax.f32 %v1394_v51, 0.0 }
 0x270   :  { %v1738_v39 = vpack.c.bf16 %v1636_v3, %v1634_v42 }
 0x271   :  { %v1739_v62 = vpack.c.bf16 %v1637_v45, %v1635_v36  ;;  %v1397_v30 = vpop.f32.mrb[52].mxu1 }
 0x272   :  { %v1398_v34 = vadd.f32 %v1397_v30, %v5465_v20  ;;  %v1399_v27 = vpop.f32.mrb[53].mxu1 }
 0x273   :  { %v1400_v26 = vadd.f32 %v1399_v27, %v5467_v53  ;;  %v1401_v63 = vpop.f32.mrb[54].mxu1  ;;  %2041 = vmatprep.mubr.bf16.mxu0 %v1739_v62 }
 0x274   :  { %v1402_v37 = vadd.f32 %v1401_v63, %v5465_v20  ;;  %v1403_v50 = vpop.f32.mrb[55].mxu1  ;;  %2042 = vmatmul.mubr.bf16.gmra.mrb[112].mxu0 %v1738_v39  ;;  %v1638_v44 = vmax.f32 %v1398_v34, 0.0 }
 0x275   :  { %v1404_v22 = vadd.f32 %v1403_v50, %v5467_v53  ;;  %v1639_v8 = vmax.f32 %v1400_v26, 0.0 }
 0x276   :  { %v1640_v41 = vmax.f32 %v1402_v37, 0.0 }
 0x277   :  { %v1641_v43 = vmax.f32 %v1404_v22, 0.0 }
 0x278   :  { %v1740_v25 = vpack.c.bf16 %v1640_v41, %v1638_v44 }
 0x279   :  { %v1741_v16 = vpack.c.bf16 %v1641_v43, %v1639_v8  ;;  %v1407_v56 = vpop.f32.mrb[56].mxu1 }
 0x27a   :  { %v1408_v55 = vadd.f32 %v1407_v56, %v5465_v20  ;;  %v1409_v61 = vpop.f32.mrb[57].mxu1 }
 0x27b   :  { %v1410_v24 = vadd.f32 %v1409_v61, %v5467_v53  ;;  %v1411_v11 = vpop.f32.mrb[58].mxu1  ;;  %2049 = vmatprep.mubr.bf16.mxu0 %v1741_v16 }
 0x27c   :  { %v1412_v14 = vadd.f32 %v1411_v11, %v5465_v20  ;;  %v1413_v10 = vpop.f32.mrb[59].mxu1  ;;  %2050 = vmatmul.mubr.bf16.gmra.mrb[116].mxu0 %v1740_v25  ;;  %v1642_v51 = vmax.f32 %v1408_v55, 0.0 }
 0x27d   :  { %v1414_v12 = vadd.f32 %v1413_v10, %v5467_v53  ;;  %v1643_v3 = vmax.f32 %v1410_v24, 0.0 }
 0x27e   :  { %v1644_v42 = vmax.f32 %v1412_v14, 0.0 }
 0x27f   :  { %v1645_v36 = vmax.f32 %v1414_v12, 0.0 }
 0x280   :  { %v1742_v45 = vpack.c.bf16 %v1644_v42, %v1642_v51 }
 0x281   :  { %v1743_v39 = vpack.c.bf16 %v1645_v36, %v1643_v3  ;;  %v1417_v62 = vpop.f32.mrb[60].mxu1 }
 0x282   :  { %v1418_v30 = vadd.f32 %v1417_v62, %v5465_v20  ;;  %v1419_v34 = vpop.f32.mrb[61].mxu1 }
 0x283   :  { %v1420_v27 = vadd.f32 %v1419_v34, %v5467_v53  ;;  %v1421_v26 = vpop.f32.mrb[62].mxu1  ;;  %2057 = vmatprep.mubr.bf16.mxu0 %v1743_v39 }
 0x284   :  { %v1422_v63 = vadd.f32 %v1421_v26, %v5465_v20  ;;  %v1423_v37 = vpop.f32.mrb[63].mxu1  ;;  %2058 = vmatmul.mubr.bf16.gmra.mrb[120].mxu0 %v1742_v45  ;;  %v1646_v22 = vmax.f32 %v1418_v30, 0.0 }
 0x285   :  { %v1424_v50 = vadd.f32 %v1423_v37, %v5467_v53  ;;  %v1647_v41 = vmax.f32 %v1420_v27, 0.0 }
 0x286   :  { %v1648_v44 = vmax.f32 %v1422_v63, 0.0 }
 0x287   :  { %v1649_v8 = vmax.f32 %v1424_v50, 0.0 }
 0x288   :  { %v1744_v43 = vpack.c.bf16 %v1648_v44, %v1646_v22 }
 0x289   :  { %v1745_v25 = vpack.c.bf16 %v1649_v8, %v1647_v41  ;;  %v1427_v16 = vpop.f32.mrb[64].mxu1 }
 0x28a   :  { %v1428_v56 = vadd.f32 %v1427_v16, %v5465_v20  ;;  %v1429_v55 = vpop.f32.mrb[65].mxu1 }
 0x28b   :  { %v1430_v61 = vadd.f32 %v1429_v55, %v5467_v53  ;;  %v1431_v24 = vpop.f32.mrb[66].mxu1  ;;  %2065 = vmatprep.mubr.bf16.mxu0 %v1745_v25 }
 0x28c   :  { %v1432_v11 = vadd.f32 %v1431_v24, %v5465_v20  ;;  %v1433_v14 = vpop.f32.mrb[67].mxu1  ;;  %2066 = vmatmul.mubr.bf16.gmra.mrb[124].mxu0 %v1744_v43  ;;  %v1650_v12 = vmax.f32 %v1428_v56, 0.0 }
 0x28d   :  { %v1434_v10 = vadd.f32 %v1433_v14, %v5467_v53  ;;  %v1651_v42 = vmax.f32 %v1430_v61, 0.0 }
 0x28e   :  { %v1652_v51 = vmax.f32 %v1432_v11, 0.0 }
 0x28f   :  { %v1653_v3 = vmax.f32 %v1434_v10, 0.0 }
 0x290   :  { %v1746_v36 = vpack.c.bf16 %v1652_v51, %v1650_v12 }
 0x291   :  { %v1747_v45 = vpack.c.bf16 %v1653_v3, %v1651_v42  ;;  %v1437_v39 = vpop.f32.mrb[68].mxu1 }
 0x292   :  { %v1438_v62 = vadd.f32 %v1437_v39, %v5465_v20  ;;  %v1439_v30 = vpop.f32.mrb[69].mxu1 }
 0x293   :  { %v1440_v34 = vadd.f32 %v1439_v30, %v5467_v53  ;;  %v1441_v27 = vpop.f32.mrb[70].mxu1  ;;  %2073 = vmatprep.mubr.bf16.mxu0 %v1747_v45 }
 0x294   :  { %v1442_v26 = vadd.f32 %v1441_v27, %v5465_v20  ;;  %v1443_v63 = vpop.f32.mrb[71].mxu1  ;;  %2074 = vmatmul.mubr.bf16.gmra.mrb[128].mxu0 %v1746_v36  ;;  %v1654_v50 = vmax.f32 %v1438_v62, 0.0 }
 0x295   :  { %v1444_v37 = vadd.f32 %v1443_v63, %v5467_v53  ;;  %v1655_v44 = vmax.f32 %v1440_v34, 0.0 }
 0x296   :  { %v1656_v22 = vmax.f32 %v1442_v26, 0.0 }
 0x297   :  { %v1657_v41 = vmax.f32 %v1444_v37, 0.0 }
 0x298   :  { %v1748_v8 = vpack.c.bf16 %v1656_v22, %v1654_v50 }
 0x299   :  { %v1749_v43 = vpack.c.bf16 %v1657_v41, %v1655_v44  ;;  %v1447_v25 = vpop.f32.mrb[72].mxu1 }
 0x29a   :  { %v1448_v16 = vadd.f32 %v1447_v25, %v5465_v20  ;;  %v1449_v56 = vpop.f32.mrb[73].mxu1 }
 0x29b   :  { %v1450_v55 = vadd.f32 %v1449_v56, %v5467_v53  ;;  %v1451_v61 = vpop.f32.mrb[74].mxu1  ;;  %2081 = vmatprep.mubr.bf16.mxu0 %v1749_v43 }
 0x29c   :  { %v1452_v24 = vadd.f32 %v1451_v61, %v5465_v20  ;;  %v1453_v11 = vpop.f32.mrb[75].mxu1  ;;  %2082 = vmatmul.mubr.bf16.gmra.mrb[132].mxu0 %v1748_v8  ;;  %v1658_v10 = vmax.f32 %v1448_v16, 0.0 }
 0x29d   :  { %v1454_v14 = vadd.f32 %v1453_v11, %v5467_v53  ;;  %v1659_v51 = vmax.f32 %v1450_v55, 0.0 }
 0x29e   :  { %v1660_v12 = vmax.f32 %v1452_v24, 0.0 }
 0x29f   :  { %v1661_v42 = vmax.f32 %v1454_v14, 0.0 }
 0x2a0   :  { %v1750_v3 = vpack.c.bf16 %v1660_v12, %v1658_v10 }
 0x2a1   :  { %v1751_v36 = vpack.c.bf16 %v1661_v42, %v1659_v51  ;;  %v1457_v45 = vpop.f32.mrb[76].mxu1 }
 0x2a2   :  { %v1458_v39 = vadd.f32 %v1457_v45, %v5465_v20  ;;  %v1459_v62 = vpop.f32.mrb[77].mxu1 }
 0x2a3   :  { %v1460_v30 = vadd.f32 %v1459_v62, %v5467_v53  ;;  %v1461_v34 = vpop.f32.mrb[78].mxu1  ;;  %2089 = vmatprep.mubr.bf16.mxu0 %v1751_v36 }
 0x2a4   :  { %v1462_v27 = vadd.f32 %v1461_v34, %v5465_v20  ;;  %v1463_v26 = vpop.f32.mrb[79].mxu1  ;;  %2090 = vmatmul.mubr.bf16.gmra.mrb[136].mxu0 %v1750_v3  ;;  %v1662_v37 = vmax.f32 %v1458_v39, 0.0 }
 0x2a5   :  { %v1464_v63 = vadd.f32 %v1463_v26, %v5467_v53  ;;  %v1663_v22 = vmax.f32 %v1460_v30, 0.0 }
 0x2a6   :  { %v1664_v50 = vmax.f32 %v1462_v27, 0.0 }
 0x2a7   :  { %v1665_v44 = vmax.f32 %v1464_v63, 0.0 }
 0x2a8   :  { %v1752_v41 = vpack.c.bf16 %v1664_v50, %v1662_v37 }
 0x2a9   :  { %v1753_v8 = vpack.c.bf16 %v1665_v44, %v1663_v22  ;;  %v1467_v43 = vpop.f32.mrb[80].mxu1 }
 0x2aa   :  { %v1468_v25 = vadd.f32 %v1467_v43, %v5465_v20  ;;  %v1469_v16 = vpop.f32.mrb[81].mxu1 }
 0x2ab   :  { %v1470_v56 = vadd.f32 %v1469_v16, %v5467_v53  ;;  %v1471_v55 = vpop.f32.mrb[82].mxu1  ;;  %2097 = vmatprep.mubr.bf16.mxu0 %v1753_v8 }
 0x2ac   :  { %v1472_v61 = vadd.f32 %v1471_v55, %v5465_v20  ;;  %v1473_v24 = vpop.f32.mrb[83].mxu1  ;;  %2098 = vmatmul.mubr.bf16.gmra.mrb[140].mxu0 %v1752_v41  ;;  %v1666_v14 = vmax.f32 %v1468_v25, 0.0 }
 0x2ad   :  { %v1474_v11 = vadd.f32 %v1473_v24, %v5467_v53  ;;  %v1667_v12 = vmax.f32 %v1470_v56, 0.0 }
 0x2ae   :  { %v1668_v10 = vmax.f32 %v1472_v61, 0.0 }
 0x2af   :  { %v1669_v51 = vmax.f32 %v1474_v11, 0.0 }
 0x2b0   :  { %v1754_v42 = vpack.c.bf16 %v1668_v10, %v1666_v14 }
 0x2b1   :  { %v1755_v3 = vpack.c.bf16 %v1669_v51, %v1667_v12  ;;  %v1477_v36 = vpop.f32.mrb[84].mxu1 }
 0x2b2   :  { %v1478_v45 = vadd.f32 %v1477_v36, %v5465_v20  ;;  %v1479_v39 = vpop.f32.mrb[85].mxu1 }
 0x2b3   :  { %v1480_v62 = vadd.f32 %v1479_v39, %v5467_v53  ;;  %v1481_v30 = vpop.f32.mrb[86].mxu1  ;;  %2105 = vmatprep.mubr.bf16.mxu0 %v1755_v3 }
 0x2b4   :  { %v1482_v34 = vadd.f32 %v1481_v30, %v5465_v20  ;;  %v1483_v27 = vpop.f32.mrb[87].mxu1  ;;  %2106 = vmatmul.mubr.bf16.gmra.mrb[144].mxu0 %v1754_v42  ;;  %v1670_v63 = vmax.f32 %v1478_v45, 0.0 }
 0x2b5   :  { %v1484_v26 = vadd.f32 %v1483_v27, %v5467_v53  ;;  %v1671_v50 = vmax.f32 %v1480_v62, 0.0 }
 0x2b6   :  { %v1672_v37 = vmax.f32 %v1482_v34, 0.0 }
 0x2b7   :  { %v1673_v22 = vmax.f32 %v1484_v26, 0.0 }
 0x2b8   :  { %v1756_v44 = vpack.c.bf16 %v1672_v37, %v1670_v63 }
 0x2b9   :  { %v1757_v41 = vpack.c.bf16 %v1673_v22, %v1671_v50  ;;  %v1487_v8 = vpop.f32.mrb[88].mxu1 }
 0x2ba   :  { %v1488_v43 = vadd.f32 %v1487_v8, %v5465_v20  ;;  %v1489_v25 = vpop.f32.mrb[89].mxu1 }
 0x2bb   :  { %v1490_v16 = vadd.f32 %v1489_v25, %v5467_v53  ;;  %v1491_v56 = vpop.f32.mrb[90].mxu1  ;;  %2113 = vmatprep.mubr.bf16.mxu0 %v1757_v41 }
 0x2bc   :  { %v1492_v55 = vadd.f32 %v1491_v56, %v5465_v20  ;;  %v1493_v61 = vpop.f32.mrb[91].mxu1  ;;  %2114 = vmatmul.mubr.bf16.gmra.mrb[148].mxu0 %v1756_v44  ;;  %v1674_v11 = vmax.f32 %v1488_v43, 0.0 }
 0x2bd   :  { %v1494_v24 = vadd.f32 %v1493_v61, %v5467_v53  ;;  %v1675_v10 = vmax.f32 %v1490_v16, 0.0 }
 0x2be   :  { %v1676_v14 = vmax.f32 %v1492_v55, 0.0 }
 0x2bf   :  { %v1677_v12 = vmax.f32 %v1494_v24, 0.0 }
 0x2c0   :  { %v1758_v51 = vpack.c.bf16 %v1676_v14, %v1674_v11 }
 0x2c1   :  { %v1759_v42 = vpack.c.bf16 %v1677_v12, %v1675_v10  ;;  %v1497_v3 = vpop.f32.mrb[92].mxu1 }
 0x2c2   :  { %v1498_v36 = vadd.f32 %v1497_v3, %v5465_v20  ;;  %v1499_v45 = vpop.f32.mrb[93].mxu1 }
 0x2c3   :  { %v1500_v39 = vadd.f32 %v1499_v45, %v5467_v53  ;;  %v1501_v62 = vpop.f32.mrb[94].mxu1  ;;  %2121 = vmatprep.mubr.bf16.mxu0 %v1759_v42 }
 0x2c4   :  { %v1502_v30 = vadd.f32 %v1501_v62, %v5465_v20  ;;  %v1503_v34 = vpop.f32.mrb[95].mxu1  ;;  %2122 = vmatmul.mubr.bf16.gmra.mrb[152].mxu0 %v1758_v51  ;;  %v1678_v26 = vmax.f32 %v1498_v36, 0.0 }
 0x2c5   :  { %v1504_v27 = vadd.f32 %v1503_v34, %v5467_v53  ;;  %v1679_v37 = vmax.f32 %v1500_v39, 0.0 }
 0x2c6   :  { %v1680_v63 = vmax.f32 %v1502_v30, 0.0 }
 0x2c7   :  { %v1681_v50 = vmax.f32 %v1504_v27, 0.0 }
 0x2c8   :  { %v1760_v22 = vpack.c.bf16 %v1680_v63, %v1678_v26 }
 0x2c9   :  { %v1761_v44 = vpack.c.bf16 %v1681_v50, %v1679_v37  ;;  %v1507_v41 = vpop.f32.mrb[96].mxu1 }
 0x2ca   :  { %v1508_v8 = vadd.f32 %v1507_v41, %v5465_v20  ;;  %v1509_v43 = vpop.f32.mrb[97].mxu1 }
 0x2cb   :  { %v1510_v25 = vadd.f32 %v1509_v43, %v5467_v53  ;;  %v1511_v16 = vpop.f32.mrb[98].mxu1  ;;  %2129 = vmatprep.mubr.bf16.mxu1 %v1761_v44 }
 0x2cc   :  { %v1512_v56 = vadd.f32 %v1511_v16, %v5465_v20  ;;  %v1513_v55 = vpop.f32.mrb[99].mxu1  ;;  %2130 = vmatmul.mubr.bf16.vlgmr.msra.gmra.mrb[128].mxu1 %v1760_v22  ;;  %v1682_v24 = vmax.f32 %v1508_v8, 0.0 }
 0x2cd   :  { %v1514_v61 = vadd.f32 %v1513_v55, %v5467_v53  ;;  %v1683_v14 = vmax.f32 %v1510_v25, 0.0 }
 0x2ce   :  { %v1684_v11 = vmax.f32 %v1512_v56, 0.0 }
 0x2cf   :  { %v1685_v10 = vmax.f32 %v1514_v61, 0.0 }
 0x2d0   :  { %v1762_v12 = vpack.c.bf16 %v1684_v11, %v1682_v24 }
 0x2d1   :  { %v1763_v51 = vpack.c.bf16 %v1685_v10, %v1683_v14  ;;  %v1517_v42 = vpop.f32.mrb[100].mxu1 }
 0x2d2   :  { %v1518_v3 = vadd.f32 %v1517_v42, %v5465_v20  ;;  %v1519_v36 = vpop.f32.mrb[101].mxu1 }
 0x2d3   :  { %v1520_v45 = vadd.f32 %v1519_v36, %v5467_v53  ;;  %v1521_v39 = vpop.f32.mrb[102].mxu1  ;;  %2137 = vmatprep.mubr.bf16.mxu1 %v1763_v51 }
 0x2d4   :  { %v1522_v62 = vadd.f32 %v1521_v39, %v5465_v20  ;;  %v1523_v30 = vpop.f32.mrb[103].mxu1  ;;  %2138 = vmatmul.mubr.bf16.gmra.mrb[132].mxu1 %v1762_v12  ;;  %v1686_v27 = vmax.f32 %v1518_v3, 0.0 }
 0x2d5   :  { %v1524_v34 = vadd.f32 %v1523_v30, %v5467_v53  ;;  %v1687_v63 = vmax.f32 %v1520_v45, 0.0 }
 0x2d6   :  { %v1688_v26 = vmax.f32 %v1522_v62, 0.0 }
 0x2d7   :  { %v1689_v37 = vmax.f32 %v1524_v34, 0.0  ;;  %v5599_v34 = vld [vmem:[%s5824_s7] ss:$0 sm:$0xff] }
 0x2d8   :  { %v1764_v50 = vpack.c.bf16 %v1688_v26, %v1686_v27 }
 0x2d9   :  { %v1765_v22 = vpack.c.bf16 %v1689_v37, %v1687_v63  ;;  %v1527_v44 = vpop.f32.mrb[104].mxu1 }
 0x2da   :  { %v1528_v41 = vadd.f32 %v1527_v44, %v5465_v20  ;;  %v1529_v8 = vpop.f32.mrb[105].mxu1 }
 0x2db   :  { %v1530_v43 = vadd.f32 %v1529_v8, %v5467_v53  ;;  %v1531_v25 = vpop.f32.mrb[106].mxu1  ;;  %2145 = vmatprep.mubr.bf16.mxu1 %v1765_v22 }
 0x2dc   :  { %v1532_v16 = vadd.f32 %v1531_v25, %v5465_v20  ;;  %v1533_v56 = vpop.f32.mrb[107].mxu1  ;;  %2146 = vmatmul.mubr.bf16.gmra.mrb[136].mxu1 %v1764_v50  ;;  %v1690_v61 = vmax.f32 %v1528_v41, 0.0 }
 0x2dd   :  { %v1534_v55 = vadd.f32 %v1533_v56, %v5467_v53  ;;  %v1691_v11 = vmax.f32 %v1530_v43, 0.0 }
 0x2de   :  { %v1692_v24 = vmax.f32 %v1532_v16, 0.0 }
 0x2df   :  { %v1693_v14 = vmax.f32 %v1534_v55, 0.0 }
 0x2e0   :  { %v1766_v10 = vpack.c.bf16 %v1692_v24, %v1690_v61 }
 0x2e1   :  { %v1767_v12 = vpack.c.bf16 %v1693_v14, %v1691_v11  ;;  %v1537_v51 = vpop.f32.mrb[108].mxu1 }
 0x2e2   :  { %v1538_v42 = vadd.f32 %v1537_v51, %v5465_v20  ;;  %v1539_v3 = vpop.f32.mrb[109].mxu1 }
 0x2e3   :  { %v1540_v36 = vadd.f32 %v1539_v3, %v5467_v53  ;;  %v1541_v45 = vpop.f32.mrb[110].mxu1  ;;  %2153 = vmatprep.mubr.bf16.mxu1 %v1767_v12 }
 0x2e4   :  { %v1542_v39 = vadd.f32 %v1541_v45, %v5465_v20  ;;  %v1543_v62 = vpop.f32.mrb[111].mxu1  ;;  %2154 = vmatmul.mubr.bf16.gmra.mrb[140].mxu1 %v1766_v10  ;;  %v1694_v27 = vmax.f32 %v1538_v42, 0.0 }
 0x2e5   :  { %v1544_v30 = vadd.f32 %v1543_v62, %v5467_v53  ;;  %v1695_v63 = vmax.f32 %v1540_v36, 0.0 }
 0x2e6   :  { %v1696_v26 = vmax.f32 %v1542_v39, 0.0 }
 0x2e7   :  { %v1697_v37 = vmax.f32 %v1544_v30, 0.0  ;;  %v1947_v50 = vpop.f32.mrb[64].mxu0 }
 0x2e8   :  { %v1768_v22 = vpack.c.bf16 %v1696_v26, %v1694_v27  ;;  %v1948_v44 = vadd.f32 %v5599_v34, %v1947_v50  ;;  %v1949_v41 = vpop.f32.mrb[65].mxu0 }
 0x2e9   :  { %v1769_v8 = vpack.c.bf16 %v1697_v37, %v1695_v63  ;;  %v1547_v43 = vpop.f32.mrb[112].mxu1  ;;  %v1950_v25 = vpop.f32.mrb[66].mxu0 }
 0x2ea   :  { %v3390_v16 = vclamps-f32 %v1948_v44, 5.0  ;;  %v1548_v56 = vadd.f32 %v1547_v43, %v5465_v20  ;;  %v1951_v55 = vadd.f32 %v5599_v34, %v1950_v25  ;;  %v1549_v61 = vpop.f32.mrb[113].mxu1  ;;  %v1952_v24 = vpop.f32.mrb[67].mxu0 }
 0x2eb   :  { %v1550_v11 = vadd.f32 %v1549_v61, %v5467_v53  ;;  %v1551_v14 = vpop.f32.mrb[114].mxu1  ;;  %2161 = vmatprep.mubr.bf16.mxu1 %v1769_v8 }
 0x2ec   :  { %v2330_v10 = vsub.f32 0.0, %v3390_v16  ;;  %v3391_v12 = vclamps-f32 %v1951_v55, 5.0  ;;  %v1552_v51 = vadd.f32 %v1551_v14, %v5465_v20  ;;  %v1553_v42 = vpop.f32.mrb[115].mxu1  ;;  %2162 = vmatmul.mubr.bf16.gmra.mrb[144].mxu1 %v1768_v22  ;;  %v1698_v45 = vmax.f32 %v1548_v56, 0.0 }
 0x2ed   :  { %v1554_v3 = vadd.f32 %v1553_v42, %v5467_v53  ;;  %v1699_v30 = vmax.f32 %v1550_v11, 0.0 }
 0x2ee   :  { %v2394_v36 = vmul.f32 1.442695, %v2330_v10  ;;  %v2331_v39 = vsub.f32 0.0, %v3391_v12  ;;  %v1700_v62 = vmax.f32 %v1552_v51, 0.0 }
 0x2ef   :  { %v1701_v27 = vmax.f32 %v1554_v3, 0.0  ;;  %v1955_v26 = vpop.f32.mrb[68].mxu0 }
 0x2f0   :  { %3716 = vpow2.f32 %v2394_v36  ;;  %v2396_v63 = vmul.f32 1.442695, %v2331_v39  ;;  %v1770_v37 = vpack.c.bf16 %v1700_v62, %v1698_v45  ;;  %v1956_v50 = vadd.f32 %v5599_v34, %v1955_v26  ;;  %v1957_v44 = vpop.f32.mrb[69].mxu0 }
 0x2f1   :  { %v1771_v41 = vpack.c.bf16 %v1701_v27, %v1699_v30  ;;  %v1557_v8 = vpop.f32.mrb[116].mxu1  ;;  %v1958_v43 = vpop.f32.mrb[70].mxu0 }
 0x2f2   :  { %3718 = vpow2.f32 %v2396_v63  ;;  %v3392_v22 = vclamps-f32 %v1956_v50, 5.0  ;;  %v1558_v25 = vadd.f32 %v1557_v8, %v5465_v20  ;;  %v1959_v16 = vadd.f32 %v5599_v34, %v1958_v43  ;;  %v1559_v56 = vpop.f32.mrb[117].mxu1  ;;  %v1960_v55 = vpop.f32.mrb[71].mxu0 }
 0x2f3   :  { %v1560_v61 = vadd.f32 %v1559_v56, %v5467_v53  ;;  %v1561_v24 = vpop.f32.mrb[118].mxu1  ;;  %2169 = vmatprep.mubr.bf16.mxu1 %v1771_v41 }
 0x2f4   :  { %v2332_v11 = vsub.f32 0.0, %v3392_v22  ;;  %v3393_v14 = vclamps-f32 %v1959_v16, 5.0  ;;  %v1562_v10 = vadd.f32 %v1561_v24, %v5465_v20  ;;  %v1563_v12 = vpop.f32.mrb[119].mxu1  ;;  %2170 = vmatmul.mubr.bf16.gmra.mrb[148].mxu1 %v1770_v37  ;;  %v1702_v3 = vmax.f32 %v1558_v25, 0.0 }
 0x2f5   :  { %v1564_v51 = vadd.f32 %v1563_v12, %v5467_v53  ;;  %v1703_v39 = vmax.f32 %v1560_v61, 0.0 }
 0x2f6   :  { %v2398_v42 = vmul.f32 1.442695, %v2332_v11  ;;  %v2333_v36 = vsub.f32 0.0, %v3393_v14  ;;  %v1704_v45 = vmax.f32 %v1562_v10, 0.0 }
 0x2f7   :  { %v1705_v62 = vmax.f32 %v1564_v51, 0.0  ;;  %v1963_v30 = vpop.f32.mrb[72].mxu0 }
 0x2f8   :  { %3720 = vpow2.f32 %v2398_v42  ;;  %v2400_v27 = vmul.f32 1.442695, %v2333_v36  ;;  %v1772_v26 = vpack.c.bf16 %v1704_v45, %v1702_v3  ;;  %v1964_v63 = vadd.f32 %v5599_v34, %v1963_v30  ;;  %v1965_v50 = vpop.f32.mrb[73].mxu0  ;;  %v2714_v30 = vld [vmem:[#allocation5] sm:$0xff] }
 0x2f9   :  { %v1773_v44 = vpack.c.bf16 %v1705_v62, %v1703_v39  ;;  %v1567_v41 = vpop.f32.mrb[120].mxu1  ;;  %v1966_v8 = vpop.f32.mrb[74].mxu0 }
 0x2fa   :  { %v3717_v43 = vpop.eup %3716  ;;  %3722 = vpow2.f32 %v2400_v27  ;;  %v3394_v37 = vclamps-f32 %v1964_v63, 5.0  ;;  %v1568_v22 = vadd.f32 %v1567_v41, %v5465_v20  ;;  %v1967_v25 = vadd.f32 %v5599_v34, %v1966_v8  ;;  %v1569_v16 = vpop.f32.mrb[121].mxu1 }
 0x2fb   :  { %v1968_v56 = vpop.f32.mrb[75].mxu0  ;;  %v2522_v55 = vadd.f32 1.0, %v3717_v43  ;;  %v1570_v61 = vadd.f32 %v1569_v16, %v5467_v53  ;;  %v1571_v24 = vpop.f32.mrb[122].mxu1  ;;  %2177 = vmatprep.mubr.bf16.mxu1 %v1773_v44 }
 0x2fc   :  { %v3719_v11 = vpop.eup %3718  ;;  %v2334_v14 = vsub.f32 0.0, %v3394_v37  ;;  %v3395_v10 = vclamps-f32 %v1967_v25, 5.0  ;;  %v1572_v12 = vadd.f32 %v1571_v24, %v5465_v20  ;;  %v1573_v51 = vpop.f32.mrb[123].mxu1  ;;  %2178 = vmatmul.mubr.bf16.gmra.mrb[152].mxu1 %v1772_v26  ;;  %v1706_v45 = vmax.f32 %v1568_v22, 0.0  ;;  %v2715_v26 = vld [vmem:[#allocation5 + $0x8] sm:$0xff] }
 0x2fd   :  { %3724 = vrcp.f32 %v2522_v55  ;;  %v2523_v42 = vadd.f32 1.0, %v3719_v11  ;;  %v1574_v3 = vadd.f32 %v1573_v51, %v5467_v53  ;;  %v1707_v27 = vmax.f32 %v1570_v61, 0.0  ;;  %v5926_v55 = vld [vmem:[#allocation21_spill] sm:$0xff] }
 0x2fe   :  { %v2402_v36 = vmul.f32 1.442695, %v2334_v14  ;;  %v2335_v39 = vsub.f32 0.0, %v3395_v10  ;;  %v1708_v62 = vmax.f32 %v1572_v12, 0.0  ;;  %v2778_v22 = vmul.f32 %v2714_v30, %v5926_v55 }
 0x2ff   :  { %3726 = vrcp.f32 %v2523_v42  ;;  %v1709_v63 = vmax.f32 %v1574_v3, 0.0  ;;  %v1971_v50 = vpop.f32.mrb[76].mxu0 }
 0x300   :  { %3728 = vpow2.f32 %v2402_v36  ;;  %v2404_v44 = vmul.f32 1.442695, %v2335_v39  ;;  %v1774_v41 = vpack.c.bf16 %v1708_v62, %v1706_v45  ;;  %v1972_v8 = vadd.f32 %v5599_v34, %v1971_v50  ;;  %v1973_v43 = vpop.f32.mrb[77].mxu0  ;;  %v5927_v36 = vld [vmem:[#allocation22_spill] sm:$0xff] }
 0x301   :  { %v1775_v37 = vpack.c.bf16 %v1709_v63, %v1707_v27  ;;  %v1577_v25 = vpop.f32.mrb[124].mxu1  ;;  %v1974_v16 = vpop.f32.mrb[78].mxu0  ;;  %v2779_v45 = vmul.f32 %v2715_v26, %v5927_v36  ;;  %v2716_v43 = vld [vmem:[#allocation5 + $0x10] sm:$0xff] }
 0x302   :  { %v3721_v56 = vpop.eup %3720  ;;  %3730 = vpow2.f32 %v2404_v44  ;;  %v3396_v24 = vclamps-f32 %v1972_v8, 5.0  ;;  %v1975_v11 = vadd.f32 %v5599_v34, %v1974_v16  ;;  %v1579_v61 = vpop.f32.mrb[125].mxu1  ;;  %v1578_v12 = vadd.f32 %v1577_v25, %v5465_v20  ;;  %v5928_v44 = vld [vmem:[#allocation15_spill] sm:$0xff] }
 0x303   :  { %v1976_v14 = vpop.f32.mrb[79].mxu0  ;;  %v2524_v10 = vadd.f32 1.0, %v3721_v56  ;;  %v1580_v51 = vadd.f32 %v1579_v61, %v5467_v53  ;;  %v1581_v42 = vpop.f32.mrb[126].mxu1  ;;  %2185 = vmatprep.mubr.bf16.mxu1 %v1775_v37  ;;  %v2842_v8 = vadd.f32 %v2778_v22, %v5928_v44  ;;  %v5929_v61 = vld [vmem:[#allocation16_spill] sm:$0xff]  ;;  %v5930_v22 = vld [vmem:[#allocation29_spill] sm:$0xff] }
 0x304   :  { %v3723_v3 = vpop.eup %3722  ;;  %v2336_v39 = vsub.f32 0.0, %v3396_v24  ;;  %v3397_v62 = vclamps-f32 %v1975_v11, 5.0  ;;  %v1582_v30 = vadd.f32 %v1581_v42, %v5465_v20  ;;  %v1583_v27 = vpop.f32.mrb[127].mxu1  ;;  %2186 = vmatmul.mubr.bf16.gmra.mrb[156].mxu1 %v1774_v41  ;;  %v1710_v55 = vmax.f32 %v1578_v12, 0.0  ;;  %v2717_v42 = vld [vmem:[#allocation5 + $0x18] sm:$0xff] }
 0x305   :  { %3732 = vrcp.f32 %v2524_v10  ;;  %v2525_v63 = vadd.f32 1.0, %v3723_v3  ;;  %v1584_v50 = vadd.f32 %v1583_v27, %v5467_v53  ;;  %v1711_v26 = vmax.f32 %v1580_v51, 0.0  ;;  %v3972_v51 = vld [vmem:[#allocation2] sm:$0xff] }
 0x306   :  { %v2406_v25 = vmul.f32 1.442695, %v2336_v39  ;;  %v2337_v16 = vsub.f32 0.0, %v3397_v62  ;;  %v1712_v56 = vmax.f32 %v1582_v30, 0.0  ;;  %v2843_v20 = vadd.f32 %v2779_v45, %v5929_v61 }
 0x307   :  { %v3725_v37 = vpop.eup %3724  ;;  %3734 = vrcp.f32 %v2525_v63  ;;  %v1713_v24 = vmax.f32 %v1584_v50, 0.0  ;;  %v1979_v11 = vpop.f32.mrb[80].mxu0  ;;  %v2780_v3 = vmul.f32 %v2716_v43, %v5930_v22  ;;  %v5931_v43 = vld [vmem:[#allocation30_spill] sm:$0xff]  ;;  %v2718_v22 = vld [vmem:[#allocation5 + $0x20] sm:$0xff] }
 0x308   :  { %v2970_v14 = vsub.f32 1.0, %v3725_v37  ;;  %3226 = vst [vmem:[#allocation9] sm:$0xff] %v3725_v37  ;;  %3736 = vpow2.f32 %v2406_v25  ;;  %v2408_v41 = vmul.f32 1.442695, %v2337_v16  ;;  %v1981_v10 = vpop.f32.mrb[81].mxu0  ;;  %v1776_v36 = vpack.c.bf16 %v1712_v56, %v1710_v55 }
 0x309   :  { %v3727_v53 = vpop.eup %3726  ;;  %v1777_v39 = vpack.c.bf16 %v1713_v24, %v1711_v26  ;;  %v1980_v62 = vadd.f32 %v5599_v34, %v1979_v11  ;;  %v1982_v30 = vpop.f32.mrb[82].mxu0  ;;  %v2906_v27 = vmul.f32 %v3972_v51, %v3725_v37  ;;  %v2781_v56 = vmul.f32 %v2717_v42, %v5931_v43  ;;  %v3973_v26 = vld [vmem:[#allocation2 + $0x8] sm:$0xff]  ;;  %v5932_v10 = vld [vmem:[#allocation17_spill] sm:$0xff]  ;;  %v5933_v42 = vld [vmem:[#allocation18_spill] sm:$0xff] }
 0x30a   :  { %v3729_v12 = vpop.eup %3728  ;;  %v3034_v63 = vmul.f32 %v2970_v14, %v2842_v8  ;;  %v2971_v50 = vsub.f32 1.0, %v3727_v53  ;;  %3227 = vst [vmem:[#allocation9 + $0x8] sm:$0xff] %v3727_v53  ;;  %3738 = vpow2.f32 %v2408_v41  ;;  %v1984_v45 = vpop.f32.mrb[83].mxu0  ;;  %v1983_v16 = vadd.f32 %v5599_v34, %v1982_v30 }
 0x30b   :  { %v2526_v44 = vadd.f32 1.0, %v3729_v12  ;;  %v3398_v25 = vclamps-f32 %v1980_v62, 5.0  ;;  %2193 = vmatprep.mubr.bf16.mxu1 %v1777_v39  ;;  %v2907_v24 = vmul.f32 %v3973_v26, %v3727_v53  ;;  %v2844_v41 = vadd.f32 %v2780_v3, %v5932_v10  ;;  %v5934_v45 = vld [vmem:[#allocation33_spill] sm:$0xff] }
 0x30c   :  { %v3731_v61 = vpop.eup %3730  ;;  %v3098_v55 = vadd.f32 %v3034_v63, %v2906_v27  ;;  %v3035_v11 = vmul.f32 %v2971_v50, %v2843_v20  ;;  %2194 = vmatmul.mubr.bf16.gmra.mrb[160].mxu1 %v1776_v36  ;;  %v3399_v14 = vclamps-f32 %v1983_v16, 5.0  ;;  %v2845_v27 = vadd.f32 %v2781_v56, %v5933_v42  ;;  %v2719_v63 = vld [vmem:[#allocation5 + $0x28] sm:$0xff] }
 0x30d   :  { %3740 = vrcp.f32 %v2526_v44  ;;  %v2527_v37 = vadd.f32 1.0, %v3731_v61  ;;  %v2338_v8 = vsub.f32 0.0, %v3398_v25  ;;  %v2782_v3 = vmul.f32 %v2718_v22, %v5934_v45  ;;  %v3974_v61 = vld [vmem:[#allocation2 + $0x10] sm:$0xff]  ;;  %v3975_v22 = vld [vmem:[#allocation2 + $0x18] sm:$0xff] }
 0x30e   :  { %3162 = vst [vmem:[#allocation8] sm:$0xff] %v3098_v55  ;;  %v3099_v62 = vadd.f32 %v3035_v11, %v2907_v24  ;;  %v2339_v30 = vsub.f32 0.0, %v3399_v14  ;;  %v5935_v11 = vld [vmem:[#allocation34_spill] sm:$0xff] }
 0x30f   :  { %v3733_v12 = vpop.eup %3732  ;;  %3742 = vrcp.f32 %v2527_v37  ;;  %v2410_v39 = vmul.f32 1.442695, %v2338_v8  ;;  %v1987_v51 = vpop.f32.mrb[84].mxu0  ;;  %v2783_v37 = vmul.f32 %v2719_v63, %v5935_v11 }
 0x310   :  { %3163 = vst [vmem:[#allocation8 + $0x8] sm:$0xff] %v3099_v62  ;;  %v2972_v20 = vsub.f32 1.0, %v3733_v12  ;;  %3228 = vst [vmem:[#allocation9 + $0x10] sm:$0xff] %v3733_v12  ;;  %v1988_v53 = vadd.f32 %v5599_v34, %v1987_v51  ;;  %v1989_v36 = vpop.f32.mrb[85].mxu0  ;;  %v2412_v44 = vmul.f32 1.442695, %v2339_v30  ;;  %v2908_v43 = vmul.f32 %v3974_v61, %v3733_v12 }
 0x311   :  { %v3735_v50 = vpop.eup %3734  ;;  %3744 = vpow2.f32 %v2410_v39  ;;  %v1990_v25 = vpop.f32.mrb[86].mxu0  ;;  %v2720_v36 = vld [vmem:[#allocation5 + $0x30] sm:$0xff] }
 0x312   :  { %v3737_v16 = vpop.eup %3736  ;;  %v3036_v55 = vmul.f32 %v2972_v20, %v2844_v41  ;;  %v2973_v26 = vsub.f32 1.0, %v3735_v50  ;;  %3229 = vst [vmem:[#allocation9 + $0x18] sm:$0xff] %v3735_v50  ;;  %v3400_v56 = vclamps-f32 %v1988_v53, 5.0  ;;  %v1992_v24 = vpop.f32.mrb[87].mxu0  ;;  %3746 = vpow2.f32 %v2412_v44  ;;  %v5936_v41 = vld [vmem:[#allocation19_spill] sm:$0xff] }
 0x313   :  { %v2528_v8 = vadd.f32 1.0, %v3737_v16  ;;  %v1991_v14 = vadd.f32 %v5599_v34, %v1990_v25  ;;  %v2909_v39 = vmul.f32 %v3975_v22, %v3735_v50  ;;  %v2846_v20 = vadd.f32 %v2782_v3, %v5936_v41  ;;  %v5937_v25 = vld [vmem:[#allocation20_spill] sm:$0xff]  ;;  %v5938_v3 = vld [vmem:[#allocation39_spill] sm:$0xff] }
 0x314   :  { %v3739_v10 = vpop.eup %3738  ;;  %v3100_v62 = vadd.f32 %v3036_v55, %v2908_v43  ;;  %v3037_v30 = vmul.f32 %v2973_v26, %v2845_v27  ;;  %v2340_v51 = vsub.f32 0.0, %v3400_v56  ;;  %v2847_v61 = vadd.f32 %v2783_v37, %v5937_v25  ;;  %v2721_v43 = vld [vmem:[#allocation5 + $0x38] sm:$0xff]  ;;  %v5940_v25 = vld [vmem:[#allocation23_spill] sm:$0xff] }
 0x315   :  { %3748 = vrcp.f32 %v2528_v8  ;;  %v2529_v42 = vadd.f32 1.0, %v3739_v10  ;;  %v3401_v12 = vclamps-f32 %v1991_v14, 5.0  ;;  %v2784_v56 = vmul.f32 %v2720_v36, %v5938_v3  ;;  %v3976_v8 = vld [vmem:[#allocation2 + $0x20] sm:$0xff] }
 0x316   :  { %3164 = vst [vmem:[#allocation8 + $0x10] sm:$0xff] %v3100_v62  ;;  %v3101_v53 = vadd.f32 %v3037_v30, %v2909_v39  ;;  %v2414_v45 = vmul.f32 1.442695, %v2340_v51  ;;  %v5939_v30 = vld [vmem:[#allocation40_spill] sm:$0xff] }
 0x317   :  { %v3741_v63 = vpop.eup %3740  ;;  %3750 = vrcp.f32 %v2529_v42  ;;  %v2341_v44 = vsub.f32 0.0, %v3401_v12  ;;  %v1995_v16 = vpop.f32.mrb[88].mxu0  ;;  %v2785_v51 = vmul.f32 %v2721_v43, %v5939_v30  ;;  %v3977_v42 = vld [vmem:[#allocation2 + $0x28] sm:$0xff] }
 0x318   :  { %3165 = vst [vmem:[#allocation8 + $0x18] sm:$0xff] %v3101_v53  ;;  %v2974_v50 = vsub.f32 1.0, %v3741_v63  ;;  %3230 = vst [vmem:[#allocation9 + $0x20] sm:$0xff] %v3741_v63  ;;  %3752 = vpow2.f32 %v2414_v45  ;;  %v1996_v27 = vadd.f32 %v5599_v34, %v1995_v16  ;;  %v1997_v55 = vpop.f32.mrb[89].mxu0  ;;  %v2910_v14 = vmul.f32 %v3976_v8, %v3741_v63 }
 0x319   :  { %v3743_v26 = vpop.eup %3742  ;;  %v2416_v24 = vmul.f32 1.442695, %v2341_v44  ;;  %v1998_v11 = vpop.f32.mrb[90].mxu0  ;;  %v2848_v63 = vadd.f32 %v2784_v56, %v5940_v25 }
 0x31a   :  { %v3038_v10 = vmul.f32 %v2974_v50, %v2846_v20  ;;  %v2975_v62 = vsub.f32 1.0, %v3743_v26  ;;  %3231 = vst [vmem:[#allocation9 + $0x28] sm:$0xff] %v3743_v26  ;;  %v3402_v22 = vclamps-f32 %v1996_v27, 5.0  ;;  %v2000_v37 = vpop.f32.mrb[91].mxu0  ;;  %v2911_v12 = vmul.f32 %v3977_v42, %v3743_v26  ;;  %v2722_v50 = vld [vmem:[#allocation5 + $0x40] sm:$0xff] }
 0x31b   :  { %v3745_v39 = vpop.eup %3744  ;;  %3754 = vpow2.f32 %v2416_v24  ;;  %v1999_v41 = vadd.f32 %v5599_v34, %v1998_v11  ;;  %v5941_v24 = vld [vmem:[#allocation26_spill] sm:$0xff]  ;;  %v2723_v11 = vld [vmem:[#allocation5 + $0x48] sm:$0xff] }
 0x31c   :  { %v3102_v53 = vadd.f32 %v3038_v10, %v2910_v14  ;;  %v3039_v45 = vmul.f32 %v2975_v62, %v2847_v61  ;;  %v2530_v36 = vadd.f32 1.0, %v3745_v39  ;;  %v2342_v44 = vsub.f32 0.0, %v3402_v22  ;;  %v3747_v16 = vpop.eup %3746  ;;  %v5942_v62 = vld [vmem:[#allocation43_spill] sm:$0xff] }
 0x31d   :  { %v3403_v20 = vclamps-f32 %v1999_v41, 5.0  ;;  %v2531_v55 = vadd.f32 1.0, %v3747_v16  ;;  %v2849_v37 = vadd.f32 %v2785_v51, %v5941_v24  ;;  %v2786_v22 = vmul.f32 %v2722_v50, %v5942_v62 }
 0x31e   :  { %3166 = vst [vmem:[#allocation8 + $0x20] sm:$0xff] %v3102_v53  ;;  %v3103_v27 = vadd.f32 %v3039_v45, %v2911_v12  ;;  %3756 = vrcp.f32 %v2530_v36  ;;  %v2418_v3 = vmul.f32 1.442695, %v2342_v44  ;;  %v3978_v12 = vld [vmem:[#allocation2 + $0x30] sm:$0xff]  ;;  %v5943_v44 = vld [vmem:[#allocation44_spill] sm:$0xff] }
 0x31f   :  { %v3749_v43 = vpop.eup %3748  ;;  %v2343_v8 = vsub.f32 0.0, %v3403_v20  ;;  %v2003_v26 = vpop.f32.mrb[92].mxu0  ;;  %3758 = vrcp.f32 %v2531_v55  ;;  %v2787_v16 = vmul.f32 %v2723_v11, %v5943_v44  ;;  %v3979_v55 = vld [vmem:[#allocation2 + $0x38] sm:$0xff] }
 0x320   :  { %3167 = vst [vmem:[#allocation8 + $0x28] sm:$0xff] %v3103_v27  ;;  %v2976_v61 = vsub.f32 1.0, %v3749_v43  ;;  %3232 = vst [vmem:[#allocation9 + $0x30] sm:$0xff] %v3749_v43  ;;  %v2004_v14 = vadd.f32 %v5599_v34, %v2003_v26  ;;  %v2005_v56 = vpop.f32.mrb[93].mxu0  ;;  %3760 = vpow2.f32 %v2418_v3  ;;  %v2912_v41 = vmul.f32 %v3978_v12, %v3749_v43  ;;  %v2724_v43 = vld [vmem:[#allocation5 + $0x50] sm:$0xff]  ;;  %v5945_v12 = vld [vmem:[#allocation28_spill] sm:$0xff] }
 0x321   :  { %v3751_v10 = vpop.eup %3750  ;;  %v2420_v39 = vmul.f32 1.442695, %v2343_v8  ;;  %v2006_v30 = vpop.f32.mrb[94].mxu0  ;;  %v5944_v56 = vld [vmem:[#allocation27_spill] sm:$0xff] }
 0x322   :  { %v3753_v42 = vpop.eup %3752  ;;  %v3040_v53 = vmul.f32 %v2976_v61, %v2848_v63  ;;  %v2977_v45 = vsub.f32 1.0, %v3751_v10  ;;  %3233 = vst [vmem:[#allocation9 + $0x38] sm:$0xff] %v3751_v10  ;;  %v3404_v51 = vclamps-f32 %v2004_v14, 5.0  ;;  %v2008_v36 = vpop.f32.mrb[95].mxu0  ;;  %v2007_v20 = vadd.f32 %v5599_v34, %v2006_v30 }
 0x323   :  { %v2532_v25 = vadd.f32 1.0, %v3753_v42  ;;  %3762 = vpow2.f32 %v2420_v39  ;;  %v2913_v50 = vmul.f32 %v3979_v55, %v3751_v10  ;;  %v2850_v62 = vadd.f32 %v2786_v22, %v5944_v56  ;;  %v5948_v56 = vld [vmem:[#allocation36_spill] sm:$0xff] }
 0x324   :  { %v3104_v27 = vadd.f32 %v3040_v53, %v2912_v41  ;;  %v3041_v3 = vmul.f32 %v2977_v45, %v2849_v37  ;;  %v2344_v8 = vsub.f32 0.0, %v3404_v51  ;;  %v3405_v24 = vclamps-f32 %v2007_v20, 5.0  ;;  %v2725_v41 = vld [vmem:[#allocation5 + $0x58] sm:$0xff]  ;;  %v5946_v53 = vld [vmem:[#allocation47_spill] sm:$0xff] }
 0x325   :  { %v3755_v26 = vpop.eup %3754  ;;  %3764 = vrcp.f32 %v2532_v25  ;;  %v2851_v30 = vadd.f32 %v2787_v16, %v5945_v12  ;;  %v2788_v45 = vmul.f32 %v2724_v43, %v5946_v53  ;;  %v3980_v16 = vld [vmem:[#allocation2 + $0x40] sm:$0xff]  ;;  %v3981_v12 = vld [vmem:[#allocation2 + $0x48] sm:$0xff] }
 0x326   :  { %3168 = vst [vmem:[#allocation8 + $0x30] sm:$0xff] %v3104_v27  ;;  %v3105_v63 = vadd.f32 %v3041_v3, %v2913_v50  ;;  %v2533_v61 = vadd.f32 1.0, %v3755_v26  ;;  %v2422_v14 = vmul.f32 1.442695, %v2344_v8  ;;  %v2345_v11 = vsub.f32 0.0, %v3405_v24  ;;  %v5947_v26 = vld [vmem:[#allocation48_spill] sm:$0xff] }
 0x327   :  { %v2011_v42 = vpop.f32.mrb[96].mxu0  ;;  %v2789_v24 = vmul.f32 %v2725_v41, %v5947_v26 }
 0x328   :  { %v3757_v39 = vpop.eup %3756  ;;  %3169 = vst [vmem:[#allocation8 + $0x38] sm:$0xff] %v3105_v63  ;;  %3766 = vrcp.f32 %v2533_v61  ;;  %v2012_v37 = vadd.f32 %v5599_v34, %v2011_v42  ;;  %v2013_v10 = vpop.f32.mrb[97].mxu0  ;;  %v2424_v36 = vmul.f32 1.442695, %v2345_v11  ;;  %v2852_v11 = vadd.f32 %v2788_v45, %v5948_v56 }
 0x329   :  { %v2978_v51 = vsub.f32 1.0, %v3757_v39  ;;  %3234 = vst [vmem:[#allocation9 + $0x40] sm:$0xff] %v3757_v39  ;;  %3768 = vpow2.f32 %v2422_v14  ;;  %v2014_v44 = vpop.f32.mrb[98].mxu0  ;;  %v3759_v25 = vpop.eup %3758  ;;  %v2914_v50 = vmul.f32 %v3980_v16, %v3757_v39 }
 0x32a   :  { %v3406_v22 = vclamps-f32 %v2012_v37, 5.0  ;;  %v2015_v20 = vadd.f32 %v5599_v34, %v2014_v44  ;;  %v2016_v27 = vpop.f32.mrb[99].mxu0  ;;  %v3761_v55 = vpop.eup %3760  ;;  %v2979_v8 = vsub.f32 1.0, %v3759_v25  ;;  %3235 = vst [vmem:[#allocation9 + $0x48] sm:$0xff] %v3759_v25  ;;  %3770 = vpow2.f32 %v2424_v36 }
 0x32b   :  { %v3042_v3 = vmul.f32 %v2978_v51, %v2850_v62  ;;  %v2534_v43 = vadd.f32 1.0, %v3761_v55  ;;  %v2915_v37 = vmul.f32 %v3981_v12, %v3759_v25  ;;  %v2726_v27 = vld [vmem:[#allocation5 + $0x60] sm:$0xff]  ;;  %v5949_v55 = vld [vmem:[#allocation37_spill] sm:$0xff] }
 0x32c   :  { %v2346_v63 = vsub.f32 0.0, %v3406_v22  ;;  %v3407_v61 = vclamps-f32 %v2015_v20, 5.0  ;;  %v3043_v10 = vmul.f32 %v2979_v8, %v2851_v30  ;;  %v2853_v45 = vadd.f32 %v2789_v24, %v5949_v55  ;;  %v2728_v55 = vld [vmem:[#allocation5 + $0x70] sm:$0xff] }
 0x32d   :  { %v3763_v14 = vpop.eup %3762  ;;  %v3106_v42 = vadd.f32 %v3042_v3, %v2914_v50  ;;  %3772 = vrcp.f32 %v2534_v43  ;;  %v2727_v50 = vld [vmem:[#allocation5 + $0x68] sm:$0xff]  ;;  %v3982_v3 = vld [vmem:[#allocation2 + $0x50] sm:$0xff] }
 0x32e   :  { %v2535_v53 = vadd.f32 1.0, %v3763_v14  ;;  %v2426_v44 = vmul.f32 1.442695, %v2346_v63  ;;  %v2347_v39 = vsub.f32 0.0, %v3407_v61  ;;  %v3107_v51 = vadd.f32 %v3043_v10, %v2915_v37 }
 0x32f   :  { %v3765_v62 = vpop.eup %3764  ;;  %3170 = vst [vmem:[#allocation8 + $0x40] sm:$0xff] %v3106_v42  ;;  %v2019_v36 = vpop.f32.mrb[100].mxu0  ;;  %v2790_v14 = vmul.f32 %v2726_v27, %v4801_v52 }
 0x330   :  { %v2980_v41 = vsub.f32 1.0, %v3765_v62  ;;  %3236 = vst [vmem:[#allocation9 + $0x50] sm:$0xff] %v3765_v62  ;;  %3774 = vrcp.f32 %v2535_v53  ;;  %v2428_v22 = vmul.f32 1.442695, %v2347_v39  ;;  %v2021_v20 = vpop.f32.mrb[101].mxu0  ;;  %3171 = vst [vmem:[#allocation8 + $0x48] sm:$0xff] %v3107_v51  ;;  %v2020_v30 = vadd.f32 %v5599_v34, %v2019_v36 }
 0x331   :  { %3776 = vpow2.f32 %v2426_v44  ;;  %v2022_v25 = vpop.f32.mrb[102].mxu0  ;;  %v2916_v8 = vmul.f32 %v3982_v3, %v3765_v62  ;;  %v2791_v53 = vmul.f32 %v2727_v50, %v4817_v19  ;;  %v3983_v44 = vld [vmem:[#allocation2 + $0x58] sm:$0xff] }
 0x332   :  { %v3767_v16 = vpop.eup %3766  ;;  %v3044_v26 = vmul.f32 %v2980_v41, %v2852_v11  ;;  %3778 = vpow2.f32 %v2428_v22  ;;  %v2023_v43 = vadd.f32 %v5599_v34, %v2022_v25  ;;  %v2024_v63 = vpop.f32.mrb[103].mxu0  ;;  %v3408_v24 = vclamps-f32 %v2020_v30, 5.0 }
 0x333   :  { %v3769_v61 = vpop.eup %3768  ;;  %v2981_v56 = vsub.f32 1.0, %v3767_v16  ;;  %3237 = vst [vmem:[#allocation9 + $0x58] sm:$0xff] %v3767_v16  ;;  %v2917_v39 = vmul.f32 %v3983_v44, %v3767_v16  ;;  %v2854_v41 = vadd.f32 %v2790_v14, %v4627_v18  ;;  %v2855_v16 = vadd.f32 %v2791_v53, %v4631_v33  ;;  %v3984_v14 = vld [vmem:[#allocation2 + $0x60] sm:$0xff] }
 0x334   :  { %v3108_v42 = vadd.f32 %v3044_v26, %v2916_v8  ;;  %v2536_v12 = vadd.f32 1.0, %v3769_v61  ;;  %v3409_v37 = vclamps-f32 %v2023_v43, 5.0  ;;  %v3771_v10 = vpop.eup %3770  ;;  %v2348_v11 = vsub.f32 0.0, %v3408_v24 }
 0x335   :  { %v3045_v62 = vmul.f32 %v2981_v56, %v2853_v45  ;;  %v2537_v51 = vadd.f32 1.0, %v3771_v10  ;;  %v2729_v45 = vld [vmem:[#allocation5 + $0x78] sm:$0xff]  ;;  %v2792_v61 = vmul.f32 %v2728_v55, %v4851_v28 }
 0x336   :  { %3172 = vst [vmem:[#allocation8 + $0x50] sm:$0xff] %v3108_v42  ;;  %3780 = vrcp.f32 %v2536_v12  ;;  %v2349_v36 = vsub.f32 0.0, %v3409_v37  ;;  %v2430_v27 = vmul.f32 1.442695, %v2348_v11  ;;  %v2793_v12 = vmul.f32 %v2729_v45, %v4862_v15 }
 0x337   :  { %v3109_v52 = vadd.f32 %v3045_v62, %v2917_v39  ;;  %v2027_v22 = vpop.f32.mrb[104].mxu0  ;;  %v3773_v20 = vpop.eup %3772  ;;  %3782 = vrcp.f32 %v2537_v51  ;;  %v3985_v39 = vld [vmem:[#allocation2 + $0x68] sm:$0xff]  ;;  %v2856_v28 = vadd.f32 %v2792_v61, %v4669_v29 }
 0x338   :  { %v2432_v30 = vmul.f32 1.442695, %v2349_v36  ;;  %v2028_v25 = vadd.f32 %v5599_v34, %v2027_v22  ;;  %v2029_v19 = vpop.f32.mrb[105].mxu0  ;;  %v2982_v50 = vsub.f32 1.0, %v3773_v20  ;;  %3238 = vst [vmem:[#allocation9 + $0x60] sm:$0xff] %v3773_v20  ;;  %3784 = vpow2.f32 %v2430_v27 }
 0x339   :  { %3173 = vst [vmem:[#allocation8 + $0x58] sm:$0xff] %v3109_v52  ;;  %v2030_v3 = vpop.f32.mrb[106].mxu0  ;;  %v2918_v56 = vmul.f32 %v3984_v14, %v3773_v20  ;;  %v2730_v20 = vld [vmem:[#allocation5 + $0x80] sm:$0xff]  ;;  %v2731_v19 = vld [vmem:[#allocation5 + $0x88] sm:$0xff] }
 0x33a   :  { %v3775_v8 = vpop.eup %3774  ;;  %3786 = vpow2.f32 %v2432_v30  ;;  %v3410_v18 = vclamps-f32 %v2028_v25, 5.0  ;;  %v2031_v26 = vadd.f32 %v5599_v34, %v2030_v3  ;;  %v2032_v43 = vpop.f32.mrb[107].mxu0  ;;  %v3046_v24 = vmul.f32 %v2982_v50, %v2854_v41 }
 0x33b   :  { %v3777_v63 = vpop.eup %3776  ;;  %v2983_v42 = vsub.f32 1.0, %v3775_v8  ;;  %3239 = vst [vmem:[#allocation9 + $0x68] sm:$0xff] %v3775_v8  ;;  %v2919_v62 = vmul.f32 %v3985_v39, %v3775_v8  ;;  %v2857_v25 = vadd.f32 %v2793_v12, %v4677_v58  ;;  %v3986_v43 = vld [vmem:[#allocation2 + $0x70] sm:$0xff] }
 0x33c   :  { %v3779_v33 = vpop.eup %3778  ;;  %v2538_v37 = vadd.f32 1.0, %v3777_v63  ;;  %v2350_v10 = vsub.f32 0.0, %v3410_v18  ;;  %v3411_v53 = vclamps-f32 %v2031_v26, 5.0  ;;  %v3110_v44 = vadd.f32 %v3046_v24, %v2918_v56 }
 0x33d   :  { %v3047_v11 = vmul.f32 %v2983_v42, %v2855_v16  ;;  %v2539_v51 = vadd.f32 1.0, %v3779_v33  ;;  %v2794_v26 = vmul.f32 %v2730_v20, %v4926_v21  ;;  %v2795_v56 = vmul.f32 %v2731_v19, %v4933_v35  ;;  %v2733_v20 = vld [vmem:[#allocation5 + $0x98] sm:$0xff] }
 0x33e   :  { %3788 = vrcp.f32 %v2538_v37  ;;  %v2434_v36 = vmul.f32 1.442695, %v2350_v10  ;;  %v2351_v52 = vsub.f32 0.0, %v3411_v53  ;;  %3174 = vst [vmem:[#allocation8 + $0x60] sm:$0xff] %v3110_v44  ;;  %v3987_v37 = vld [vmem:[#allocation2 + $0x78] sm:$0xff] }
 0x33f   :  { %v3111_v41 = vadd.f32 %v3047_v11, %v2919_v62  ;;  %3790 = vrcp.f32 %v2539_v51  ;;  %v2035_v27 = vpop.f32.mrb[108].mxu0  ;;  %v2858_v21 = vadd.f32 %v2794_v26, %v4783_v6  ;;  %v2732_v11 = vld [vmem:[#allocation5 + $0x90] sm:$0xff]  ;;  %v2859_v35 = vadd.f32 %v2795_v56, %v4789_v13  ;;  %v3988_v13 = vld [vmem:[#allocation2 + $0x80] sm:$0xff]  ;;  %v3989_v26 = vld [vmem:[#allocation2 + $0x88] sm:$0xff] }
 0x340   :  { %v3781_v22 = vpop.eup %3780  ;;  %3792 = vpow2.f32 %v2434_v36  ;;  %v2436_v15 = vmul.f32 1.442695, %v2351_v52  ;;  %v2036_v55 = vadd.f32 %v5599_v34, %v2035_v27  ;;  %v2037_v30 = vpop.f32.mrb[109].mxu0  ;;  %v2734_v56 = vld [vmem:[#allocation5 + $0xa0] sm:$0xff] }
 0x341   :  { %3175 = vst [vmem:[#allocation8 + $0x68] sm:$0xff] %v3111_v41  ;;  %v2984_v16 = vsub.f32 1.0, %v3781_v22  ;;  %3240 = vst [vmem:[#allocation9 + $0x70] sm:$0xff] %v3781_v22  ;;  %v2038_v45 = vpop.f32.mrb[110].mxu0  ;;  %v3783_v50 = vpop.eup %3782  ;;  %v2920_v63 = vmul.f32 %v3986_v43, %v3781_v22  ;;  %v2796_v30 = vmul.f32 %v2732_v11, %v4970_v4 }
 0x342   :  { %3794 = vpow2.f32 %v2436_v15  ;;  %v3412_v29 = vclamps-f32 %v2036_v55, 5.0  ;;  %v2039_v3 = vadd.f32 %v5599_v34, %v2038_v45  ;;  %v2040_v8 = vpop.f32.mrb[111].mxu0  ;;  %v3785_v18 = vpop.eup %3784  ;;  %v2985_v14 = vsub.f32 1.0, %v3783_v50  ;;  %3241 = vst [vmem:[#allocation9 + $0x78] sm:$0xff] %v3783_v50 }
 0x343   :  { %v3048_v61 = vmul.f32 %v2984_v16, %v2856_v28  ;;  %v2540_v24 = vadd.f32 1.0, %v3785_v18  ;;  %v2921_v10 = vmul.f32 %v3987_v37, %v3783_v50  ;;  %v2797_v18 = vmul.f32 %v2733_v20, %v4981_v1 }
 0x344   :  { %v3787_v58 = vpop.eup %3786  ;;  %v2352_v42 = vsub.f32 0.0, %v3412_v29  ;;  %v3413_v33 = vclamps-f32 %v2039_v3, 5.0  ;;  %v3049_v53 = vmul.f32 %v2985_v14, %v2857_v25 }
 0x345   :  { %v3112_v12 = vadd.f32 %v3048_v61, %v2920_v63  ;;  %v2541_v44 = vadd.f32 1.0, %v3787_v58  ;;  %3796 = vrcp.f32 %v2540_v24  ;;  %v2861_v1 = vadd.f32 %v2797_v18, %v4831_v0  ;;  %v5689_v0 = vld [vmem:[%s5824_s7] ss:$0 sm:$0xff] }
 0x346   :  { %v2438_v39 = vmul.f32 1.442695, %v2352_v42  ;;  %v2353_v62 = vsub.f32 0.0, %v3413_v33  ;;  %v3113_v51 = vadd.f32 %v3049_v53, %v2921_v10  ;;  %v2860_v33 = vadd.f32 %v2796_v30, %v4813_v9 }
 0x347   :  { %3176 = vst [vmem:[#allocation8 + $0x70] sm:$0xff] %v3112_v12  ;;  %3798 = vrcp.f32 %v2541_v44  ;;  %v2043_v36 = vpop.f32.mrb[112].mxu0  ;;  %v2735_v12 = vld [vmem:[#allocation5 + $0xa8] sm:$0xff] }
 0x348   :  { %v3789_v52 = vpop.eup %3788  ;;  %3800 = vpow2.f32 %v2438_v39  ;;  %v2440_v28 = vmul.f32 1.442695, %v2353_v62  ;;  %v2044_v41 = vadd.f32 %v5599_v34, %v2043_v36  ;;  %v2045_v27 = vpop.f32.mrb[113].mxu0  ;;  %3177 = vst [vmem:[#allocation8 + $0x78] sm:$0xff] %v3113_v51 }
 0x349   :  { %v3791_v22 = vpop.eup %3790  ;;  %v2986_v15 = vsub.f32 1.0, %v3789_v52  ;;  %3242 = vst [vmem:[#allocation9 + $0x80] sm:$0xff] %v3789_v52  ;;  %v2046_v55 = vpop.f32.mrb[114].mxu0  ;;  %v2922_v45 = vmul.f32 %v3988_v13, %v3789_v52  ;;  %v2799_v52 = vmul.f32 %v2735_v12, %v5051_v23  ;;  %v3991_v27 = vld [vmem:[#allocation2 + $0x90] sm:$0xff] }
 0x34a   :  { %v3793_v6 = vpop.eup %3792  ;;  %v2987_v25 = vsub.f32 1.0, %v3791_v22  ;;  %3243 = vst [vmem:[#allocation9 + $0x88] sm:$0xff] %v3791_v22  ;;  %3802 = vpow2.f32 %v2440_v28  ;;  %v3414_v19 = vclamps-f32 %v2044_v41, 5.0  ;;  %v2048_v16 = vpop.f32.mrb[115].mxu0  ;;  %v2047_v3 = vadd.f32 %v5599_v34, %v2046_v55  ;;  %v3992_v55 = vld [vmem:[#allocation2 + $0x98] sm:$0xff] }
 0x34b   :  { %v3050_v50 = vmul.f32 %v2986_v15, %v2858_v21  ;;  %v2542_v29 = vadd.f32 1.0, %v3793_v6  ;;  %v2923_v43 = vmul.f32 %v3989_v26, %v3791_v22  ;;  %v2798_v21 = vmul.f32 %v2734_v56, %v5031_v57 }
 0x34c   :  { %v3795_v8 = vpop.eup %3794  ;;  %v3051_v63 = vmul.f32 %v2987_v25, %v2859_v35  ;;  %v2354_v61 = vsub.f32 0.0, %v3414_v19  ;;  %v3415_v58 = vclamps-f32 %v2047_v3, 5.0  ;;  %v2863_v26 = vadd.f32 %v2799_v52, %v4899_v48  ;;  %v2738_v52 = vld [vmem:[#allocation5 + $0xc0] sm:$0xff] }
 0x34d   :  { %v3114_v14 = vadd.f32 %v3050_v50, %v2922_v45  ;;  %3804 = vrcp.f32 %v2542_v29  ;;  %v2543_v4 = vadd.f32 1.0, %v3795_v8  ;;  %v2862_v13 = vadd.f32 %v2798_v21, %v4897_v47  ;;  %v2736_v45 = vld [vmem:[#allocation5 + $0xb0] sm:$0xff] }
 0x34e   :  { %v3115_v24 = vadd.f32 %v3051_v63, %v2923_v43  ;;  %v2442_v42 = vmul.f32 1.442695, %v2354_v61  ;;  %v2355_v37 = vsub.f32 0.0, %v3415_v58  ;;  %v2800_v47 = vmul.f32 %v2736_v45, %v5099_v2 }
 0x34f   :  { %3178 = vst [vmem:[#allocation8 + $0x80] sm:$0xff] %v3114_v14  ;;  %3806 = vrcp.f32 %v2543_v4  ;;  %v2051_v10 = vpop.f32.mrb[116].mxu0  ;;  %v3797_v53 = vpop.eup %3796  ;;  %v2737_v4 = vld [vmem:[#allocation5 + $0xb8] sm:$0xff] }
 0x350   :  { %3179 = vst [vmem:[#allocation8 + $0x88] sm:$0xff] %v3115_v24  ;;  %3808 = vpow2.f32 %v2442_v42  ;;  %v2052_v44 = vadd.f32 %v5599_v34, %v2051_v10  ;;  %v2053_v39 = vpop.f32.mrb[117].mxu0  ;;  %v2988_v11 = vsub.f32 1.0, %v3797_v53  ;;  %3244 = vst [vmem:[#allocation9 + $0x90] sm:$0xff] %v3797_v53  ;;  %v2444_v51 = vmul.f32 1.442695, %v2355_v37 }
 0x351   :  { %v3799_v62 = vpop.eup %3798  ;;  %v2054_v9 = vpop.f32.mrb[118].mxu0  ;;  %v2924_v57 = vmul.f32 %v3991_v27, %v3797_v53  ;;  %v3993_v42 = vld [vmem:[#allocation2 + $0xa0] sm:$0xff] }
 0x352   :  { %v3801_v36 = vpop.eup %3800  ;;  %v2989_v35 = vsub.f32 1.0, %v3799_v62  ;;  %3245 = vst [vmem:[#allocation9 + $0x98] sm:$0xff] %v3799_v62  ;;  %v3416_v28 = vclamps-f32 %v2052_v44, 5.0  ;;  %v2055_v34 = vadd.f32 %v5689_v0, %v2054_v9  ;;  %v2056_v41 = vpop.f32.mrb[119].mxu0  ;;  %v3052_v22 = vmul.f32 %v2988_v11, %v2860_v33 }
 0x353   :  { %v2544_v20 = vadd.f32 1.0, %v3801_v36  ;;  %3810 = vpow2.f32 %v2444_v51  ;;  %v2925_v6 = vmul.f32 %v3992_v55, %v3799_v62  ;;  %v2801_v44 = vmul.f32 %v2737_v4, %v5108_v7  ;;  %v3994_v62 = vld [vmem:[#allocation2 + $0xa8] sm:$0xff] }
 0x354   :  { %v3803_v15 = vpop.eup %3802  ;;  %v3053_v23 = vmul.f32 %v2989_v35, %v2861_v1  ;;  %v2356_v30 = vsub.f32 0.0, %v3416_v28  ;;  %v3417_v25 = vclamps-f32 %v2055_v34, 5.0  ;;  %v3116_v19 = vadd.f32 %v3052_v22, %v2924_v57 }
 0x355   :  { %3812 = vrcp.f32 %v2544_v20  ;;  %v2545_v16 = vadd.f32 1.0, %v3803_v15  ;;  %v2864_v36 = vadd.f32 %v2800_v47, %v4917_v31  ;;  %v2865_v7 = vadd.f32 %v2801_v44, %v4919_v46 }
 0x356   :  { %v3117_v50 = vadd.f32 %v3053_v23, %v2925_v6  ;;  %v2446_v29 = vmul.f32 1.442695, %v2356_v30  ;;  %v2357_v3 = vsub.f32 0.0, %v3417_v25  ;;  %3180 = vst [vmem:[#allocation8 + $0x90] sm:$0xff] %v3116_v19  ;;  %v2802_v31 = vmul.f32 %v2738_v52, %v5164_v40  ;;  %v2739_v25 = vld [vmem:[#allocation5 + $0xc8] sm:$0xff]  ;;  %v3995_v19 = vld [vmem:[#allocation2 + $0xb0] sm:$0xff] }
 0x357   :  { %v3805_v8 = vpop.eup %3804  ;;  %3814 = vrcp.f32 %v2545_v16  ;;  %v2059_v18 = vpop.f32.mrb[120].mxu0 }
 0x358   :  { %3181 = vst [vmem:[#allocation8 + $0x98] sm:$0xff] %v3117_v50  ;;  %v2990_v43 = vsub.f32 1.0, %v3805_v8  ;;  %3246 = vst [vmem:[#allocation9 + $0xa0] sm:$0xff] %v3805_v8  ;;  %3816 = vpow2.f32 %v2446_v29  ;;  %v2448_v63 = vmul.f32 1.442695, %v2357_v3  ;;  %v2061_v61 = vpop.f32.mrb[121].mxu0  ;;  %v2060_v58 = vadd.f32 %v5689_v0, %v2059_v18 }
 0x359   :  { %v3807_v14 = vpop.eup %3806  ;;  %v2062_v56 = vpop.f32.mrb[122].mxu0  ;;  %v2926_v33 = vmul.f32 %v3993_v42, %v3805_v8  ;;  %v2803_v61 = vmul.f32 %v2739_v25, %v5172_v60  ;;  %v2866_v47 = vadd.f32 %v2802_v31, %v5053_v54 }
 0x35a   :  { %v3809_v24 = vpop.eup %3808  ;;  %v3054_v12 = vmul.f32 %v2990_v43, %v2862_v13  ;;  %v2991_v37 = vsub.f32 1.0, %v3807_v14  ;;  %3247 = vst [vmem:[#allocation9 + $0xa8] sm:$0xff] %v3807_v14  ;;  %3818 = vpow2.f32 %v2448_v63  ;;  %v2064_v48 = vpop.f32.mrb[123].mxu0  ;;  %v3418_v53 = vclamps-f32 %v2060_v58, 5.0  ;;  %v2740_v58 = vld [vmem:[#allocation5 + $0xd0] sm:$0xff] }
 0x35b   :  { %v2546_v10 = vadd.f32 1.0, %v3809_v24  ;;  %v2063_v1 = vadd.f32 %v5689_v0, %v2062_v56  ;;  %v2927_v2 = vmul.f32 %v3994_v62, %v3807_v14  ;;  %v2804_v54 = vmul.f32 %v2740_v58, %v5198_v32  ;;  %v3997_v62 = vld [vmem:[#allocation2 + $0xc0] sm:$0xff] }
 0x35c   :  { %v3118_v39 = vadd.f32 %v3054_v12, %v2926_v33  ;;  %v3055_v21 = vmul.f32 %v2991_v37, %v2863_v26  ;;  %v2358_v51 = vsub.f32 0.0, %v3418_v53  ;;  %v3996_v26 = vld [vmem:[#allocation2 + $0xb8] sm:$0xff]  ;;  %v2867_v53 = vadd.f32 %v2803_v61, %v5055_v49 }
 0x35d   :  { %v3811_v11 = vpop.eup %3810  ;;  %3820 = vrcp.f32 %v2546_v10  ;;  %v3419_v9 = vclamps-f32 %v2063_v1, 5.0  ;;  %v2741_v37 = vld [vmem:[#allocation5 + $0xd8] sm:$0xff] }
 0x35e   :  { %3182 = vst [vmem:[#allocation8 + $0xa0] sm:$0xff] %v3118_v39  ;;  %v3119_v35 = vadd.f32 %v3055_v21, %v2927_v2  ;;  %v2547_v28 = vadd.f32 1.0, %v3811_v11  ;;  %v2450_v41 = vmul.f32 1.442695, %v2358_v51  ;;  %v2805_v52 = vmul.f32 %v2741_v37, %v5203_v38 }
 0x35f   :  { %v3813_v34 = vpop.eup %3812  ;;  %v2359_v27 = vsub.f32 0.0, %v3419_v9  ;;  %v2067_v57 = vpop.f32.mrb[124].mxu0 }
 0x360   :  { %3183 = vst [vmem:[#allocation8 + $0xa8] sm:$0xff] %v3119_v35  ;;  %v2992_v22 = vsub.f32 1.0, %v3813_v34  ;;  %3248 = vst [vmem:[#allocation9 + $0xb0] sm:$0xff] %v3813_v34  ;;  %3822 = vrcp.f32 %v2547_v28  ;;  %v2068_v20 = vadd.f32 %v5689_v0, %v2067_v57  ;;  %v2069_v15 = vpop.f32.mrb[125].mxu0  ;;  %v2928_v16 = vmul.f32 %v3995_v19, %v3813_v34  ;;  %v3998_v57 = vld [vmem:[#allocation2 + $0xc8] sm:$0xff] }
 0x361   :  { %v3815_v55 = vpop.eup %3814  ;;  %3824 = vpow2.f32 %v2450_v41  ;;  %v2452_v6 = vmul.f32 1.442695, %v2359_v27  ;;  %v2070_v23 = vpop.f32.mrb[126].mxu0  ;;  %v2868_v27 = vadd.f32 %v2804_v54, %v5079_v59 }
 0x362   :  { %v3817_v30 = vpop.eup %3816  ;;  %v3056_v13 = vmul.f32 %v2992_v22, %v2864_v36  ;;  %v2993_v45 = vsub.f32 1.0, %v3815_v55  ;;  %3249 = vst [vmem:[#allocation9 + $0xb8] sm:$0xff] %v3815_v55  ;;  %v3420_v46 = vclamps-f32 %v2068_v20, 5.0  ;;  %v2072_v50 = vpop.f32.mrb[127].mxu0  ;;  %v2071_v3 = vadd.f32 %v5689_v0, %v2070_v23 }
 0x363   :  { %v2548_v29 = vadd.f32 1.0, %v3817_v30  ;;  %3826 = vpow2.f32 %v2452_v6  ;;  %v2929_v40 = vmul.f32 %v3996_v26, %v3815_v55  ;;  %v2869_v23 = vadd.f32 %v2805_v52, %v5081_v17  ;;  %v2742_v30 = vld [vmem:[#allocation5 + $0xe0] sm:$0xff]  ;;  %v2743_v50 = vld [vmem:[#allocation5 + $0xe8] sm:$0xff]  ;;  %v5953_v52 = vld [vmem:[#allocation74_spill] sm:$0xff] }
 0x364   :  { %v3819_v8 = vpop.eup %3818  ;;  %v3120_v18 = vadd.f32 %v3056_v13, %v2928_v16  ;;  %v3057_v43 = vmul.f32 %v2993_v45, %v2865_v7  ;;  %v2360_v63 = vsub.f32 0.0, %v3420_v46  ;;  %v3421_v4 = vclamps-f32 %v2071_v3, 5.0 }
 0x365   :  { %3828 = vrcp.f32 %v2548_v29  ;;  %v2549_v14 = vadd.f32 1.0, %v3819_v8  ;;  %v3999_v29 = vld [vmem:[#allocation2 + $0xd0] sm:$0xff]  ;;  %v2806_v26 = vmul.f32 %v2742_v30, %v5213_v5 }
 0x366   :  { %3184 = vst [vmem:[#allocation8 + $0xb0] sm:$0xff] %v3120_v18  ;;  %v3121_v56 = vadd.f32 %v3057_v43, %v2929_v40  ;;  %v2454_v24 = vmul.f32 1.442695, %v2360_v63  ;;  %v2361_v33 = vsub.f32 0.0, %v3421_v4  ;;  %v2744_v5 = vld [vmem:[#allocation5 + $0xf0] sm:$0xff] }
 0x367   :  { %v3821_v42 = vpop.eup %3820  ;;  %3830 = vrcp.f32 %v2549_v14  ;;  %v2075_v12 = vpop.f32.mrb[128].mxu0  ;;  %v4000_v14 = vld [vmem:[#allocation2 + $0xd8] sm:$0xff] }
 0x368   :  { %3185 = vst [vmem:[#allocation8 + $0xb8] sm:$0xff] %v3121_v56  ;;  %v2994_v48 = vsub.f32 1.0, %v3821_v42  ;;  %3250 = vst [vmem:[#allocation9 + $0xc0] sm:$0xff] %v3821_v42  ;;  %3832 = vpow2.f32 %v2454_v24  ;;  %v2076_v60 = vadd.f32 %v5689_v0, %v2075_v12  ;;  %v2077_v10 = vpop.f32.mrb[129].mxu0  ;;  %v2456_v1 = vmul.f32 1.442695, %v2361_v33 }
 0x369   :  { %v2078_v44 = vpop.f32.mrb[130].mxu0  ;;  %v2930_v2 = vmul.f32 %v3997_v62, %v3821_v42  ;;  %v5950_v56 = vld [vmem:[#allocation71_spill] sm:$0xff]  ;;  %v5952_v62 = vld [vmem:[#allocation64_spill] sm:$0xff] }
 0x36a   :  { %v3823_v39 = vpop.eup %3822  ;;  %v3058_v21 = vmul.f32 %v2994_v48, %v2866_v47  ;;  %v3422_v11 = vclamps-f32 %v2076_v60, 5.0  ;;  %v2079_v51 = vadd.f32 %v5689_v0, %v2078_v44  ;;  %v2080_v9 = vpop.f32.mrb[131].mxu0  ;;  %3834 = vpow2.f32 %v2456_v1  ;;  %v5951_v48 = vld [vmem:[#allocation63_spill] sm:$0xff] }
 0x36b   :  { %v3825_v36 = vpop.eup %3824  ;;  %v2995_v35 = vsub.f32 1.0, %v3823_v39  ;;  %3251 = vst [vmem:[#allocation9 + $0xc8] sm:$0xff] %v3823_v39  ;;  %v2931_v7 = vmul.f32 %v3998_v57, %v3823_v39  ;;  %v2807_v24 = vmul.f32 %v2743_v50, %v5950_v56  ;;  %v2870_v60 = vadd.f32 %v2806_v26, %v5951_v48 }
 0x36c   :  { %v3122_v28 = vadd.f32 %v3058_v21, %v2930_v2  ;;  %v2550_v49 = vadd.f32 1.0, %v3825_v36  ;;  %v2362_v34 = vsub.f32 0.0, %v3422_v11  ;;  %v3423_v32 = vclamps-f32 %v2079_v51, 5.0  ;;  %v2745_v21 = vld [vmem:[#allocation5 + $0xf8] sm:$0xff] }
 0x36d   :  { %v3827_v41 = vpop.eup %3826  ;;  %v3059_v22 = vmul.f32 %v2995_v35, %v2867_v53  ;;  %v2871_v2 = vadd.f32 %v2807_v24, %v5952_v62  ;;  %v2808_v35 = vmul.f32 %v2744_v5, %v5953_v52 }
 0x36e   :  { %3186 = vst [vmem:[#allocation8 + $0xc0] sm:$0xff] %v3122_v28  ;;  %3836 = vrcp.f32 %v2550_v49  ;;  %v2551_v20 = vadd.f32 1.0, %v3827_v41  ;;  %v2458_v15 = vmul.f32 1.442695, %v2362_v34  ;;  %v2363_v55 = vsub.f32 0.0, %v3423_v32  ;;  %v4001_v41 = vld [vmem:[#allocation2 + $0xe0] sm:$0xff] }
 0x36f   :  { %v3829_v31 = vpop.eup %3828  ;;  %v3123_v38 = vadd.f32 %v3059_v22, %v2931_v7  ;;  %v2083_v6 = vpop.f32.mrb[132].mxu0 }
 0x370   :  { %v2996_v25 = vsub.f32 1.0, %v3829_v31  ;;  %3252 = vst [vmem:[#allocation9 + $0xd0] sm:$0xff] %v3829_v31  ;;  %3838 = vrcp.f32 %v2551_v20  ;;  %v2460_v19 = vmul.f32 1.442695, %v2363_v55  ;;  %v2085_v16 = vpop.f32.mrb[133].mxu0  ;;  %v2084_v13 = vadd.f32 %v5689_v0, %v2083_v6  ;;  %v5954_v20 = vld [vmem:[#allocation75_spill] sm:$0xff] }
 0x371   :  { %v3831_v59 = vpop.eup %3830  ;;  %3187 = vst [vmem:[#allocation8 + $0xc8] sm:$0xff] %v3123_v38  ;;  %3840 = vpow2.f32 %v2458_v15  ;;  %v2086_v45 = vpop.f32.mrb[134].mxu0  ;;  %v2932_v3 = vmul.f32 %v3999_v29, %v3829_v31  ;;  %v2809_v15 = vmul.f32 %v2745_v21, %v5954_v20  ;;  %v5955_v16 = vld [vmem:[#allocation65_spill] sm:$0xff] }
 0x372   :  { %v3833_v46 = vpop.eup %3832  ;;  %v3060_v8 = vmul.f32 %v2996_v25, %v2868_v27  ;;  %v2997_v18 = vsub.f32 1.0, %v3831_v59  ;;  %3253 = vst [vmem:[#allocation9 + $0xd8] sm:$0xff] %v3831_v59  ;;  %3842 = vpow2.f32 %v2460_v19  ;;  %v2088_v17 = vpop.f32.mrb[135].mxu0  ;;  %v3424_v43 = vclamps-f32 %v2084_v13, 5.0 }
 0x373   :  { %v2552_v40 = vadd.f32 1.0, %v3833_v46  ;;  %v2087_v63 = vadd.f32 %v5689_v0, %v2086_v45  ;;  %v2933_v4 = vmul.f32 %v4000_v14, %v3831_v59  ;;  %v2872_v59 = vadd.f32 %v2808_v35, %v5955_v16  ;;  %v5956_v17 = vld [vmem:[#allocation66_spill] sm:$0xff] }
 0x374   :  { %v3124_v61 = vadd.f32 %v3060_v8, %v2932_v3  ;;  %v3061_v47 = vmul.f32 %v2997_v18, %v2869_v23  ;;  %v3835_v58 = vpop.eup %3834  ;;  %v2364_v42 = vsub.f32 0.0, %v3424_v43  ;;  %v4002_v23 = vld [vmem:[#allocation2 + $0xe8] sm:$0xff]  ;;  %v2873_v26 = vadd.f32 %v2809_v15, %v5956_v17 }
 0x375   :  { %3844 = vrcp.f32 %v2552_v40  ;;  %v3425_v33 = vclamps-f32 %v2087_v63, 5.0  ;;  %v2553_v37 = vadd.f32 1.0, %v3835_v58  ;;  %v4006_v15 = vld [vmem:[#allocation2 + $0x108] sm:$0xff] }
 0x376   :  { %3188 = vst [vmem:[#allocation8 + $0xd0] sm:$0xff] %v3124_v61  ;;  %v3125_v12 = vadd.f32 %v3061_v47, %v2933_v4  ;;  %v2462_v10 = vmul.f32 1.442695, %v2364_v42  ;;  %v4003_v61 = vld [vmem:[#allocation2 + $0xf0] sm:$0xff] }
 0x377   :  { %v2365_v53 = vsub.f32 0.0, %v3425_v33  ;;  %v2091_v54 = vpop.f32.mrb[136].mxu0  ;;  %3846 = vrcp.f32 %v2553_v37 }
 0x378   :  { %v3837_v1 = vpop.eup %3836  ;;  %3189 = vst [vmem:[#allocation8 + $0xd8] sm:$0xff] %v3125_v12  ;;  %v2092_v44 = vadd.f32 %v5689_v0, %v2091_v54  ;;  %v2093_v39 = vpop.f32.mrb[137].mxu0  ;;  %3848 = vpow2.f32 %v2462_v10 }
 0x379   :  { %v2998_v11 = vsub.f32 1.0, %v3837_v1  ;;  %3254 = vst [vmem:[#allocation9 + $0xe0] sm:$0xff] %v3837_v1  ;;  %v2464_v51 = vmul.f32 1.442695, %v2365_v53  ;;  %v2094_v9 = vpop.f32.mrb[138].mxu0  ;;  %v2934_v27 = vmul.f32 %v4001_v41, %v3837_v1 }
 0x37a   :  { %v3839_v36 = vpop.eup %3838  ;;  %v3426_v28 = vclamps-f32 %v2092_v44, 5.0  ;;  %v2095_v49 = vadd.f32 %v5689_v0, %v2094_v9  ;;  %v2096_v34 = vpop.f32.mrb[139].mxu0 }
 0x37b   :  { %v3841_v32 = vpop.eup %3840  ;;  %v3062_v57 = vmul.f32 %v2998_v11, %v2870_v60  ;;  %v2999_v7 = vsub.f32 1.0, %v3839_v36  ;;  %3255 = vst [vmem:[#allocation9 + $0xe8] sm:$0xff] %v3839_v36  ;;  %3850 = vpow2.f32 %v2464_v51  ;;  %v2935_v30 = vmul.f32 %v4002_v23, %v3839_v36  ;;  %v4004_v60 = vld [vmem:[#allocation2 + $0xf8] sm:$0xff] }
 0x37c   :  { %v3843_v22 = vpop.eup %3842  ;;  %v2554_v55 = vadd.f32 1.0, %v3841_v32  ;;  %v2366_v31 = vsub.f32 0.0, %v3426_v28  ;;  %v3427_v38 = vclamps-f32 %v2095_v49, 5.0  ;;  %v4005_v32 = vld [vmem:[#allocation2 + $0x100] sm:$0xff] }
 0x37d   :  { %v3126_v6 = vadd.f32 %v3062_v57, %v2934_v27  ;;  %v3063_v25 = vmul.f32 %v2999_v7, %v2871_v2  ;;  %v2555_v19 = vadd.f32 1.0, %v3843_v22  ;;  %v5957_v27 = vld [vmem:[#allocation24_spill] sm:$0xff] }
 0x37e   :  { %3852 = vrcp.f32 %v2554_v55  ;;  %v2466_v13 = vmul.f32 1.442695, %v2366_v31  ;;  %v2367_v45 = vsub.f32 0.0, %v3427_v38  ;;  %v5958_v31 = vld [vmem:[#allocation25_spill] sm:$0xff] }
 0x37f   :  { %v3845_v46 = vpop.eup %3844  ;;  %3190 = vst [vmem:[#allocation8 + $0xe0] sm:$0xff] %v3126_v6  ;;  %v3127_v50 = vadd.f32 %v3063_v25, %v2935_v30  ;;  %3854 = vrcp.f32 %v2555_v19  ;;  %v2099_v29 = vpop.f32.mrb[140].mxu0 }
 0x380   :  { %v3000_v3 = vsub.f32 1.0, %v3845_v46  ;;  %3256 = vst [vmem:[#allocation9 + $0xf0] sm:$0xff] %v3845_v46  ;;  %3856 = vpow2.f32 %v2466_v13  ;;  %v2468_v8 = vmul.f32 1.442695, %v2367_v45  ;;  %v2101_v18 = vpop.f32.mrb[141].mxu0  ;;  %v2100_v40 = vadd.f32 %v5689_v0, %v2099_v29 }
 0x381   :  { %3191 = vst [vmem:[#allocation8 + $0xe8] sm:$0xff] %v3127_v50  ;;  %v2102_v43 = vpop.f32.mrb[142].mxu0  ;;  %v3847_v63 = vpop.eup %3846  ;;  %v2936_v14 = vmul.f32 %v4003_v61, %v3845_v46 }
 0x382   :  { %v3064_v4 = vmul.f32 %v3000_v3, %v2872_v59  ;;  %3858 = vpow2.f32 %v2468_v8  ;;  %v2103_v47 = vadd.f32 %v5689_v0, %v2102_v43  ;;  %v2104_v58 = vpop.f32.mrb[143].mxu0  ;;  %v3849_v56 = vpop.eup %3848  ;;  %v3001_v24 = vsub.f32 1.0, %v3847_v63  ;;  %3257 = vst [vmem:[#allocation9 + $0xf8] sm:$0xff] %v3847_v63 }
 0x383   :  { %v3428_v42 = vclamps-f32 %v2100_v40, 5.0  ;;  %v2556_v12 = vadd.f32 1.0, %v3849_v56  ;;  %v2937_v5 = vmul.f32 %v4004_v60, %v3847_v63  ;;  %v4007_v63 = vld [vmem:[#allocation2 + $0x110] sm:$0xff] }
 0x384   :  { %v3128_v33 = vadd.f32 %v3064_v4, %v2936_v14  ;;  %v3429_v37 = vclamps-f32 %v2103_v47, 5.0  ;;  %v3065_v10 = vmul.f32 %v3001_v24, %v2873_v26  ;;  %v5959_v14 = vld [vmem:[#allocation31_spill] sm:$0xff] }
 0x385   :  { %v3851_v48 = vpop.eup %3850  ;;  %v2368_v53 = vsub.f32 0.0, %v3428_v42  ;;  %3860 = vrcp.f32 %v2556_v12  ;;  %v4008_v12 = vld [vmem:[#allocation2 + $0x118] sm:$0xff] }
 0x386   :  { %3192 = vst [vmem:[#allocation8 + $0xf0] sm:$0xff] %v3128_v33  ;;  %v2557_v54 = vadd.f32 1.0, %v3851_v48  ;;  %v2369_v1 = vsub.f32 0.0, %v3429_v37  ;;  %v3129_v44 = vadd.f32 %v3065_v10, %v2937_v5  ;;  %v5960_v48 = vld [vmem:[#allocation32_spill] sm:$0xff] }
 0x387   :  { %v2470_v39 = vmul.f32 1.442695, %v2368_v53  ;;  %v2107_v62 = vpop.f32.mrb[144].mxu0 }
 0x388   :  { %v3853_v2 = vpop.eup %3852  ;;  %3862 = vrcp.f32 %v2557_v54  ;;  %v2472_v21 = vmul.f32 1.442695, %v2369_v1  ;;  %v2108_v11 = vadd.f32 %v5689_v0, %v2107_v62  ;;  %v2109_v51 = vpop.f32.mrb[145].mxu0  ;;  %3193 = vst [vmem:[#allocation8 + $0xf8] sm:$0xff] %v3129_v44 }
 0x389   :  { %v3855_v9 = vpop.eup %3854  ;;  %v3002_v36 = vsub.f32 1.0, %v3853_v2  ;;  %3258 = vst [vmem:[#allocation9 + $0x100] sm:$0xff] %v3853_v2  ;;  %3864 = vpow2.f32 %v2470_v39  ;;  %v2110_v52 = vpop.f32.mrb[146].mxu0  ;;  %v2938_v41 = vmul.f32 %v4005_v32, %v3853_v2 }
 0x38a   :  { %v3857_v35 = vpop.eup %3856  ;;  %v3003_v28 = vsub.f32 1.0, %v3855_v9  ;;  %3259 = vst [vmem:[#allocation9 + $0x108] sm:$0xff] %v3855_v9  ;;  %3866 = vpow2.f32 %v2472_v21  ;;  %v3430_v49 = vclamps-f32 %v2108_v11, 5.0  ;;  %v2112_v34 = vpop.f32.mrb[147].mxu0  ;;  %v2111_v22 = vadd.f32 %v5689_v0, %v2110_v52 }
 0x38b   :  { %v3066_v57 = vmul.f32 %v3002_v36, %v5957_v27  ;;  %v2558_v7 = vadd.f32 1.0, %v3857_v35  ;;  %v2939_v55 = vmul.f32 %v4006_v15, %v3855_v9  ;;  %v4009_v36 = vld [vmem:[#allocation2 + $0x120] sm:$0xff] }
 0x38c   :  { %v3859_v20 = vpop.eup %3858  ;;  %v3067_v38 = vmul.f32 %v3003_v28, %v5958_v31  ;;  %v2370_v6 = vsub.f32 0.0, %v3430_v49  ;;  %v3431_v25 = vclamps-f32 %v2111_v22, 5.0  ;;  %v5961_v35 = vld [vmem:[#allocation35_spill] sm:$0xff] }
 0x38d   :  { %v3130_v23 = vadd.f32 %v3066_v57, %v2938_v41  ;;  %3868 = vrcp.f32 %v2558_v7  ;;  %v2559_v30 = vadd.f32 1.0, %v3859_v20  ;;  %v4010_v7 = vld [vmem:[#allocation2 + $0x128] sm:$0xff]  ;;  %v5962_v20 = vld [vmem:[#allocation38_spill] sm:$0xff] }
 0x38e   :  { %v3131_v19 = vadd.f32 %v3067_v38, %v2939_v55  ;;  %v2474_v16 = vmul.f32 1.442695, %v2370_v6  ;;  %v2371_v59 = vsub.f32 0.0, %v3431_v25 }
 0x38f   :  { %3194 = vst [vmem:[#allocation8 + $0x100] sm:$0xff] %v3130_v23  ;;  %3870 = vrcp.f32 %v2559_v30  ;;  %v2115_v13 = vpop.f32.mrb[148].mxu0  ;;  %v3861_v45 = vpop.eup %3860 }
 0x390   :  { %3195 = vst [vmem:[#allocation8 + $0x108] sm:$0xff] %v3131_v19  ;;  %3872 = vpow2.f32 %v2474_v16  ;;  %v2116_v46 = vadd.f32 %v5689_v0, %v2115_v13  ;;  %v2117_v50 = vpop.f32.mrb[149].mxu0  ;;  %v3004_v29 = vsub.f32 1.0, %v3861_v45  ;;  %3260 = vst [vmem:[#allocation9 + $0x110] sm:$0xff] %v3861_v45  ;;  %v2476_v3 = vmul.f32 1.442695, %v2371_v59 }
 0x391   :  { %v2118_v8 = vpop.f32.mrb[150].mxu0  ;;  %v2940_v61 = vmul.f32 %v4007_v63, %v3861_v45  ;;  %v5963_v63 = vld [vmem:[#allocation41_spill] sm:$0xff] }
 0x392   :  { %v3863_v18 = vpop.eup %3862  ;;  %v3432_v17 = vclamps-f32 %v2116_v46, 5.0  ;;  %v2119_v26 = vadd.f32 %v5689_v0, %v2118_v8  ;;  %v2120_v40 = vpop.f32.mrb[151].mxu0  ;;  %v3068_v4 = vmul.f32 %v3004_v29, %v5959_v14  ;;  %3874 = vpow2.f32 %v2476_v3 }
 0x393   :  { %v3865_v43 = vpop.eup %3864  ;;  %v3005_v47 = vsub.f32 1.0, %v3863_v18  ;;  %3261 = vst [vmem:[#allocation9 + $0x118] sm:$0xff] %v3863_v18  ;;  %v2941_v37 = vmul.f32 %v4008_v12, %v3863_v18  ;;  %v4011_v40 = vld [vmem:[#allocation2 + $0x130] sm:$0xff] }
 0x394   :  { %v3867_v58 = vpop.eup %3866  ;;  %v2560_v56 = vadd.f32 1.0, %v3865_v43  ;;  %v2372_v24 = vsub.f32 0.0, %v3432_v17  ;;  %v3433_v42 = vclamps-f32 %v2119_v26, 5.0  ;;  %v3132_v33 = vadd.f32 %v3068_v4, %v2940_v61 }
 0x395   :  { %v3069_v60 = vmul.f32 %v3005_v47, %v5960_v48  ;;  %v2561_v5 = vadd.f32 1.0, %v3867_v58  ;;  %v4012_v47 = vld [vmem:[#allocation2 + $0x138] sm:$0xff] }
 0x396   :  { %3876 = vrcp.f32 %v2560_v56  ;;  %v2478_v10 = vmul.f32 1.442695, %v2372_v24  ;;  %v2373_v53 = vsub.f32 0.0, %v3433_v42  ;;  %3196 = vst [vmem:[#allocation8 + $0x110] sm:$0xff] %v3132_v33  ;;  %v5964_v56 = vld [vmem:[#allocation42_spill] sm:$0xff] }
 0x397   :  { %v3869_v54 = vpop.eup %3868  ;;  %v3133_v1 = vadd.f32 %v3069_v60, %v2941_v37  ;;  %3878 = vrcp.f32 %v2561_v5  ;;  %v2123_v44 = vpop.f32.mrb[152].mxu0 }
 0x398   :  { %v3006_v39 = vsub.f32 1.0, %v3869_v54  ;;  %3262 = vst [vmem:[#allocation9 + $0x120] sm:$0xff] %v3869_v54  ;;  %3880 = vpow2.f32 %v2478_v10  ;;  %v2480_v62 = vmul.f32 1.442695, %v2373_v53  ;;  %v2125_v2 = vpop.f32.mrb[153].mxu0  ;;  %v2124_v11 = vadd.f32 %v5689_v0, %v2123_v44 }
 0x399   :  { %v3871_v21 = vpop.eup %3870  ;;  %3197 = vst [vmem:[#allocation8 + $0x118] sm:$0xff] %v3133_v1  ;;  %v2126_v51 = vpop.f32.mrb[154].mxu0  ;;  %v2942_v52 = vmul.f32 %v4009_v36, %v3869_v54 }
 0x39a   :  { %v3873_v9 = vpop.eup %3872  ;;  %v3070_v28 = vmul.f32 %v3006_v39, %v5961_v35  ;;  %v3007_v49 = vsub.f32 1.0, %v3871_v21  ;;  %3263 = vst [vmem:[#allocation9 + $0x128] sm:$0xff] %v3871_v21  ;;  %3882 = vpow2.f32 %v2480_v62  ;;  %v2128_v34 = vpop.f32.mrb[155].mxu0  ;;  %v3434_v41 = vclamps-f32 %v2124_v11, 5.0 }
 0x39b   :  { %v2562_v32 = vadd.f32 1.0, %v3873_v9  ;;  %v2127_v27 = vadd.f32 %v5689_v0, %v2126_v51  ;;  %v2943_v22 = vmul.f32 %v4010_v7, %v3871_v21  ;;  %v4013_v21 = vld [vmem:[#allocation2 + $0x140] sm:$0xff]  ;;  %v5965_v51 = vld [vmem:[#allocation45_spill] sm:$0xff] }
 0x39c   :  { %v3134_v57 = vadd.f32 %v3070_v28, %v2942_v52  ;;  %v3071_v15 = vmul.f32 %v3007_v49, %v5962_v20  ;;  %v3875_v55 = vpop.eup %3874  ;;  %v2374_v31 = vsub.f32 0.0, %v3434_v41 }
 0x39d   :  { %3884 = vrcp.f32 %v2562_v32  ;;  %v3435_v38 = vclamps-f32 %v2127_v27, 5.0  ;;  %v2563_v23 = vadd.f32 1.0, %v3875_v55 }
 0x39e   :  { %3198 = vst [vmem:[#allocation8 + $0x120] sm:$0xff] %v3134_v57  ;;  %v3135_v6 = vadd.f32 %v3071_v15, %v2943_v22  ;;  %v2482_v30 = vmul.f32 1.442695, %v2374_v31  ;;  %v4014_v57 = vld [vmem:[#allocation2 + $0x148] sm:$0xff]  ;;  %v5966_v22 = vld [vmem:[#allocation46_spill] sm:$0xff] }
 0x39f   :  { %v2375_v25 = vsub.f32 0.0, %v3435_v38  ;;  %v2131_v19 = vpop.f32.mrb[128].mxu1  ;;  %3886 = vrcp.f32 %v2563_v23 }
 0x3a0   :  { %v3877_v16 = vpop.eup %3876  ;;  %3199 = vst [vmem:[#allocation8 + $0x128] sm:$0xff] %v3135_v6  ;;  %v2132_v59 = vadd.f32 %v5689_v0, %v2131_v19  ;;  %v2133_v13 = vpop.f32.mrb[129].mxu1  ;;  %3888 = vpow2.f32 %v2482_v30 }
 0x3a1   :  { %v3879_v45 = vpop.eup %3878  ;;  %v3008_v46 = vsub.f32 1.0, %v3877_v16  ;;  %3264 = vst [vmem:[#allocation9 + $0x130] sm:$0xff] %v3877_v16  ;;  %v2484_v50 = vmul.f32 1.442695, %v2375_v25  ;;  %v2134_v29 = vpop.f32.mrb[130].mxu1  ;;  %v2944_v43 = vmul.f32 %v4011_v40, %v3877_v16 }
 0x3a2   :  { %v3881_v3 = vpop.eup %3880  ;;  %v3009_v8 = vsub.f32 1.0, %v3879_v45  ;;  %3265 = vst [vmem:[#allocation9 + $0x138] sm:$0xff] %v3879_v45  ;;  %v3436_v18 = vclamps-f32 %v2132_v59, 5.0  ;;  %v2135_v17 = vadd.f32 %v5689_v0, %v2134_v29  ;;  %v2136_v26 = vpop.f32.mrb[131].mxu1  ;;  %v2945_v58 = vmul.f32 %v4012_v47, %v3879_v45  ;;  %v5968_v47 = vld [vmem:[#allocation50_spill] sm:$0xff] }
 0x3a3   :  { %v3072_v61 = vmul.f32 %v3008_v46, %v5963_v63  ;;  %v2564_v14 = vadd.f32 1.0, %v3881_v3  ;;  %3890 = vpow2.f32 %v2484_v50  ;;  %v4015_v50 = vld [vmem:[#allocation2 + $0x150] sm:$0xff] }
 0x3a4   :  { %v3883_v4 = vpop.eup %3882  ;;  %v3073_v24 = vmul.f32 %v3009_v8, %v5964_v56  ;;  %v2376_v42 = vsub.f32 0.0, %v3436_v18  ;;  %v3437_v33 = vclamps-f32 %v2135_v17, 5.0  ;;  %v5967_v3 = vld [vmem:[#allocation49_spill] sm:$0xff] }
 0x3a5   :  { %v3136_v12 = vadd.f32 %v3072_v61, %v2944_v43  ;;  %3892 = vrcp.f32 %v2564_v14  ;;  %v2565_v37 = vadd.f32 1.0, %v3883_v4  ;;  %v4016_v14 = vld [vmem:[#allocation2 + $0x158] sm:$0xff] }
 0x3a6   :  { %v3137_v48 = vadd.f32 %v3073_v24, %v2945_v58  ;;  %v2486_v60 = vmul.f32 1.442695, %v2376_v42  ;;  %v2377_v5 = vsub.f32 0.0, %v3437_v33 }
 0x3a7   :  { %v3885_v10 = vpop.eup %3884  ;;  %3200 = vst [vmem:[#allocation8 + $0x130] sm:$0xff] %v3136_v12  ;;  %3894 = vrcp.f32 %v2565_v37  ;;  %v2139_v53 = vpop.f32.mrb[132].mxu1 }
 0x3a8   :  { %3201 = vst [vmem:[#allocation8 + $0x138] sm:$0xff] %v3137_v48  ;;  %v3010_v54 = vsub.f32 1.0, %v3885_v10  ;;  %3266 = vst [vmem:[#allocation9 + $0x140] sm:$0xff] %v3885_v10  ;;  %3896 = vpow2.f32 %v2486_v60  ;;  %v2488_v1 = vmul.f32 1.442695, %v2377_v5  ;;  %v2141_v44 = vpop.f32.mrb[133].mxu1  ;;  %v2140_v39 = vadd.f32 %v5689_v0, %v2139_v53 }
 0x3a9   :  { %v2142_v62 = vpop.f32.mrb[134].mxu1  ;;  %v3887_v2 = vpop.eup %3886  ;;  %v2946_v11 = vmul.f32 %v4013_v21, %v3885_v10 }
 0x3aa   :  { %v3074_v9 = vmul.f32 %v3010_v54, %v5965_v51  ;;  %3898 = vpow2.f32 %v2488_v1  ;;  %v2143_v36 = vadd.f32 %v5689_v0, %v2142_v62  ;;  %v2144_v52 = vpop.f32.mrb[135].mxu1  ;;  %v3889_v35 = vpop.eup %3888  ;;  %v3011_v28 = vsub.f32 1.0, %v3887_v2  ;;  %3267 = vst [vmem:[#allocation9 + $0x148] sm:$0xff] %v3887_v2 }
 0x3ab   :  { %v3438_v49 = vclamps-f32 %v2140_v39, 5.0  ;;  %v2566_v32 = vadd.f32 1.0, %v3889_v35  ;;  %v2947_v7 = vmul.f32 %v4014_v57, %v3887_v2  ;;  %v5970_v57 = vld [vmem:[#allocation52_spill] sm:$0xff] }
 0x3ac   :  { %v3138_v34 = vadd.f32 %v3074_v9, %v2946_v11  ;;  %v3439_v41 = vclamps-f32 %v2143_v36, 5.0  ;;  %v3075_v20 = vmul.f32 %v3011_v28, %v5966_v22  ;;  %v4017_v11 = vld [vmem:[#allocation2 + $0x160] sm:$0xff] }
 0x3ad   :  { %v3891_v27 = vpop.eup %3890  ;;  %v2378_v15 = vsub.f32 0.0, %v3438_v49  ;;  %3900 = vrcp.f32 %v2566_v32  ;;  %v5969_v9 = vld [vmem:[#allocation51_spill] sm:$0xff] }
 0x3ae   :  { %3202 = vst [vmem:[#allocation8 + $0x140] sm:$0xff] %v3138_v34  ;;  %v2567_v55 = vadd.f32 1.0, %v3891_v27  ;;  %v2379_v31 = vsub.f32 0.0, %v3439_v41  ;;  %v3139_v6 = vadd.f32 %v3075_v20, %v2947_v7  ;;  %v4018_v41 = vld [vmem:[#allocation2 + $0x168] sm:$0xff] }
 0x3af   :  { %v3893_v38 = vpop.eup %3892  ;;  %v2490_v23 = vmul.f32 1.442695, %v2378_v15  ;;  %v2147_v30 = vpop.f32.mrb[136].mxu1 }
 0x3b0   :  { %v3012_v25 = vsub.f32 1.0, %v3893_v38  ;;  %3268 = vst [vmem:[#allocation9 + $0x150] sm:$0xff] %v3893_v38  ;;  %3902 = vrcp.f32 %v2567_v55  ;;  %v2492_v19 = vmul.f32 1.442695, %v2379_v31  ;;  %v2149_v16 = vpop.f32.mrb[137].mxu1  ;;  %3203 = vst [vmem:[#allocation8 + $0x148] sm:$0xff] %v3139_v6  ;;  %v2148_v13 = vadd.f32 %v5689_v0, %v2147_v30 }
 0x3b1   :  { %v3895_v59 = vpop.eup %3894  ;;  %3904 = vpow2.f32 %v2490_v23  ;;  %v2150_v45 = vpop.f32.mrb[138].mxu1  ;;  %v2948_v29 = vmul.f32 %v4015_v50, %v3893_v38 }
 0x3b2   :  { %v3897_v46 = vpop.eup %3896  ;;  %v3076_v8 = vmul.f32 %v3012_v25, %v5967_v3  ;;  %v3013_v18 = vsub.f32 1.0, %v3895_v59  ;;  %3269 = vst [vmem:[#allocation9 + $0x158] sm:$0xff] %v3895_v59  ;;  %3906 = vpow2.f32 %v2492_v19  ;;  %v2152_v17 = vpop.f32.mrb[139].mxu1  ;;  %v3440_v40 = vclamps-f32 %v2148_v13, 5.0 }
 0x3b3   :  { %v2568_v26 = vadd.f32 1.0, %v3897_v46  ;;  %v2151_v43 = vadd.f32 %v5689_v0, %v2150_v45  ;;  %v2949_v4 = vmul.f32 %v4016_v14, %v3895_v59  ;;  %v4019_v59 = vld [vmem:[#allocation2 + $0x170] sm:$0xff] }
 0x3b4   :  { %v3899_v63 = vpop.eup %3898  ;;  %v3140_v61 = vadd.f32 %v3076_v8, %v2948_v29  ;;  %v3077_v58 = vmul.f32 %v3013_v18, %v5968_v47  ;;  %v2380_v24 = vsub.f32 0.0, %v3440_v40  ;;  %v5971_v45 = vld [vmem:[#allocation53_spill] sm:$0xff]  ;;  %v5759_v18 = vld [vmem:[%s5824_s7] ss:$0 sm:$0xff]  ;;  %s4164_s7 = smov [#allocation9]  }
 0x3b5   :  { %3908 = vrcp.f32 %v2568_v26  ;;  %v2569_v56 = vadd.f32 1.0, %v3899_v63  ;;  %v3441_v42 = vclamps-f32 %v2151_v43, 5.0  ;;  %v5972_v43 = vld [vmem:[#allocation54_spill] sm:$0xff]  ;;  %s3307_s2 = sshll.u32 %s4164_s7, 4  ;;  %s3308_s2 = int_to_ptr.vmem [resolvable:$true] %s3307_s2 }
 0x3b6   :  { %3204 = vst [vmem:[#allocation8 + $0x150] sm:$0xff] %v3140_v61  ;;  %v3141_v33 = vadd.f32 %v3077_v58, %v2949_v4  ;;  %v2494_v12 = vmul.f32 1.442695, %v2380_v24  ;;  %s4104_s0 = scalar_lea.vmem %s3308_s2, 8192  ;;  %p4109_p11 = scmp.lt.s32.totalorder %s3308_s2, %s3308_s2 }
 0x3b7   :  { %3910 = vrcp.f32 %v2569_v56  ;;  %v2381_v37 = vsub.f32 0.0, %v3441_v42  ;;  %v2155_v48 = vpop.f32.mrb[140].mxu1  ;;  %v3901_v60 = vpop.eup %3900  ;;  %p4105_p10 = scmp.ne.s32.totalorder %s3308_s2, %s4104_s0  ;;  %p4110_p12 = scmp.lt.s32.totalorder %s4104_s0, %s4104_s0 }
 0x3b8   :  { %3205 = vst [vmem:[#allocation8 + $0x158] sm:$0xff] %v3141_v33  ;;  %v2156_v5 = vadd.f32 %v5689_v0, %v2155_v48  ;;  %v2157_v10 = vpop.f32.mrb[141].mxu1  ;;  %v3014_v53 = vsub.f32 1.0, %v3901_v60  ;;  %3270 = vst [vmem:[#allocation9 + $0x160] sm:$0xff] %v3901_v60  ;;  %3912 = vpow2.f32 %v2494_v12  ;;  %v2950_v51 = vmul.f32 %v4017_v11, %v3901_v60  ;;  %v5973_v11 = vld [vmem:[#allocation55_spill] sm:$0xff] }
 0x3b9   :  { %v2496_v54 = vmul.f32 1.442695, %v2381_v37  ;;  %v2158_v1 = vpop.f32.mrb[142].mxu1  ;;  %p4111_p13 = por %p4110_p12, %p4109_p11 }
 0x3ba   :  { %v3903_v44 = vpop.eup %3902  ;;  %v3442_v39 = vclamps-f32 %v2156_v5, 5.0  ;;  %v2159_v62 = vadd.f32 %v5689_v0, %v2158_v1  ;;  %v2160_v2 = vpop.f32.mrb[143].mxu1  ;;  %v3078_v36 = vmul.f32 %v3014_v53, %v5969_v9 }
 0x3bb   :  { %v3905_v21 = vpop.eup %3904  ;;  %v3015_v52 = vsub.f32 1.0, %v3903_v44  ;;  %3271 = vst [vmem:[#allocation9 + $0x168] sm:$0xff] %v3903_v44  ;;  %3914 = vpow2.f32 %v2496_v54  ;;  %v2951_v27 = vmul.f32 %v4018_v41, %v3903_v44  ;;  %v4022_v2 = vld [vmem:[#allocation2 + $0x180] sm:$0xff]  ;;  %p4112_p0 = pnand %p4111_p13, %p4105_p10 }
 0x3bc   :  { %v3907_v35 = vpop.eup %3906  ;;  %v2570_v28 = vadd.f32 1.0, %v3905_v21  ;;  %v2382_v49 = vsub.f32 0.0, %v3442_v39  ;;  %v3443_v34 = vclamps-f32 %v2159_v62, 5.0  ;;  %v3142_v32 = vadd.f32 %v3078_v36, %v2950_v51 }
 0x3bd   :  { %v3079_v7 = vmul.f32 %v3015_v52, %v5970_v57  ;;  %v2571_v22 = vadd.f32 1.0, %v3907_v35  ;;  %v4023_v52 = vld [vmem:[#allocation2 + $0x188] sm:$0xff] }
 0x3be   :  { %3916 = vrcp.f32 %v2570_v28  ;;  %v2498_v20 = vmul.f32 1.442695, %v2382_v49  ;;  %v2383_v15 = vsub.f32 0.0, %v3443_v34  ;;  %3206 = vst [vmem:[#allocation8 + $0x160] sm:$0xff] %v3142_v32  ;;  %v5974_v28 = vld [vmem:[#allocation56_spill] sm:$0xff] }
 0x3bf   :  { %v3909_v55 = vpop.eup %3908  ;;  %v3143_v31 = vadd.f32 %v3079_v7, %v2951_v27  ;;  %3918 = vrcp.f32 %v2571_v22  ;;  %v2163_v38 = vpop.f32.mrb[144].mxu1 }
 0x3c0   :  { %v3016_v6 = vsub.f32 1.0, %v3909_v55  ;;  %3272 = vst [vmem:[#allocation9 + $0x170] sm:$0xff] %v3909_v55  ;;  %3920 = vpow2.f32 %v2498_v20  ;;  %v2500_v23 = vmul.f32 1.442695, %v2383_v15  ;;  %v2165_v30 = vpop.f32.mrb[145].mxu1  ;;  %v2164_v19 = vadd.f32 %v5689_v0, %v2163_v38  ;;  %v4021_v0 = vld [vmem:[#allocation2 + $0x178] sm:$0xff] }
 0x3c1   :  { %v3911_v25 = vpop.eup %3910  ;;  %3207 = vst [vmem:[#allocation8 + $0x168] sm:$0xff] %v3143_v31  ;;  %v2166_v16 = vpop.f32.mrb[146].mxu1  ;;  %v2952_v13 = vmul.f32 %v4019_v59, %v3909_v55 }
 0x3c2   :  { %v3080_v46 = vmul.f32 %v3016_v6, %v5971_v45  ;;  %v3017_v50 = vsub.f32 1.0, %v3911_v25  ;;  %3273 = vst [vmem:[#allocation9 + $0x178] sm:$0xff] %v3911_v25  ;;  %3922 = vpow2.f32 %v2500_v23  ;;  %v2168_v29 = vpop.f32.mrb[147].mxu1  ;;  %v3913_v3 = vpop.eup %3912  ;;  %v3444_v8 = vclamps-f32 %v2164_v19, 5.0 }
 0x3c3   :  { %v2167_v17 = vadd.f32 %v5759_v18, %v2166_v16  ;;  %v2953_v40 = vmul.f32 %v4021_v0, %v3911_v25  ;;  %v2572_v61 = vadd.f32 1.0, %v3913_v3 }
 0x3c4   :  { %v3144_v26 = vadd.f32 %v3080_v46, %v2952_v13  ;;  %v3081_v63 = vmul.f32 %v3017_v50, %v5972_v43  ;;  %v2384_v4 = vsub.f32 0.0, %v3444_v8  ;;  %v4024_v13 = vld [vmem:[#allocation2 + $0x190] sm:$0xff] }
 0x3c5   :  { %v3915_v14 = vpop.eup %3914  ;;  %v3445_v47 = vclamps-f32 %v2167_v17, 5.0  ;;  %3924 = vrcp.f32 %v2572_v61  ;;  %v5975_v46 = vld [vmem:[#allocation57_spill] sm:$0xff] }
 0x3c6   :  { %3208 = vst [vmem:[#allocation8 + $0x170] sm:$0xff] %v3144_v26  ;;  %v3145_v58 = vadd.f32 %v3081_v63, %v2953_v40  ;;  %v2573_v56 = vadd.f32 1.0, %v3915_v14  ;;  %v2502_v24 = vmul.f32 1.442695, %v2384_v4  ;;  %v4025_v40 = vld [vmem:[#allocation2 + $0x198] sm:$0xff] }
 0x3c7   :  { %v2385_v42 = vsub.f32 0.0, %v3445_v47  ;;  %v2171_v33 = vpop.f32.mrb[148].mxu1  ;;  %v5976_v63 = vld [vmem:[#allocation58_spill] sm:$0xff] }
 0x3c8   :  { %v3917_v12 = vpop.eup %3916  ;;  %3209 = vst [vmem:[#allocation8 + $0x178] sm:$0xff] %v3145_v58  ;;  %3926 = vrcp.f32 %v2573_v56  ;;  %v2172_v37 = vadd.f32 %v5759_v18, %v2171_v33  ;;  %v2173_v48 = vpop.f32.mrb[149].mxu1 }
 0x3c9   :  { %v3919_v60 = vpop.eup %3918  ;;  %v3018_v5 = vsub.f32 1.0, %v3917_v12  ;;  %3274 = vst [vmem:[#allocation9 + $0x180] sm:$0xff] %v3917_v12  ;;  %3928 = vpow2.f32 %v2502_v24  ;;  %v2504_v10 = vmul.f32 1.442695, %v2385_v42  ;;  %v2174_v53 = vpop.f32.mrb[150].mxu1  ;;  %v2954_v21 = vmul.f32 %v4022_v2, %v3917_v12 }
 0x3ca   :  { %v3921_v54 = vpop.eup %3920  ;;  %v3019_v1 = vsub.f32 1.0, %v3919_v60  ;;  %3275 = vst [vmem:[#allocation9 + $0x188] sm:$0xff] %v3919_v60  ;;  %v3446_v44 = vclamps-f32 %v2172_v37, 5.0  ;;  %v2175_v39 = vadd.f32 %v5759_v18, %v2174_v53  ;;  %v2176_v62 = vpop.f32.mrb[151].mxu1  ;;  %v2955_v35 = vmul.f32 %v4023_v52, %v3919_v60  ;;  %v5978_v52 = vld [vmem:[#allocation60_spill] sm:$0xff] }
 0x3cb   :  { %v3082_v51 = vmul.f32 %v3018_v5, %v5973_v11  ;;  %v2574_v9 = vadd.f32 1.0, %v3921_v54  ;;  %3930 = vpow2.f32 %v2504_v10  ;;  %v4026_v10 = vld [vmem:[#allocation2 + $0x1a0] sm:$0xff] }
 0x3cc   :  { %v3923_v36 = vpop.eup %3922  ;;  %v3083_v49 = vmul.f32 %v3019_v1, %v5974_v28  ;;  %v2386_v34 = vsub.f32 0.0, %v3446_v44  ;;  %v3447_v32 = vclamps-f32 %v2175_v39, 5.0  ;;  %v5977_v54 = vld [vmem:[#allocation59_spill] sm:$0xff] }
 0x3cd   :  { %v3146_v41 = vadd.f32 %v3082_v51, %v2954_v21  ;;  %3932 = vrcp.f32 %v2574_v9  ;;  %v2575_v27 = vadd.f32 1.0, %v3923_v36  ;;  %v4027_v9 = vld [vmem:[#allocation2 + $0x1a8] sm:$0xff] }
 0x3ce   :  { %v3147_v57 = vadd.f32 %v3083_v49, %v2955_v35  ;;  %v2506_v7 = vmul.f32 1.442695, %v2386_v34  ;;  %v2387_v22 = vsub.f32 0.0, %v3447_v32 }
 0x3cf   :  { %3210 = vst [vmem:[#allocation8 + $0x180] sm:$0xff] %v3146_v41  ;;  %3934 = vrcp.f32 %v2575_v27  ;;  %v2179_v20 = vpop.f32.mrb[152].mxu1  ;;  %v3925_v15 = vpop.eup %3924 }
 0x3d0   :  { %3211 = vst [vmem:[#allocation8 + $0x188] sm:$0xff] %v3147_v57  ;;  %3936 = vpow2.f32 %v2506_v7  ;;  %v2508_v55 = vmul.f32 1.442695, %v2387_v22  ;;  %v2180_v31 = vadd.f32 %v5759_v18, %v2179_v20  ;;  %v2181_v38 = vpop.f32.mrb[153].mxu1  ;;  %v3020_v6 = vsub.f32 1.0, %v3925_v15  ;;  %3276 = vst [vmem:[#allocation9 + $0x190] sm:$0xff] %v3925_v15 }
 0x3d1   :  { %v2182_v23 = vpop.f32.mrb[154].mxu1  ;;  %v2956_v45 = vmul.f32 %v4024_v13, %v3925_v15 }
 0x3d2   :  { %v3927_v30 = vpop.eup %3926  ;;  %3938 = vpow2.f32 %v2508_v55  ;;  %v3448_v25 = vclamps-f32 %v2180_v31, 5.0  ;;  %v2183_v19 = vadd.f32 %v5759_v18, %v2182_v23  ;;  %v2184_v16 = vpop.f32.mrb[155].mxu1  ;;  %v3084_v50 = vmul.f32 %v3020_v6, %v5975_v46 }
 0x3d3   :  { %v3929_v59 = vpop.eup %3928  ;;  %v3021_v29 = vsub.f32 1.0, %v3927_v30  ;;  %3277 = vst [vmem:[#allocation9 + $0x198] sm:$0xff] %v3927_v30  ;;  %v2957_v43 = vmul.f32 %v4025_v40, %v3927_v30 }
 0x3d4   :  { %v2576_v3 = vadd.f32 1.0, %v3929_v59  ;;  %v2388_v8 = vsub.f32 0.0, %v3448_v25  ;;  %v3449_v17 = vclamps-f32 %v2183_v19, 5.0  ;;  %v3148_v0 = vadd.f32 %v3084_v50, %v2956_v45  ;;  %v4028_v19 = vld [vmem:[#allocation2 + $0x1b0] sm:$0xff] }
 0x3d5   :  { %v3931_v26 = vpop.eup %3930  ;;  %v3085_v61 = vmul.f32 %v3021_v29, %v5976_v63  ;;  %v5979_v59 = vld [vmem:[#allocation61_spill] sm:$0xff] }
 0x3d6   :  { %3940 = vrcp.f32 %v2576_v3  ;;  %v2577_v14 = vadd.f32 1.0, %v3931_v26  ;;  %v2510_v4 = vmul.f32 1.442695, %v2388_v8  ;;  %v2389_v47 = vsub.f32 0.0, %v3449_v17  ;;  %3212 = vst [vmem:[#allocation8 + $0x190] sm:$0xff] %v3148_v0  ;;  %v4029_v17 = vld [vmem:[#allocation2 + $0x1b8] sm:$0xff] }
 0x3d7   :  { %v3933_v58 = vpop.eup %3932  ;;  %v3149_v56 = vadd.f32 %v3085_v61, %v2957_v43  ;;  %v2187_v24 = vpop.f32.mrb[156].mxu1  ;;  %v5980_v0 = vld [vmem:[#allocation62_spill] sm:$0xff] }
 0x3d8   :  { %v3022_v42 = vsub.f32 1.0, %v3933_v58  ;;  %3278 = vst [vmem:[#allocation9 + $0x1a0] sm:$0xff] %v3933_v58  ;;  %3942 = vrcp.f32 %v2577_v14  ;;  %v2512_v33 = vmul.f32 1.442695, %v2389_v47  ;;  %v2189_v12 = vpop.f32.mrb[157].mxu1  ;;  %v2188_v48 = vadd.f32 %v5759_v18, %v2187_v24 }
 0x3d9   :  { %v3935_v37 = vpop.eup %3934  ;;  %3213 = vst [vmem:[#allocation8 + $0x198] sm:$0xff] %v3149_v56  ;;  %3944 = vpow2.f32 %v2510_v4  ;;  %v2190_v60 = vpop.f32.mrb[158].mxu1  ;;  %v2958_v53 = vmul.f32 %v4026_v10, %v3933_v58  ;;  %v4030_v56 = vld [vmem:[#allocation2 + $0x1c0] sm:$0xff]  ;;  %v5982_v10 = vld [vmem:[#allocation68_spill] sm:$0xff] }
 0x3da   :  { %v3937_v5 = vpop.eup %3936  ;;  %v3086_v1 = vmul.f32 %v3022_v42, %v5977_v54  ;;  %v3023_v44 = vsub.f32 1.0, %v3935_v37  ;;  %3279 = vst [vmem:[#allocation9 + $0x1a8] sm:$0xff] %v3935_v37  ;;  %3946 = vpow2.f32 %v2512_v33  ;;  %v2192_v39 = vpop.f32.mrb[159].mxu1  ;;  %v3450_v2 = vclamps-f32 %v2188_v48, 5.0  ;;  %v5981_v42 = vld [vmem:[#allocation67_spill] sm:$0xff] }
 0x3db   :  { %v2578_v62 = vadd.f32 1.0, %v3937_v5  ;;  %v2191_v21 = vadd.f32 %v5759_v18, %v2190_v60  ;;  %v2959_v36 = vmul.f32 %v4027_v9, %v3935_v37  ;;  %v4031_v60 = vld [vmem:[#allocation2 + $0x1c8] sm:$0xff]  ;;  %v4032_v9 = vld [vmem:[#allocation2 + $0x1d0] sm:$0xff] }
 0x3dc   :  { %v3939_v11 = vpop.eup %3938  ;;  %v3150_v51 = vadd.f32 %v3086_v1, %v2958_v53  ;;  %v3087_v35 = vmul.f32 %v3023_v44, %v5978_v52  ;;  %v2390_v49 = vsub.f32 0.0, %v3450_v2  ;;  %v5983_v52 = vld [vmem:[#allocation69_spill] sm:$0xff] }
 0x3dd   :  { %3948 = vrcp.f32 %v2578_v62  ;;  %v2579_v28 = vadd.f32 1.0, %v3939_v11  ;;  %v3451_v34 = vclamps-f32 %v2191_v21, 5.0 }
 0x3de   :  { %3214 = vst [vmem:[#allocation8 + $0x1a0] sm:$0xff] %v3150_v51  ;;  %v3151_v32 = vadd.f32 %v3087_v35, %v2959_v36  ;;  %v2514_v41 = vmul.f32 1.442695, %v2390_v49 }
 0x3df   :  { %3950 = vrcp.f32 %v2579_v28  ;;  %v2391_v27 = vsub.f32 0.0, %v3451_v34  ;;  %v2195_v57 = vpop.f32.mrb[160].mxu1  ;;  %v4033_v34 = vld [vmem:[#allocation2 + $0x1d8] sm:$0xff] }
 0x3e0   :  { %v3941_v7 = vpop.eup %3940  ;;  %3215 = vst [vmem:[#allocation8 + $0x1a8] sm:$0xff] %v3151_v32  ;;  %v2196_v22 = vadd.f32 %v5759_v18, %v2195_v57  ;;  %v2197_v20 = vpop.f32.mrb[161].mxu1  ;;  %3952 = vpow2.f32 %v2514_v41  ;;  %v5984_v41 = vld [vmem:[#allocation70_spill] sm:$0xff] }
 0x3e1   :  { %v3024_v15 = vsub.f32 1.0, %v3941_v7  ;;  %3280 = vst [vmem:[#allocation9 + $0x1b0] sm:$0xff] %v3941_v7  ;;  %v2516_v55 = vmul.f32 1.442695, %v2391_v27  ;;  %v2198_v31 = vpop.f32.mrb[162].mxu1  ;;  %v2960_v16 = vmul.f32 %v4028_v19, %v3941_v7  ;;  %v4035_v19 = vld [vmem:[#allocation2 + $0x1e8] sm:$0xff] }
 0x3e2   :  { %v3943_v38 = vpop.eup %3942  ;;  %v3452_v6 = vclamps-f32 %v2196_v22, 5.0  ;;  %v2199_v23 = vadd.f32 %v5759_v18, %v2198_v31  ;;  %v2200_v30 = vpop.f32.mrb[163].mxu1  ;;  %v4034_v31 = vld [vmem:[#allocation2 + $0x1e0] sm:$0xff] }
 0x3e3   :  { %v3945_v25 = vpop.eup %3944  ;;  %v3088_v13 = vmul.f32 %v3024_v15, %v5979_v59  ;;  %v3025_v45 = vsub.f32 1.0, %v3943_v38  ;;  %3281 = vst [vmem:[#allocation9 + $0x1b8] sm:$0xff] %v3943_v38  ;;  %3954 = vpow2.f32 %v2516_v55  ;;  %v2961_v26 = vmul.f32 %v4029_v17, %v3943_v38  ;;  %v5986_v59 = vld [vmem:[#allocation73_spill] sm:$0xff]  ;;  %v5987_v17 = vld [vmem:[#allocation76_spill] sm:$0xff] }
 0x3e4   :  { %v3947_v46 = vpop.eup %3946  ;;  %v2580_v50 = vadd.f32 1.0, %v3945_v25  ;;  %v2392_v29 = vsub.f32 0.0, %v3452_v6  ;;  %v3453_v3 = vclamps-f32 %v2199_v23, 5.0  ;;  %v5985_v6 = vld [vmem:[#allocation72_spill] sm:$0xff] }
 0x3e5   :  { %v3152_v8 = vadd.f32 %v3088_v13, %v2960_v16  ;;  %v3089_v40 = vmul.f32 %v3025_v45, %v5980_v0  ;;  %v2581_v43 = vadd.f32 1.0, %v3947_v46 }
 0x3e6   :  { %3956 = vrcp.f32 %v2580_v50  ;;  %v2518_v18 = vmul.f32 1.442695, %v2392_v29  ;;  %v2393_v63 = vsub.f32 0.0, %v3453_v3  ;;  %v4036_v3 = vld [vmem:[#allocation2 + $0x1f0] sm:$0xff] }
 0x3e7   :  { %v3949_v61 = vpop.eup %3948  ;;  %3216 = vst [vmem:[#allocation8 + $0x1b0] sm:$0xff] %v3152_v8  ;;  %v3153_v14 = vadd.f32 %v3089_v40, %v2961_v26  ;;  %3958 = vrcp.f32 %v2581_v43 }
 0x3e8   :  { %v3026_v4 = vsub.f32 1.0, %v3949_v61  ;;  %3282 = vst [vmem:[#allocation9 + $0x1c0] sm:$0xff] %v3949_v61  ;;  %3960 = vpow2.f32 %v2518_v18  ;;  %v2520_v47 = vmul.f32 1.442695, %v2393_v63  ;;  %v2962_v24 = vmul.f32 %v4030_v56, %v3949_v61 }
 0x3e9   :  { %v3951_v58 = vpop.eup %3950  ;;  %3217 = vst [vmem:[#allocation8 + $0x1b8] sm:$0xff] %v3153_v14 }
 0x3ea   :  { %v3090_v33 = vmul.f32 %v3026_v4, %v5981_v42  ;;  %v3027_v12 = vsub.f32 1.0, %v3951_v58  ;;  %3283 = vst [vmem:[#allocation9 + $0x1c8] sm:$0xff] %v3951_v58  ;;  %3962 = vpow2.f32 %v2520_v47  ;;  %v3953_v37 = vpop.eup %3952  ;;  %v2963_v5 = vmul.f32 %v4031_v60, %v3951_v58 }
 0x3eb   :  { %v2582_v54 = vadd.f32 1.0, %v3953_v37 }
 0x3ec   :  { %v3154_v48 = vadd.f32 %v3090_v33, %v2962_v24  ;;  %v3091_v53 = vmul.f32 %v3027_v12, %v5982_v10 }
 0x3ed   :  { %v3955_v1 = vpop.eup %3954  ;;  %3964 = vrcp.f32 %v2582_v54 }
 0x3ee   :  { %3218 = vst [vmem:[#allocation8 + $0x1c0] sm:$0xff] %v3154_v48  ;;  %v3155_v44 = vadd.f32 %v3091_v53, %v2963_v5  ;;  %v2583_v39 = vadd.f32 1.0, %v3955_v1 }
 0x3f0   :  { %v3957_v62 = vpop.eup %3956  ;;  %3219 = vst [vmem:[#allocation8 + $0x1c8] sm:$0xff] %v3155_v44  ;;  %3966 = vrcp.f32 %v2583_v39 }
 0x3f1   :  { %v3959_v2 = vpop.eup %3958  ;;  %v3028_v21 = vsub.f32 1.0, %v3957_v62  ;;  %3284 = vst [vmem:[#allocation9 + $0x1d0] sm:$0xff] %v3957_v62  ;;  %v2964_v36 = vmul.f32 %v4032_v9, %v3957_v62 }
 0x3f2   :  { %v3961_v11 = vpop.eup %3960  ;;  %v3029_v51 = vsub.f32 1.0, %v3959_v2  ;;  %3285 = vst [vmem:[#allocation9 + $0x1d8] sm:$0xff] %v3959_v2  ;;  %v2965_v32 = vmul.f32 %v4033_v34, %v3959_v2 }
 0x3f3   :  { %v3092_v35 = vmul.f32 %v3028_v21, %v5983_v52  ;;  %v2584_v28 = vadd.f32 1.0, %v3961_v11 }
 0x3f4   :  { %v3963_v49 = vpop.eup %3962  ;;  %v3093_v27 = vmul.f32 %v3029_v51, %v5984_v41 }
 0x3f5   :  { %v3156_v57 = vadd.f32 %v3092_v35, %v2964_v36  ;;  %3968 = vrcp.f32 %v2584_v28  ;;  %v2585_v7 = vadd.f32 1.0, %v3963_v49 }
 0x3f6   :  { %v3157_v22 = vadd.f32 %v3093_v27, %v2965_v32 }
 0x3f7   :  { %3220 = vst [vmem:[#allocation8 + $0x1d0] sm:$0xff] %v3156_v57  ;;  %3970 = vrcp.f32 %v2585_v7  ;;  %v3965_v20 = vpop.eup %3964 }
 0x3f8   :  { %3221 = vst [vmem:[#allocation8 + $0x1d8] sm:$0xff] %v3157_v22  ;;  %v3030_v15 = vsub.f32 1.0, %v3965_v20  ;;  %3286 = vst [vmem:[#allocation9 + $0x1e0] sm:$0xff] %v3965_v20  ;;  %v2966_v38 = vmul.f32 %v4034_v31, %v3965_v20 }
 0x3fa   :  { %v3967_v55 = vpop.eup %3966  ;;  %v3094_v23 = vmul.f32 %v3030_v15, %v5985_v6 }
 0x3fb   :  { %v3031_v30 = vsub.f32 1.0, %v3967_v55  ;;  %3287 = vst [vmem:[#allocation9 + $0x1e8] sm:$0xff] %v3967_v55  ;;  %v2967_v16 = vmul.f32 %v4035_v19, %v3967_v55 }
 0x3fc   :  { %v3158_v25 = vadd.f32 %v3094_v23, %v2966_v38 }
 0x3fd   :  { %v3095_v13 = vmul.f32 %v3031_v30, %v5986_v59 }
 0x3fe   :  { %3222 = vst [vmem:[#allocation8 + $0x1e0] sm:$0xff] %v3158_v25 }
 0x3ff   :  { %v3969_v45 = vpop.eup %3968  ;;  %v3159_v46 = vadd.f32 %v3095_v13, %v2967_v16 }
 0x400   :  { %v3032_v50 = vsub.f32 1.0, %v3969_v45  ;;  %3288 = vst [vmem:[#allocation9 + $0x1f0] sm:$0xff] %v3969_v45  ;;  %v2968_v8 = vmul.f32 %v4036_v3, %v3969_v45 }
 0x401   :  { %v3971_v29 = vpop.eup %3970  ;;  %3223 = vst [vmem:[#allocation8 + $0x1e8] sm:$0xff] %v3159_v46 }
 0x402   :  { %v3096_v26 = vmul.f32 %v3032_v50, %v5987_v17  ;;  %v3033_v0 = vsub.f32 1.0, %v3971_v29  ;;  %3289 = vst [vmem:[#allocation9 + $0x1f8] sm:$0xff] %v3971_v29 }
 0x403   :  { %4115 = shalt.err (!%p4112_p0)
}
 0x404   :  { %s4116_s27 = scalar_lea.hbm %s5826_s9, 8192 }
 0x405   :  { %p4117_p1 = scmp.ne.s32.totalorder %s5826_s9, %s4116_s27  ;;  %p4120_p2 = scmp.lt.u32.totalorder %s4116_s27, %s5826_s9 }
 0x407   :  { %p4122_p3 = pnand %p4120_p2, %p4117_p1 }
 0x409   :  { %4125 = shalt.err (!%p4122_p3)
}
 0x40a   :  { %3313 = dma.vmem_to_hbm [thread:$0]  %s3308_s2, 8192, %s5826_s9, [#allocation10], %s4158_s21, %s4158_s21, %s4159_s22   ;;  %v3160_v40 = vadd.f32 %v3096_v26, %v2968_v8  ;;  %v4037_v43 = vld [vmem:[#allocation2 + $0x1f8] sm:$0xff]  ;;  %v5988_v63 = vld [vmem:[#allocation77_spill] sm:$0xff] }
 0x40b   :  { %v2969_v18 = vmul.f32 %v4037_v43, %v3971_v29  ;;  %v3097_v61 = vmul.f32 %v3033_v0, %v5988_v63  ;;  %s4126_s6 = scalar_lea.vmem %s3296_s25, 8192  ;;  %p4131_p5 = scmp.lt.s32.totalorder %s3296_s25, %s3296_s25 }
 0x40c   :  { %3224 = vst [vmem:[#allocation8 + $0x1f0] sm:$0xff] %v3160_v40  ;;  %p4127_p4 = scmp.ne.s32.totalorder %s3296_s25, %s4126_s6  ;;  %p4132_p6 = scmp.lt.s32.totalorder %s4126_s6, %s4126_s6 }
 0x40d   :  { %v3161_v14 = vadd.f32 %v3097_v61, %v2969_v18 }
 0x40e   :  { %p4133_p7 = por %p4132_p6, %p4131_p5 }
 0x40f   :  { %3225 = vst [vmem:[#allocation8 + $0x1f8] sm:$0xff] %v3161_v14 }
 0x410   :  { %p4134_p8 = pnand %p4133_p7, %p4127_p4 }
 0x412   :  { %4137 = shalt.err (!%p4134_p8)
}
 0x413   :  { %s4138_s9 = scalar_lea.hbm %s5825_s8, 8192 }
 0x414   :  { %p4139_p9 = scmp.ne.s32.totalorder %s5825_s8, %s4138_s9  ;;  %p4142_p10 = scmp.lt.u32.totalorder %s4138_s9, %s5825_s8 }
 0x416   :  { %p4144_p11 = pnand %p4142_p10, %p4139_p9 }
 0x418   :  { %4147 = shalt.err (!%p4144_p11)
}
 0x419   :  { %3301 = dma.vmem_to_hbm [thread:$0]  %s3296_s25, 8192, %s5825_s8, [#allocation4], %s4158_s21, %s4158_s21, %s4159_s22  }
 0x41a   :  { %4152 = dma.done.wait [#allocation4], 8192  }
 0x41b   :  { %4153 = vsyncadd [#allocation4], 4294959104 }
 0x41c   :  { %4154 = dma.done.wait [#allocation10], 8192  }
 0x41d   :  { %4155 = vsyncadd [#allocation10], 4294959104 }
 0x41e   :  { %3320 = vsyncpa [#allocation3], 1 }
 0x41f   :  { %3321 = vsyncpa [#allocation6], 1 }
 0x420   :  { %3322 = vsyncpa [#allocation4], 1 }
 0x421   :  { %3323 = vsyncpa [#allocation10], 1 }

</bundles_post_ra>
